<compile_context>
chip_gen: v5e
topology: v5e:2x2
jax: 0.10.0
libtpu: 0.0.40
codegen_flags: <defaults>
</compile_context>

<pallas_src>
import functools

import jax
import jax.numpy as jnp
from jax import lax
from jax.experimental import pallas as pl
from jax.experimental.pallas import tpu as pltpu


# --------------------------- hardware-aware knobs --------------------------- #

def _tensorcores_per_chip() -> int:
    """2 for dual-TC chips (v7x; v4/v5p megacore), 1 for v5e/v6e, 1 on failure."""
    try:
        kind = jax.devices()[0].device_kind.lower()
    except Exception:
        return 1
    if "lite" in kind:                           # v5e / v6e report "... lite"
        return 1
    for tag in ("v7", "7x", "v5p", "v4"):
        if tag in kind:
            return 2
    return 1


def _vmem_capacity_bytes() -> int:
    try:
        return int(pltpu.get_tpu_info().vmem_capacity_bytes)
    except Exception:
        return 64 << 20                          # conservative: v7x per-TC VMEM


def _vmem_estimate_bytes(block_b, N, C, H, Dhp, Dout) -> int:
    f32 = 4
    weights = (C * H * Dhp + H * Dhp * H + H * H * Dhp
               + H * Dhp * Dout + 2 * Dout) * f32
    io = 2 * block_b * N * (C + Dout) * f32                   # double-buffered windows
    live = (N * H * Dhp + N * H + H * N                        # wh_all, wh1_all, wh2_all
            + 3 * N * N + N * Dhp + 2 * N * Dout) * f32        # e/att/ex, hp, who/out
    return weights + io + live


def _pick_batch_block(B, N, C, H, Dhp, Dout) -> int:
    n_tc = _tensorcores_per_chip()
    if n_tc >= 2 and B >= 2:
        # Dual-TC: keep >=2 parallel grid steps so both cores get work, but as
        # few steps as possible to amortize the per-step pipeline overhead.
        bb = B // 2 if B % 2 == 0 else 1
    else:
        # Single-TC v5e/v6e: collapse the grid to one step.
        bb = B
    # Cap block_b so the per-step working set stays well inside VMEM (v7x: 64 MiB).
    budget = _vmem_capacity_bytes() // 2
    while bb > 1 and _vmem_estimate_bytes(bb, N, C, H, Dhp, Dout) > budget:
        bb -= 1
        while B % bb:
            bb -= 1
    return bb


# ----------------------------- kernel helpers ------------------------------ #

def _gat_softmax_matmul(e, wh, alpha):
    """LeakyReLU -> sigmoid -> softmax over rows (axis 0, == torch dim=1) -> @ wh."""
    e = jnp.where(e > 0, e, alpha * e)
    att = jax.nn.sigmoid(e)
    # sigmoid output is in (0,1): exp() cannot overflow, so the max-subtraction
    # is dropped (softmax is shift-invariant; saves one cross-sublane reduce).
    ex = jnp.exp(att)
    # (1,N) reciprocal + broadcast multiply instead of an (N,N)-wide divide.
    inv = 1.0 / jnp.sum(ex, axis=0, keepdims=True)
    att = ex * inv
    return jnp.dot(att, wh, preferred_element_type=jnp.float32)


def _fused_stl_kernel(x_ref, wcat_ref, a1_ref, a2_ref, wo_ref, ao_ref, out_ref, *,
                      alpha, nheads, dhp, block_b):
    """Whole Spatial_Transformer_layer for `block_b` batch elements.

    x_ref    : (block_b, N, C)
    wcat_ref : (C, H*Dhp)    per-head W, each head zero-padded to Dhp lanes
    a1_ref   : (H*Dhp, H)    block matrix with a_k[:Dh] in rows [k*Dhp : k*Dhp+Dh]
    a2_ref   : (H, H*Dhp)    block matrix with a_k[Dh:] in cols [k*Dhp : k*Dhp+Dh]
    wo_ref   : (H*Dhp, Dout) output-attention W, rows padded per head
    ao_ref   : (2, Dout)     output-attention [a[:Dout]^T ; a[Dout:]^T]
    out_ref  : (block_b, N, Dout)
    """
    # Hoist all weight loads out of the batch loop.
    wcat = wcat_ref[...]
    a1 = a1_ref[...]
    a2 = a2_ref[...]
    ao1 = ao_ref[0:1, :]
    ao2 = ao_ref[1:2, :]
    wos = [wo_ref[k * dhp:(k + 1) * dhp, :] for k in range(nheads)]

    def one_element(h):                               # h: (N, C)
        # One matmul covers all heads; head slices below are lane-aligned (128).
        wh_all = jnp.dot(h, wcat, preferred_element_type=jnp.float32)      # (N, H*Dhp)
        # Two wide dots replace 2*H width-1 a-vector dots.
        wh1_all = jnp.dot(wh_all, a1, preferred_element_type=jnp.float32)  # (N, H)
        wh2_all = lax.dot_general(a2, wh_all, (((1,), (1,)), ((), ())),
                                  preferred_element_type=jnp.float32)      # (H, N)
        who = None
        for k in range(nheads):
            wh_k = wh_all[:, k * dhp:(k + 1) * dhp]                        # free slice
            e = wh1_all[:, k:k + 1] + wh2_all[k:k + 1, :]                  # (N, N)
            hp = _gat_softmax_matmul(e, wh_k, alpha)                       # (N, Dhp)
            # ELU (alpha=1); clamp so the discarded branch never produces inf.
            hp = jnp.where(hp > 0, hp, jnp.exp(jnp.minimum(hp, 0.0)) - 1.0)
            # concat(heads) @ W_out  ==  sum_k hp_k @ W_out[k*Dh:(k+1)*Dh]
            contrib = jnp.dot(hp, wos[k], preferred_element_type=jnp.float32)
            who = contrib if who is None else who + contrib                # (N, Dout)

        # Output attention (concat=False) + the transformer layer's ReLU.
        w1 = lax.dot_general(who, ao1, (((1,), (1,)), ((), ())),
                             preferred_element_type=jnp.float32)           # (N, 1)
        w2 = lax.dot_general(ao2, who, (((1,), (1,)), ((), ())),
                             preferred_element_type=jnp.float32)           # (1, N)
        out = _gat_softmax_matmul(w1 + w2, who, alpha)                     # (N, Dout)
        return jnp.maximum(out, 0.0)

    if block_b <= 4:
        # Tiny block: static unroll gives the LLO scheduler full visibility.
        for b in range(block_b):
            out_ref[b] = one_element(x_ref[b]).astype(out_ref.dtype)
    else:
        # Larger block: bounded live ranges, modest unroll.
        def body(b, carry):
            out_ref[b] = one_element(x_ref[b]).astype(out_ref.dtype)
            return carry
        lax.fori_loop(0, block_b, body, 0, unroll=2)


# ------------------------------ host wrapper ------------------------------- #

def spatial_transformer_layer(x, params, alpha=0.2, batch_block=None):
    """x: (B, N, F*T) -> (B, N, out_features).  One fused pallas_call."""
    B, N, C = x.shape
    heads = params["heads"]
    H = len(heads)
    Dh = heads[0]["W"].shape[1]
    Wo = params["out"]["W"]                                  # (H*Dh, Dout)
    Dout = Wo.shape[1]
    Dhp = max(128, pl.cdiv(Dh, 128) * 128)                   # lane-aligned per-head width
    HD = H * Dhp

    # Host-side parameter packing (pure glue; constant-folded under jit).
    wcat = jnp.zeros((C, HD), jnp.float32)
    a1p = jnp.zeros((HD, H), jnp.float32)
    a2p = jnp.zeros((H, HD), jnp.float32)
    wop = jnp.zeros((HD, Dout), jnp.float32)
    for k, p in enumerate(heads):
        lo = k * Dhp
        wcat = wcat.at[:, lo:lo + Dh].set(p["W"])
        a1p = a1p.at[lo:lo + Dh, k].set(p["a"][:Dh, 0])
        a2p = a2p.at[k, lo:lo + Dh].set(p["a"][Dh:, 0])
        wop = wop.at[lo:lo + Dh, :].set(Wo[k * Dh:(k + 1) * Dh, :])
    ao = params["out"]["a"].reshape(2, Dout)

    if batch_block is None:
        batch_block = _pick_batch_block(B, N, C, H, Dhp, Dout)
    assert B % batch_block == 0, "batch_block must divide the batch size"
    grid = (B // batch_block,)

    vmem_limit = int(min(3 * _vmem_capacity_bytes() // 4,
                         max(32 << 20,
                             2 * _vmem_estimate_bytes(batch_block, N, C, H, Dhp, Dout))))

    kern = functools.partial(_fused_stl_kernel, alpha=alpha, nheads=H,
                             dhp=Dhp, block_b=batch_block)
    out = pl.pallas_call(
        kern,
        out_shape=jax.ShapeDtypeStruct((B, N, Dout), jnp.float32),
        grid=grid,
        in_specs=[
            pl.BlockSpec((batch_block, N, C), lambda i: (i, 0, 0)),
            pl.BlockSpec((C, HD), lambda i: (0, 0)),
            pl.BlockSpec((HD, H), lambda i: (0, 0)),
            pl.BlockSpec((H, HD), lambda i: (0, 0)),
            pl.BlockSpec((HD, Dout), lambda i: (0, 0)),
            pl.BlockSpec((2, Dout), lambda i: (0, 0)),
        ],
        # Unpadded output: 1x HBM writeback, no follow-up XLA slice.
        out_specs=pl.BlockSpec((batch_block, N, Dout), lambda i: (i, 0, 0)),
        compiler_params=pltpu.CompilerParams(
            dimension_semantics=("parallel",),
            vmem_limit_bytes=vmem_limit),
    )(x, wcat, a1p, a2p, wop, ao)
    return out


# --------------------------- parameter creation ---------------------------- #

def _xavier_uniform(key, shape, gain):
    fan_sum = shape[0] + shape[1]
    bound = gain * (6.0 / fan_sum) ** 0.5
    return jax.random.uniform(key, shape, jnp.float32, -bound, bound)


def init_params(key, in_channels, out_features, nheads):
    D = out_features // nheads
    gain = 1.414
    heads = []
    for _ in range(nheads):
        key, k1, k2 = jax.random.split(key, 3)
        heads.append({
            "W": _xavier_uniform(k1, (in_channels, D), gain),
            "a": _xavier_uniform(k2, (2 * D, 1), gain),
        })
    key, k1, k2 = jax.random.split(key, 3)
    out = {
        "W": _xavier_uniform(k1, (nheads * D, out_features), gain),
        "a": _xavier_uniform(k2, (2 * out_features, 1), gain),
    }
    return {"heads": heads, "out": out}


# ------------------------------ pure-JAX ref ------------------------------- #

def _gat_ref(h, W, a, alpha, concat):
    D = W.shape[1]
    Wh = h @ W
    Wh1 = Wh @ a[:D]
    Wh2 = Wh @ a[D:]
    e = Wh1 + jnp.transpose(Wh2, (0, 2, 1))
    e = jnp.where(e > 0, e, alpha * e)
    att = jax.nn.sigmoid(e)
    att = jax.nn.softmax(att, axis=1)
    hp = jnp.einsum("bij,bjd->bid", att, Wh)
    if concat:
        hp = jnp.where(hp > 0, hp, jnp.exp(hp) - 1.0)
    return hp


def spatial_transformer_ref(x, params, alpha=0.2):
    outs = [_gat_ref(x, p["W"], p["a"], alpha, True) for p in params["heads"]]
    xcat = jnp.concatenate(outs, axis=2)
    out = _gat_ref(xcat, params["out"]["W"], params["out"]["a"], alpha, False)
    return jnp.maximum(out, 0.0)


# ---------------------------------- main ----------------------------------- #

if __name__ == "__main__":
    # Run all matmuls (kernel trace + reference) at f32 precision so the
    # f32-vs-f32 comparison below is meaningful on TPU.
    jax.config.update("jax_default_matmul_precision", "highest")

    B, N = 2, 16
    in_channels = 32      # F * T  (e.g. F=4, T=8)
    out_features = 32
    nheads = 2
    alpha = 0.2

    key = jax.random.PRNGKey(0)
    key, kx, kp = jax.random.split(key, 3)
    x = jax.random.normal(kx, (B, N, in_channels), dtype=jnp.float32)
    params = init_params(kp, in_channels, out_features, nheads)

    out = spatial_transformer_layer(x, params, alpha=alpha)
    out = jax.block_until_ready(out)

    ref = jax.block_until_ready(spatial_transformer_ref(x, params, alpha=alpha))
    assert out.shape == (B, N, out_features), out.shape
    max_err = float(jnp.max(jnp.abs(out - ref)))
    assert jnp.allclose(out, ref, rtol=1e-4, atol=1e-4), max_err

    print("KERNEL_OK")
</pallas_src>

<mosaic_0001>
module attributes {stable_mosaic.version = 11 : i64} {
  func.func @_fused_stl_kernel(%arg0: i32, %arg1: memref<2x16x32xf32, #tpu.memory_space<vmem>>, %arg2: memref<32x256xf32, #tpu.memory_space<vmem>>, %arg3: memref<256x2xf32, #tpu.memory_space<vmem>>, %arg4: memref<2x256xf32, #tpu.memory_space<vmem>>, %arg5: memref<256x32xf32, #tpu.memory_space<vmem>>, %arg6: memref<2x32xf32, #tpu.memory_space<vmem>>, %arg7: memref<2x16x32xf32, #tpu.memory_space<vmem>>) attributes {dimension_semantics = [#tpu.dimension_semantics<parallel>], iteration_bounds = array<i64: 1>, scalar_prefetch = 0 : i64, scratch_operands = 0 : i64, tpu.core_type = #tpu.core_type<tc>, window_params = [{transform_indices = @transform_0, window_bounds = array<i64: 2, 16, 32>}, {pipeline_mode = #tpu.pipeline_mode<synchronous>, transform_indices = @transform_1, window_bounds = array<i64: 32, 256>}, {pipeline_mode = #tpu.pipeline_mode<synchronous>, transform_indices = @transform_2, window_bounds = array<i64: 256, 2>}, {pipeline_mode = #tpu.pipeline_mode<synchronous>, transform_indices = @transform_3, window_bounds = array<i64: 2, 256>}, {pipeline_mode = #tpu.pipeline_mode<synchronous>, transform_indices = @transform_4, window_bounds = array<i64: 256, 32>}, {pipeline_mode = #tpu.pipeline_mode<synchronous>, transform_indices = @transform_5, window_bounds = array<i64: 2, 32>}, {transform_indices = @transform_6, window_bounds = array<i64: 2, 16, 32>}]} {
    %c0 = arith.constant 0 : index
    %c0_0 = arith.constant 0 : index
    %0 = vector.load %arg2[%c0, %c0_0] : memref<32x256xf32, #tpu.memory_space<vmem>>, vector<32x256xf32>
    %c0_1 = arith.constant 0 : index
    %c0_2 = arith.constant 0 : index
    %1 = vector.load %arg3[%c0_1, %c0_2] : memref<256x2xf32, #tpu.memory_space<vmem>>, vector<256x2xf32>
    %c0_3 = arith.constant 0 : index
    %c0_4 = arith.constant 0 : index
    %2 = vector.load %arg4[%c0_3, %c0_4] : memref<2x256xf32, #tpu.memory_space<vmem>>, vector<2x256xf32>
    %c0_5 = arith.constant 0 : index
    %c0_6 = arith.constant 0 : index
    %3 = vector.load %arg6[%c0_5, %c0_6] : memref<2x32xf32, #tpu.memory_space<vmem>>, vector<1x32xf32>
    %c1 = arith.constant 1 : index
    %c0_7 = arith.constant 0 : index
    %4 = vector.load %arg6[%c1, %c0_7] : memref<2x32xf32, #tpu.memory_space<vmem>>, vector<1x32xf32>
    %c0_8 = arith.constant 0 : index
    %c0_9 = arith.constant 0 : index
    %5 = vector.load %arg5[%c0_8, %c0_9] : memref<256x32xf32, #tpu.memory_space<vmem>>, vector<128x32xf32>
    %c128 = arith.constant 128 : index
    %c0_10 = arith.constant 0 : index
    %6 = vector.load %arg5[%c128, %c0_10] : memref<256x32xf32, #tpu.memory_space<vmem>>, vector<128x32xf32>
    %c0_11 = arith.constant 0 : index
    %c0_12 = arith.constant 0 : index
    %c0_13 = arith.constant 0 : index
    %7 = vector.load %arg1[%c0_11, %c0_12, %c0_13] : memref<2x16x32xf32, #tpu.memory_space<vmem>>, vector<1x16x32xf32>
    %8 = vector.shape_cast %7 : vector<1x16x32xf32> to vector<16x32xf32>
    %cst = arith.constant dense<0.000000e+00> : vector<16x256xf32>
    %9 = tpu.matmul %8, %0, %cst {dimension_numbers = #tpu.dot_dimension_numbers<[1], [0], [0], [1], [0, 0, 1, 1], [], []>, precision = #tpu.contract_precision<fp32>} : vector<16x32xf32>, vector<32x256xf32>, vector<16x256xf32> -> vector<16x256xf32>
    %cst_14 = arith.constant dense<0.000000e+00> : vector<16x2xf32>
    %10 = tpu.matmul %9, %1, %cst_14 {dimension_numbers = #tpu.dot_dimension_numbers<[1], [0], [0], [1], [0, 0, 1, 1], [], []>, precision = #tpu.contract_precision<fp32>} : vector<16x256xf32>, vector<256x2xf32>, vector<16x2xf32> -> vector<16x2xf32>
    %cst_15 = arith.constant dense<0.000000e+00> : vector<2x16xf32>
    %11 = tpu.matmul %2, %9, %cst_15 {dimension_numbers = #tpu.dot_dimension_numbers<[1], [1], [0], [0], [0, 0, 1, 0], [], []>, precision = #tpu.contract_precision<fp32>} : vector<2x256xf32>, vector<16x256xf32>, vector<2x16xf32> -> vector<2x16xf32>
    %12 = vector.extract_strided_slice %9 {offsets = [0, 0], sizes = [16, 128], strides = [1, 1]} : vector<16x256xf32> to vector<16x128xf32>
    %13 = vector.extract_strided_slice %10 {offsets = [0, 0], sizes = [16, 1], strides = [1, 1]} : vector<16x2xf32> to vector<16x1xf32>
    %14 = vector.extract_strided_slice %11 {offsets = [0, 0], sizes = [1, 16], strides = [1, 1]} : vector<2x16xf32> to vector<1x16xf32>
    %15 = vector.broadcast %13 : vector<16x1xf32> to vector<16x16xf32>
    %16 = vector.broadcast %14 : vector<1x16xf32> to vector<16x16xf32>
    %17 = arith.addf %15, %16 : vector<16x16xf32>
    %cst_16 = arith.constant 0.000000e+00 : f32
    %18 = vector.broadcast %cst_16 : f32 to vector<16x16xf32>
    %19 = arith.cmpf ogt, %17, %18 : vector<16x16xf32>
    %cst_17 = arith.constant 2.000000e-01 : f32
    %20 = vector.broadcast %cst_17 : f32 to vector<16x16xf32>
    %21 = arith.mulf %20, %17 : vector<16x16xf32>
    %22 = arith.select %19, %17, %21 : vector<16x16xi1>, vector<16x16xf32>
    %23 = arith.negf %22 : vector<16x16xf32>
    %24 = math.exp %23 : vector<16x16xf32>
    %cst_18 = arith.constant 1.000000e+00 : f32
    %25 = vector.broadcast %cst_18 : f32 to vector<16x16xf32>
    %26 = arith.addf %25, %24 : vector<16x16xf32>
    %27 = arith.divf %25, %26 : vector<16x16xf32>
    %28 = math.exp %27 : vector<16x16xf32>
    %cst_19 = arith.constant dense<0.000000e+00> : vector<16xf32>
    %29 = vector.multi_reduction <add>, %28, %cst_19 [0] : vector<16x16xf32> to vector<16xf32>
    %30 = vector.shape_cast %29 : vector<16xf32> to vector<1x16xf32>
    %cst_20 = arith.constant 1.000000e+00 : f32
    %31 = vector.broadcast %cst_20 : f32 to vector<1x16xf32>
    %32 = arith.divf %31, %30 : vector<1x16xf32>
    %33 = vector.broadcast %32 : vector<1x16xf32> to vector<16x16xf32>
    %34 = arith.mulf %28, %33 : vector<16x16xf32>
    %cst_21 = arith.constant dense<0.000000e+00> : vector<16x128xf32>
    %35 = tpu.matmul %34, %12, %cst_21 {dimension_numbers = #tpu.dot_dimension_numbers<[1], [0], [0], [1], [0, 0, 1, 1], [], []>, precision = #tpu.contract_precision<fp32>} : vector<16x16xf32>, vector<16x128xf32>, vector<16x128xf32> -> vector<16x128xf32>
    %cst_22 = arith.constant 0.000000e+00 : f32
    %36 = vector.broadcast %cst_22 : f32 to vector<16x128xf32>
    %37 = arith.cmpf ogt, %35, %36 : vector<16x128xf32>
    %cst_23 = arith.constant 0.000000e+00 : f32
    %38 = vector.broadcast %cst_23 : f32 to vector<16x128xf32>
    %39 = arith.minimumf %35, %38 : vector<16x128xf32>
    %40 = math.exp %39 : vector<16x128xf32>
    %cst_24 = arith.constant 1.000000e+00 : f32
    %41 = vector.broadcast %cst_24 : f32 to vector<16x128xf32>
    %42 = arith.subf %40, %41 : vector<16x128xf32>
    %43 = arith.select %37, %35, %42 : vector<16x128xi1>, vector<16x128xf32>
    %cst_25 = arith.constant dense<0.000000e+00> : vector<16x32xf32>
    %44 = tpu.matmul %43, %5, %cst_25 {dimension_numbers = #tpu.dot_dimension_numbers<[1], [0], [0], [1], [0, 0, 1, 1], [], []>, precision = #tpu.contract_precision<fp32>} : vector<16x128xf32>, vector<128x32xf32>, vector<16x32xf32> -> vector<16x32xf32>
    %45 = vector.extract_strided_slice %9 {offsets = [0, 128], sizes = [16, 128], strides = [1, 1]} : vector<16x256xf32> to vector<16x128xf32>
    %46 = vector.extract_strided_slice %10 {offsets = [0, 1], sizes = [16, 1], strides = [1, 1]} : vector<16x2xf32> to vector<16x1xf32>
    %47 = vector.extract_strided_slice %11 {offsets = [1, 0], sizes = [1, 16], strides = [1, 1]} : vector<2x16xf32> to vector<1x16xf32>
    %48 = vector.broadcast %46 : vector<16x1xf32> to vector<16x16xf32>
    %49 = vector.broadcast %47 : vector<1x16xf32> to vector<16x16xf32>
    %50 = arith.addf %48, %49 : vector<16x16xf32>
    %cst_26 = arith.constant 0.000000e+00 : f32
    %51 = vector.broadcast %cst_26 : f32 to vector<16x16xf32>
    %52 = arith.cmpf ogt, %50, %51 : vector<16x16xf32>
    %cst_27 = arith.constant 2.000000e-01 : f32
    %53 = vector.broadcast %cst_27 : f32 to vector<16x16xf32>
    %54 = arith.mulf %53, %50 : vector<16x16xf32>
    %55 = arith.select %52, %50, %54 : vector<16x16xi1>, vector<16x16xf32>
    %56 = arith.negf %55 : vector<16x16xf32>
    %57 = math.exp %56 : vector<16x16xf32>
    %cst_28 = arith.constant 1.000000e+00 : f32
    %58 = vector.broadcast %cst_28 : f32 to vector<16x16xf32>
    %59 = arith.addf %58, %57 : vector<16x16xf32>
    %60 = arith.divf %58, %59 : vector<16x16xf32>
    %61 = math.exp %60 : vector<16x16xf32>
    %cst_29 = arith.constant dense<0.000000e+00> : vector<16xf32>
    %62 = vector.multi_reduction <add>, %61, %cst_29 [0] : vector<16x16xf32> to vector<16xf32>
    %63 = vector.shape_cast %62 : vector<16xf32> to vector<1x16xf32>
    %cst_30 = arith.constant 1.000000e+00 : f32
    %64 = vector.broadcast %cst_30 : f32 to vector<1x16xf32>
    %65 = arith.divf %64, %63 : vector<1x16xf32>
    %66 = vector.broadcast %65 : vector<1x16xf32> to vector<16x16xf32>
    %67 = arith.mulf %61, %66 : vector<16x16xf32>
    %cst_31 = arith.constant dense<0.000000e+00> : vector<16x128xf32>
    %68 = tpu.matmul %67, %45, %cst_31 {dimension_numbers = #tpu.dot_dimension_numbers<[1], [0], [0], [1], [0, 0, 1, 1], [], []>, precision = #tpu.contract_precision<fp32>} : vector<16x16xf32>, vector<16x128xf32>, vector<16x128xf32> -> vector<16x128xf32>
    %cst_32 = arith.constant 0.000000e+00 : f32
    %69 = vector.broadcast %cst_32 : f32 to vector<16x128xf32>
    %70 = arith.cmpf ogt, %68, %69 : vector<16x128xf32>
    %cst_33 = arith.constant 0.000000e+00 : f32
    %71 = vector.broadcast %cst_33 : f32 to vector<16x128xf32>
    %72 = arith.minimumf %68, %71 : vector<16x128xf32>
    %73 = math.exp %72 : vector<16x128xf32>
    %cst_34 = arith.constant 1.000000e+00 : f32
    %74 = vector.broadcast %cst_34 : f32 to vector<16x128xf32>
    %75 = arith.subf %73, %74 : vector<16x128xf32>
    %76 = arith.select %70, %68, %75 : vector<16x128xi1>, vector<16x128xf32>
    %cst_35 = arith.constant dense<0.000000e+00> : vector<16x32xf32>
    %77 = tpu.matmul %76, %6, %cst_35 {dimension_numbers = #tpu.dot_dimension_numbers<[1], [0], [0], [1], [0, 0, 1, 1], [], []>, precision = #tpu.contract_precision<fp32>} : vector<16x128xf32>, vector<128x32xf32>, vector<16x32xf32> -> vector<16x32xf32>
    %78 = arith.addf %44, %77 : vector<16x32xf32>
    %cst_36 = arith.constant dense<0.000000e+00> : vector<16x1xf32>
    %79 = tpu.matmul %78, %3, %cst_36 {dimension_numbers = #tpu.dot_dimension_numbers<[1], [1], [0], [0], [0, 0, 1, 0], [], []>, precision = #tpu.contract_precision<fp32>} : vector<16x32xf32>, vector<1x32xf32>, vector<16x1xf32> -> vector<16x1xf32>
    %cst_37 = arith.constant dense<0.000000e+00> : vector<1x16xf32>
    %80 = tpu.matmul %4, %78, %cst_37 {dimension_numbers = #tpu.dot_dimension_numbers<[1], [1], [0], [0], [0, 0, 1, 0], [], []>, precision = #tpu.contract_precision<fp32>} : vector<1x32xf32>, vector<16x32xf32>, vector<1x16xf32> -> vector<1x16xf32>
    %81 = vector.broadcast %79 : vector<16x1xf32> to vector<16x16xf32>
    %82 = vector.broadcast %80 : vector<1x16xf32> to vector<16x16xf32>
    %83 = arith.addf %81, %82 : vector<16x16xf32>
    %cst_38 = arith.constant 0.000000e+00 : f32
    %84 = vector.broadcast %cst_38 : f32 to vector<16x16xf32>
    %85 = arith.cmpf ogt, %83, %84 : vector<16x16xf32>
    %cst_39 = arith.constant 2.000000e-01 : f32
    %86 = vector.broadcast %cst_39 : f32 to vector<16x16xf32>
    %87 = arith.mulf %86, %83 : vector<16x16xf32>
    %88 = arith.select %85, %83, %87 : vector<16x16xi1>, vector<16x16xf32>
    %89 = arith.negf %88 : vector<16x16xf32>
    %90 = math.exp %89 : vector<16x16xf32>
    %cst_40 = arith.constant 1.000000e+00 : f32
    %91 = vector.broadcast %cst_40 : f32 to vector<16x16xf32>
    %92 = arith.addf %91, %90 : vector<16x16xf32>
    %93 = arith.divf %91, %92 : vector<16x16xf32>
    %94 = math.exp %93 : vector<16x16xf32>
    %cst_41 = arith.constant dense<0.000000e+00> : vector<16xf32>
    %95 = vector.multi_reduction <add>, %94, %cst_41 [0] : vector<16x16xf32> to vector<16xf32>
    %96 = vector.shape_cast %95 : vector<16xf32> to vector<1x16xf32>
    %cst_42 = arith.constant 1.000000e+00 : f32
    %97 = vector.broadcast %cst_42 : f32 to vector<1x16xf32>
    %98 = arith.divf %97, %96 : vector<1x16xf32>
    %99 = vector.broadcast %98 : vector<1x16xf32> to vector<16x16xf32>
    %100 = arith.mulf %94, %99 : vector<16x16xf32>
    %cst_43 = arith.constant dense<0.000000e+00> : vector<16x32xf32>
    %101 = tpu.matmul %100, %78, %cst_43 {dimension_numbers = #tpu.dot_dimension_numbers<[1], [0], [0], [1], [0, 0, 1, 1], [], []>, precision = #tpu.contract_precision<fp32>} : vector<16x16xf32>, vector<16x32xf32>, vector<16x32xf32> -> vector<16x32xf32>
    %cst_44 = arith.constant 0.000000e+00 : f32
    %102 = vector.broadcast %cst_44 : f32 to vector<16x32xf32>
    %103 = arith.maximumf %101, %102 : vector<16x32xf32>
    %c0_45 = arith.constant 0 : index
    %c0_46 = arith.constant 0 : index
    %c0_47 = arith.constant 0 : index
    %104 = vector.load %arg7[%c0_45, %c0_46, %c0_47] : memref<2x16x32xf32, #tpu.memory_space<vmem>>, vector<1x16x32xf32>
    %105 = vector.shape_cast %104 : vector<1x16x32xf32> to vector<16x32xf32>
    %106 = vector.shape_cast %103 : vector<16x32xf32> to vector<1x16x32xf32>
    tpu.vector_store %arg7[%c0_45, %c0_46, %c0_47], %106 {strides = array<i32>} : memref<2x16x32xf32, #tpu.memory_space<vmem>>, vector<1x16x32xf32>,
    %c1_48 = arith.constant 1 : index
    %c0_49 = arith.constant 0 : index
    %c0_50 = arith.constant 0 : index
    %107 = vector.load %arg1[%c1_48, %c0_49, %c0_50] : memref<2x16x32xf32, #tpu.memory_space<vmem>>, vector<1x16x32xf32>
    %108 = vector.shape_cast %107 : vector<1x16x32xf32> to vector<16x32xf32>
    %cst_51 = arith.constant dense<0.000000e+00> : vector<16x256xf32>
    %109 = tpu.matmul %108, %0, %cst_51 {dimension_numbers = #tpu.dot_dimension_numbers<[1], [0], [0], [1], [0, 0, 1, 1], [], []>, precision = #tpu.contract_precision<fp32>} : vector<16x32xf32>, vector<32x256xf32>, vector<16x256xf32> -> vector<16x256xf32>
    %cst_52 = arith.constant dense<0.000000e+00> : vector<16x2xf32>
    %110 = tpu.matmul %109, %1, %cst_52 {dimension_numbers = #tpu.dot_dimension_numbers<[1], [0], [0], [1], [0, 0, 1, 1], [], []>, precision = #tpu.contract_precision<fp32>} : vector<16x256xf32>, vector<256x2xf32>, vector<16x2xf32> -> vector<16x2xf32>
    %cst_53 = arith.constant dense<0.000000e+00> : vector<2x16xf32>
    %111 = tpu.matmul %2, %109, %cst_53 {dimension_numbers = #tpu.dot_dimension_numbers<[1], [1], [0], [0], [0, 0, 1, 0], [], []>, precision = #tpu.contract_precision<fp32>} : vector<2x256xf32>, vector<16x256xf32>, vector<2x16xf32> -> vector<2x16xf32>
    %112 = vector.extract_strided_slice %109 {offsets = [0, 0], sizes = [16, 128], strides = [1, 1]} : vector<16x256xf32> to vector<16x128xf32>
    %113 = vector.extract_strided_slice %110 {offsets = [0, 0], sizes = [16, 1], strides = [1, 1]} : vector<16x2xf32> to vector<16x1xf32>
    %114 = vector.extract_strided_slice %111 {offsets = [0, 0], sizes = [1, 16], strides = [1, 1]} : vector<2x16xf32> to vector<1x16xf32>
    %115 = vector.broadcast %113 : vector<16x1xf32> to vector<16x16xf32>
    %116 = vector.broadcast %114 : vector<1x16xf32> to vector<16x16xf32>
    %117 = arith.addf %115, %116 : vector<16x16xf32>
    %cst_54 = arith.constant 0.000000e+00 : f32
    %118 = vector.broadcast %cst_54 : f32 to vector<16x16xf32>
    %119 = arith.cmpf ogt, %117, %118 : vector<16x16xf32>
    %cst_55 = arith.constant 2.000000e-01 : f32
    %120 = vector.broadcast %cst_55 : f32 to vector<16x16xf32>
    %121 = arith.mulf %120, %117 : vector<16x16xf32>
    %122 = arith.select %119, %117, %121 : vector<16x16xi1>, vector<16x16xf32>
    %123 = arith.negf %122 : vector<16x16xf32>
    %124 = math.exp %123 : vector<16x16xf32>
    %cst_56 = arith.constant 1.000000e+00 : f32
    %125 = vector.broadcast %cst_56 : f32 to vector<16x16xf32>
    %126 = arith.addf %125, %124 : vector<16x16xf32>
    %127 = arith.divf %125, %126 : vector<16x16xf32>
    %128 = math.exp %127 : vector<16x16xf32>
    %cst_57 = arith.constant dense<0.000000e+00> : vector<16xf32>
    %129 = vector.multi_reduction <add>, %128, %cst_57 [0] : vector<16x16xf32> to vector<16xf32>
    %130 = vector.shape_cast %129 : vector<16xf32> to vector<1x16xf32>
    %cst_58 = arith.constant 1.000000e+00 : f32
    %131 = vector.broadcast %cst_58 : f32 to vector<1x16xf32>
    %132 = arith.divf %131, %130 : vector<1x16xf32>
    %133 = vector.broadcast %132 : vector<1x16xf32> to vector<16x16xf32>
    %134 = arith.mulf %128, %133 : vector<16x16xf32>
    %cst_59 = arith.constant dense<0.000000e+00> : vector<16x128xf32>
    %135 = tpu.matmul %134, %112, %cst_59 {dimension_numbers = #tpu.dot_dimension_numbers<[1], [0], [0], [1], [0, 0, 1, 1], [], []>, precision = #tpu.contract_precision<fp32>} : vector<16x16xf32>, vector<16x128xf32>, vector<16x128xf32> -> vector<16x128xf32>
    %cst_60 = arith.constant 0.000000e+00 : f32
    %136 = vector.broadcast %cst_60 : f32 to vector<16x128xf32>
    %137 = arith.cmpf ogt, %135, %136 : vector<16x128xf32>
    %cst_61 = arith.constant 0.000000e+00 : f32
    %138 = vector.broadcast %cst_61 : f32 to vector<16x128xf32>
    %139 = arith.minimumf %135, %138 : vector<16x128xf32>
    %140 = math.exp %139 : vector<16x128xf32>
    %cst_62 = arith.constant 1.000000e+00 : f32
    %141 = vector.broadcast %cst_62 : f32 to vector<16x128xf32>
    %142 = arith.subf %140, %141 : vector<16x128xf32>
    %143 = arith.select %137, %135, %142 : vector<16x128xi1>, vector<16x128xf32>
    %cst_63 = arith.constant dense<0.000000e+00> : vector<16x32xf32>
    %144 = tpu.matmul %143, %5, %cst_63 {dimension_numbers = #tpu.dot_dimension_numbers<[1], [0], [0], [1], [0, 0, 1, 1], [], []>, precision = #tpu.contract_precision<fp32>} : vector<16x128xf32>, vector<128x32xf32>, vector<16x32xf32> -> vector<16x32xf32>
    %145 = vector.extract_strided_slice %109 {offsets = [0, 128], sizes = [16, 128], strides = [1, 1]} : vector<16x256xf32> to vector<16x128xf32>
    %146 = vector.extract_strided_slice %110 {offsets = [0, 1], sizes = [16, 1], strides = [1, 1]} : vector<16x2xf32> to vector<16x1xf32>
    %147 = vector.extract_strided_slice %111 {offsets = [1, 0], sizes = [1, 16], strides = [1, 1]} : vector<2x16xf32> to vector<1x16xf32>
    %148 = vector.broadcast %146 : vector<16x1xf32> to vector<16x16xf32>
    %149 = vector.broadcast %147 : vector<1x16xf32> to vector<16x16xf32>
    %150 = arith.addf %148, %149 : vector<16x16xf32>
    %cst_64 = arith.constant 0.000000e+00 : f32
    %151 = vector.broadcast %cst_64 : f32 to vector<16x16xf32>
    %152 = arith.cmpf ogt, %150, %151 : vector<16x16xf32>
    %cst_65 = arith.constant 2.000000e-01 : f32
    %153 = vector.broadcast %cst_65 : f32 to vector<16x16xf32>
    %154 = arith.mulf %153, %150 : vector<16x16xf32>
    %155 = arith.select %152, %150, %154 : vector<16x16xi1>, vector<16x16xf32>
    %156 = arith.negf %155 : vector<16x16xf32>
    %157 = math.exp %156 : vector<16x16xf32>
    %cst_66 = arith.constant 1.000000e+00 : f32
    %158 = vector.broadcast %cst_66 : f32 to vector<16x16xf32>
    %159 = arith.addf %158, %157 : vector<16x16xf32>
    %160 = arith.divf %158, %159 : vector<16x16xf32>
    %161 = math.exp %160 : vector<16x16xf32>
    %cst_67 = arith.constant dense<0.000000e+00> : vector<16xf32>
    %162 = vector.multi_reduction <add>, %161, %cst_67 [0] : vector<16x16xf32> to vector<16xf32>
    %163 = vector.shape_cast %162 : vector<16xf32> to vector<1x16xf32>
    %cst_68 = arith.constant 1.000000e+00 : f32
    %164 = vector.broadcast %cst_68 : f32 to vector<1x16xf32>
    %165 = arith.divf %164, %163 : vector<1x16xf32>
    %166 = vector.broadcast %165 : vector<1x16xf32> to vector<16x16xf32>
    %167 = arith.mulf %161, %166 : vector<16x16xf32>
    %cst_69 = arith.constant dense<0.000000e+00> : vector<16x128xf32>
    %168 = tpu.matmul %167, %145, %cst_69 {dimension_numbers = #tpu.dot_dimension_numbers<[1], [0], [0], [1], [0, 0, 1, 1], [], []>, precision = #tpu.contract_precision<fp32>} : vector<16x16xf32>, vector<16x128xf32>, vector<16x128xf32> -> vector<16x128xf32>
    %cst_70 = arith.constant 0.000000e+00 : f32
    %169 = vector.broadcast %cst_70 : f32 to vector<16x128xf32>
    %170 = arith.cmpf ogt, %168, %169 : vector<16x128xf32>
    %cst_71 = arith.constant 0.000000e+00 : f32
    %171 = vector.broadcast %cst_71 : f32 to vector<16x128xf32>
    %172 = arith.minimumf %168, %171 : vector<16x128xf32>
    %173 = math.exp %172 : vector<16x128xf32>
    %cst_72 = arith.constant 1.000000e+00 : f32
    %174 = vector.broadcast %cst_72 : f32 to vector<16x128xf32>
    %175 = arith.subf %173, %174 : vector<16x128xf32>
    %176 = arith.select %170, %168, %175 : vector<16x128xi1>, vector<16x128xf32>
    %cst_73 = arith.constant dense<0.000000e+00> : vector<16x32xf32>
    %177 = tpu.matmul %176, %6, %cst_73 {dimension_numbers = #tpu.dot_dimension_numbers<[1], [0], [0], [1], [0, 0, 1, 1], [], []>, precision = #tpu.contract_precision<fp32>} : vector<16x128xf32>, vector<128x32xf32>, vector<16x32xf32> -> vector<16x32xf32>
    %178 = arith.addf %144, %177 : vector<16x32xf32>
    %cst_74 = arith.constant dense<0.000000e+00> : vector<16x1xf32>
    %179 = tpu.matmul %178, %3, %cst_74 {dimension_numbers = #tpu.dot_dimension_numbers<[1], [1], [0], [0], [0, 0, 1, 0], [], []>, precision = #tpu.contract_precision<fp32>} : vector<16x32xf32>, vector<1x32xf32>, vector<16x1xf32> -> vector<16x1xf32>
    %cst_75 = arith.constant dense<0.000000e+00> : vector<1x16xf32>
    %180 = tpu.matmul %4, %178, %cst_75 {dimension_numbers = #tpu.dot_dimension_numbers<[1], [1], [0], [0], [0, 0, 1, 0], [], []>, precision = #tpu.contract_precision<fp32>} : vector<1x32xf32>, vector<16x32xf32>, vector<1x16xf32> -> vector<1x16xf32>
    %181 = vector.broadcast %179 : vector<16x1xf32> to vector<16x16xf32>
    %182 = vector.broadcast %180 : vector<1x16xf32> to vector<16x16xf32>
    %183 = arith.addf %181, %182 : vector<16x16xf32>
    %cst_76 = arith.constant 0.000000e+00 : f32
    %184 = vector.broadcast %cst_76 : f32 to vector<16x16xf32>
    %185 = arith.cmpf ogt, %183, %184 : vector<16x16xf32>
    %cst_77 = arith.constant 2.000000e-01 : f32
    %186 = vector.broadcast %cst_77 : f32 to vector<16x16xf32>
    %187 = arith.mulf %186, %183 : vector<16x16xf32>
    %188 = arith.select %185, %183, %187 : vector<16x16xi1>, vector<16x16xf32>
    %189 = arith.negf %188 : vector<16x16xf32>
    %190 = math.exp %189 : vector<16x16xf32>
    %cst_78 = arith.constant 1.000000e+00 : f32
    %191 = vector.broadcast %cst_78 : f32 to vector<16x16xf32>
    %192 = arith.addf %191, %190 : vector<16x16xf32>
    %193 = arith.divf %191, %192 : vector<16x16xf32>
    %194 = math.exp %193 : vector<16x16xf32>
    %cst_79 = arith.constant dense<0.000000e+00> : vector<16xf32>
    %195 = vector.multi_reduction <add>, %194, %cst_79 [0] : vector<16x16xf32> to vector<16xf32>
    %196 = vector.shape_cast %195 : vector<16xf32> to vector<1x16xf32>
    %cst_80 = arith.constant 1.000000e+00 : f32
    %197 = vector.broadcast %cst_80 : f32 to vector<1x16xf32>
    %198 = arith.divf %197, %196 : vector<1x16xf32>
    %199 = vector.broadcast %198 : vector<1x16xf32> to vector<16x16xf32>
    %200 = arith.mulf %194, %199 : vector<16x16xf32>
    %cst_81 = arith.constant dense<0.000000e+00> : vector<16x32xf32>
    %201 = tpu.matmul %200, %178, %cst_81 {dimension_numbers = #tpu.dot_dimension_numbers<[1], [0], [0], [1], [0, 0, 1, 1], [], []>, precision = #tpu.contract_precision<fp32>} : vector<16x16xf32>, vector<16x32xf32>, vector<16x32xf32> -> vector<16x32xf32>
    %cst_82 = arith.constant 0.000000e+00 : f32
    %202 = vector.broadcast %cst_82 : f32 to vector<16x32xf32>
    %203 = arith.maximumf %201, %202 : vector<16x32xf32>
    %c1_83 = arith.constant 1 : index
    %c0_84 = arith.constant 0 : index
    %c0_85 = arith.constant 0 : index
    %204 = vector.load %arg7[%c1_83, %c0_84, %c0_85] : memref<2x16x32xf32, #tpu.memory_space<vmem>>, vector<1x16x32xf32>
    %205 = vector.shape_cast %204 : vector<1x16x32xf32> to vector<16x32xf32>
    %206 = vector.shape_cast %203 : vector<16x32xf32> to vector<1x16x32xf32>
    tpu.vector_store %arg7[%c1_83, %c0_84, %c0_85], %206 {strides = array<i32>} : memref<2x16x32xf32, #tpu.memory_space<vmem>>, vector<1x16x32xf32>,
    return
  }
  func.func @transform_0(%arg0: i32) -> (i32, i32, i32) {
    %c0_i32 = arith.constant 0 : i32
    %c0_i32_0 = arith.constant 0 : i32
    %c0_i32_1 = arith.constant 0 : i32
    return %arg0, %c0_i32, %c0_i32_0 : i32, i32, i32
  }
  func.func @transform_1(%arg0: i32) -> (i32, i32) {
    %c0_i32 = arith.constant 0 : i32
    %c0_i32_0 = arith.constant 0 : i32
    %c0_i32_1 = arith.constant 0 : i32
    return %c0_i32, %c0_i32_0 : i32, i32
  }
  func.func @transform_2(%arg0: i32) -> (i32, i32) {
    %c0_i32 = arith.constant 0 : i32
    %c0_i32_0 = arith.constant 0 : i32
    %c0_i32_1 = arith.constant 0 : i32
    return %c0_i32, %c0_i32_0 : i32, i32
  }
  func.func @transform_3(%arg0: i32) -> (i32, i32) {
    %c0_i32 = arith.constant 0 : i32
    %c0_i32_0 = arith.constant 0 : i32
    %c0_i32_1 = arith.constant 0 : i32
    return %c0_i32, %c0_i32_0 : i32, i32
  }
  func.func @transform_4(%arg0: i32) -> (i32, i32) {
    %c0_i32 = arith.constant 0 : i32
    %c0_i32_0 = arith.constant 0 : i32
    %c0_i32_1 = arith.constant 0 : i32
    return %c0_i32, %c0_i32_0 : i32, i32
  }
  func.func @transform_5(%arg0: i32) -> (i32, i32) {
    %c0_i32 = arith.constant 0 : i32
    %c0_i32_0 = arith.constant 0 : i32
    %c0_i32_1 = arith.constant 0 : i32
    return %c0_i32, %c0_i32_0 : i32, i32
  }
  func.func @transform_6(%arg0: i32) -> (i32, i32, i32) {
    %c0_i32 = arith.constant 0 : i32
    %c0_i32_0 = arith.constant 0 : i32
    %c0_i32_1 = arith.constant 0 : i32
    return %arg0, %c0_i32, %c0_i32_0 : i32, i32, i32
  }
}

</mosaic_0001>

<bundles_post_ra>
// kernel: tpu_custom_call.1
= control target key start
LH: loop header
LB: loop body
LE: loop exit
PB: predicated region body
PF: predicated region fallthrough
CT: control target
= control target key end

     0   :  { %vm101_vm0 = vcmask 261120   ;;  %s9430_s0 = inlined_call_operand.vmem [shape: f32[2,16,32], index: 0, kind: input, shape index: {}]   ;;  %s9431_s1 = inlined_call_operand.vmem [shape: f32[32,256], index: 1, kind: input, shape index: {}]   ;;  %s9432_s2 = inlined_call_operand.vmem [shape: f32[256,2], index: 2, kind: input, shape index: {}]   ;;  %s9433_s3 = inlined_call_operand.vmem [shape: f32[2,256], index: 3, kind: input, shape index: {}]   ;;  %s9434_s4 = inlined_call_operand.vmem [shape: f32[256,32], index: 4, kind: input, shape index: {}]   ;;  %s9435_s5 = inlined_call_operand.vmem [shape: f32[2,32], index: 5, kind: input, shape index: {}]   ;;  %s9436_s6 = inlined_call_operand.hbm [shape: f32[2,16,32], index: 6, kind: output, shape index: {}]  }
   0x1   :  { %v30_v0 = vld [vmem:[%s9431_s1 + $0x30] sm:$0xff]  ;;  %v28_v1 = vld [vmem:[%s9431_s1 + $0x20] sm:$0xff]  ;;  %v100_v7 = vld [vmem:[%s9430_s0 + $0x8] sm:$0xff] }
   0x2   :  { %v26_v2 = vld [vmem:[%s9431_s1 + $0x10] sm:$0xff]  ;;  %v6921_v3 = vand.u32 4294901760, %v30_v0  ;;  %v6923_v4 = vand.u32 4294901760, %v28_v1  ;;  %v24_v6 = vld [vmem:[%s9431_s1] sm:$0xff]  ;;  %v106_v10 = vsel %vm101_vm0, %v100_v7, 0  ;;  %v31_v16 = vld [vmem:[%s9431_s1 + $0x38] sm:$0xff] }
   0x3   :  { %v6925_v5 = vand.u32 4294901760, %v26_v2  ;;  %v99_v8 = vld [vmem:[%s9430_s0] sm:$0xff]  ;;  %v6936_v9 = vand.u32 4294901760, %v24_v6  ;;  %v6944_v13 = vand.u32 4294901760, %v106_v10 }
   0x4   :  { %9783 = vst [vmem:[#allocation5_spill] sm:$0xff] %v6921_v3  ;;  %v103_v11 = vsel %vm101_vm0, %v99_v8, 0  ;;  %6726 = vmatpush.msra.mxu2 %v6921_v3  ;;  %v6942_v12 = vsub.f32 %v30_v0, %v6921_v3  ;;  %v6947_v14 = vsub.f32 %v28_v1, %v6923_v4  ;;  %121 = vmatpush.msra.mxu0 %v6921_v3 }
   0x5   :  { %9784 = vst [vmem:[#allocation6_spill] sm:$0xff] %v6923_v4  ;;  %v6950_v15 = vsub.f32 %v26_v2, %v6925_v5 }
   0x6   :  { %9785 = vst [vmem:[#allocation7_spill] sm:$0xff] %v6925_v5 }
   0x7   :  { %9786 = vst [vmem:[#allocation8_spill] sm:$0xff] %v6936_v9 }
   0x8   :  { %9787 = vst [vmem:[#allocation9_spill] sm:$0xff] %v6942_v12 }
   0x9   :  { %9788 = vst [vmem:[#allocation10_spill] sm:$0xff] %v6947_v14 }
   0xa   :  { %9789 = vst [vmem:[#allocation11_spill] sm:$0xff] %v6950_v15 }
   0xb   :  { %11 = vsyncpa [#allocation3], 0  ;;  %v6957_v17 = vsub.f32 %v24_v6, %v6936_v9  ;;  %v6959_v18 = vand.u32 4294901760, %v103_v11  ;;  %6727 = vmatpush.msra.mxu2 %v6923_v4  ;;  %v6963_v19 = vand.u32 4294901760, %v6942_v12  ;;  %v6966_v20 = vsub.f32 %v106_v10, %v6944_v13  ;;  %123 = vmatpush.msra.mxu0 %v6923_v4  ;;  %v29_v23 = vld [vmem:[%s9431_s1 + $0x28] sm:$0xff]  ;;  %v27_v33 = vld [vmem:[%s9431_s1 + $0x18] sm:$0xff] }
   0xc   :  { %v6969_v21 = vand.u32 4294901760, %v6947_v14  ;;  %v6972_v22 = vand.u32 4294901760, %v6950_v15  ;;  %v6984_v26 = vand.u32 4294901760, %v31_v16  ;;  %v7000_v32 = vand.u32 4294901760, %v29_v23  ;;  %v25_v39 = vld [vmem:[%s9431_s1 + $0x8] sm:$0xff]  ;;  %v47_v62 = vld [vmem:[%s9432_s2 + $0x78] sm:$0xff] }
   0xd   :  { %9790 = vst [vmem:[#allocation12_spill] sm:$0xff] %v6957_v17  ;;  %v6979_v24 = vand.u32 4294901760, %v6957_v17  ;;  %v6982_v25 = vsub.f32 %v103_v11, %v6959_v18  ;;  %6728 = vmatpush.msra.mxu2 %v6925_v5  ;;  %v160_v27 = vsub.f32 %v6942_v12, %v6963_v19  ;;  %v6990_v28 = vand.u32 4294901760, %v6966_v20  ;;  %125 = vmatpush.msra.mxu0 %v6925_v5  ;;  %v46_v63 = vld [vmem:[%s9432_s2 + $0x70] sm:$0xff]  ;;  %v45_v0 = vld [vmem:[%s9432_s2 + $0x68] sm:$0xff]  ;;  %v44_v7 = vld [vmem:[%s9432_s2 + $0x60] sm:$0xff] }
   0xe   :  { %9791 = vst [vmem:[#allocation13_spill] sm:$0xff] %v6963_v19  ;;  %v166_v29 = vsub.f32 %v6947_v14, %v6969_v21  ;;  %v172_v30 = vsub.f32 %v6950_v15, %v6972_v22  ;;  %v7028_v42 = vand.u32 4294901760, %v27_v33  ;;  %v7031_v43 = vsub.f32 %v31_v16, %v6984_v26  ;;  %v43_v8 = vld [vmem:[%s9432_s2 + $0x58] sm:$0xff]  ;;  %v42_v10 = vld [vmem:[%s9432_s2 + $0x50] sm:$0xff]  ;;  %s6692_s26 = sshll.u32 %s9436_s6, 4  ;;  %s6875_s27 = smov 128   ;;  %s6693_s26 = int_to_ptr.hbm [resolvable:$true] %s6692_s26 }
   0xf   :  { %9792 = vst [vmem:[#allocation14_spill] sm:$0xff] %v6969_v21  ;;  %v6998_v31 = vand.u32 4294901760, %v6982_v25  ;;  %6729 = vmatpush.msra.mxu2 %v6936_v9  ;;  %v7006_v34 = vand.u32 4294901760, %v160_v27  ;;  %v139_v35 = vsub.f32 %v6966_v20, %v6990_v28  ;;  %v178_v37 = vsub.f32 %v6957_v17, %v6979_v24  ;;  %127 = vmatpush.msra.mxu0 %v6936_v9  ;;  %s6876_s28 = smov 8  }
  0x10   :  { %9793 = vst [vmem:[#allocation15_spill] sm:$0xff] %v6972_v22  ;;  %v7010_v36 = vand.u32 4294901760, %v166_v29  ;;  %v7025_v41 = vand.u32 4294901760, %v172_v30  ;;  %v7041_v46 = vand.u32 4294901760, %v25_v39  ;;  %v7044_v47 = vsub.f32 %v29_v23, %v7000_v32  ;;  %v41_v23 = vld [vmem:[%s9432_s2 + $0x48] sm:$0xff] }
  0x11   :  { %9794 = vst [vmem:[#allocation16_spill] sm:$0xff] %v6979_v24  ;;  %204 = vmatpush.msrb.mxu2 %v6942_v12  ;;  %v131_v38 = vsub.f32 %v6982_v25, %v6998_v31  ;;  %273 = vmatpush.msrb.mxu0 %v6963_v19  ;;  %v7023_v40 = vand.u32 4294901760, %v139_v35  ;;  %v7039_v45 = vand.u32 4294901760, %v178_v37  ;;  %v7051_v48 = vand.u32 4294901760, %v7031_v43  ;;  %v40_v35 = vld [vmem:[%s9432_s2 + $0x40] sm:$0xff] }
  0x12   :  { %9795 = vst [vmem:[#allocation17_spill] sm:$0xff] %v6984_v26  ;;  %6730 = vmatpush.msra.mxu3 %v7006_v34  ;;  %162 = vmatpush.msra.mxu1 %v7006_v34  ;;  %v7054_v49 = vsub.f32 %v27_v33, %v7028_v42  ;;  %v7061_v50 = vand.u32 4294901760, %v7044_v47  ;;  %v7064_v51 = vsub.f32 %v25_v39, %v7041_v46  ;;  %v7133_v1 = vand.u32 4294901760, %v47_v62 }
  0x13   :  { %9796 = vst [vmem:[#allocation18_spill] sm:$0xff] %v7000_v32  ;;  %207 = vmatpush.msrb.mxu2 %v6947_v14  ;;  %v7034_v44 = vand.u32 4294901760, %v131_v38  ;;  %277 = vmatpush.msrb.mxu0 %v6969_v21  ;;  %v376_v52 = vsub.f32 %v7031_v43, %v7051_v48  ;;  %v7135_v2 = vand.u32 4294901760, %v46_v63  ;;  %v7137_v6 = vand.u32 4294901760, %v45_v0 }
  0x14   :  { %9797 = vst [vmem:[#allocation19_spill] sm:$0xff] %v7006_v34  ;;  %141 = vmatmul.f32.vlgmr.msra.gmra.mxu2 %v7023_v40  ;;  %6731 = vmatpush.msra.mxu3 %v7010_v36  ;;  %v7073_v53 = vand.u32 4294901760, %v7054_v49  ;;  %v382_v54 = vsub.f32 %v7044_v47, %v7061_v50  ;;  %v7082_v55 = vand.u32 4294901760, %v7064_v51  ;;  %v7150_v11 = vand.u32 4294901760, %v44_v7 }
  0x15   :  { %9798 = vst [vmem:[#allocation20_spill] sm:$0xff] %v7010_v36  ;;  %210 = vmatpush.msrb.mxu2 %v6950_v15  ;;  %168 = vmatpush.msra.mxu1 %v7010_v36  ;;  %v7088_v56 = vand.u32 4294901760, %v376_v52  ;;  %v7152_v16 = vand.u32 4294901760, %v43_v8  ;;  %v7160_v27 = vsub.f32 %v47_v62, %v7133_v1  ;;  %v7163_v29 = vsub.f32 %v46_v63, %v7135_v2 }
  0x16   :  { %9799 = vst [vmem:[#allocation21_spill] sm:$0xff] %v7025_v41  ;;  %6732 = vmatpush.msra.mxu3 %v7025_v41  ;;  %133 = vmatmul.f32.vlgmr.msra.gmra.mxu0 %v7034_v44  ;;  %v388_v57 = vsub.f32 %v7054_v49, %v7073_v53  ;;  %v7096_v58 = vand.u32 4294901760, %v382_v54  ;;  %v394_v59 = vsub.f32 %v7064_v51, %v7082_v55  ;;  %v7168_v33 = vand.u32 4294901760, %v42_v10 }
  0x17   :  { %9800 = vst [vmem:[#allocation22_spill] sm:$0xff] %v7028_v42  ;;  %213 = vmatpush.msrb.mxu2 %v6957_v17  ;;  %174 = vmatpush.msra.mxu1 %v7025_v41  ;;  %v7166_v30 = vsub.f32 %v45_v0, %v7137_v6  ;;  %v7176_v37 = vsub.f32 %v44_v7, %v7150_v11  ;;  %v7178_v38 = vand.u32 4294901760, %v41_v23  ;;  %v7181_v39 = vand.u32 4294901760, %v7160_v27 }
  0x18   :  { %9801 = vst [vmem:[#allocation23_spill] sm:$0xff] %v7031_v43  ;;  %6733 = vmatpush.msra.mxu3 %v7039_v45  ;;  %281 = vmatpush.msrb.mxu0 %v6972_v22  ;;  %v7104_v60 = vand.u32 4294901760, %v388_v57  ;;  %v7110_v61 = vand.u32 4294901760, %v394_v59  ;;  %v7192_v54 = vsub.f32 %v43_v8, %v7152_v16  ;;  %v7195_v57 = vand.u32 4294901760, %v40_v35  ;;  %v39_v8 = vld [vmem:[%s9432_s2 + $0x38] sm:$0xff] }
  0x19   :  { %9802 = vst [vmem:[#allocation24_spill] sm:$0xff] %v7039_v45  ;;  %337 = vmatpush.msra.mxu2 %v6984_v26  ;;  %186 = vmatmul.f32.vlgmr.msra.gmra.mxu3 %v6944_v13  ;;  %v7187_v52 = vand.u32 4294901760, %v7166_v30  ;;  %v592_v59 = vsub.f32 %v7160_v27, %v7181_v39  ;;  %v7203_v63 = vand.u32 4294901760, %v7176_v37  ;;  %v7207_v0 = vsub.f32 %v42_v10, %v7168_v33 }
  0x1a   :  { %9803 = vst [vmem:[#allocation25_spill] sm:$0xff] %v7041_v46  ;;  %180 = vmatpush.msra.mxu1 %v7039_v45  ;;  %238 = vmatpush.msrb.mxu3 %v6921_v3 }
  0x1b   :  { %9804 = vst [vmem:[#allocation26_spill] sm:$0xff] %v7044_v47  ;;  %182 = vmatmul.f32.vlgmr.msra.gmra.mxu1 %v6959_v18  ;;  %339 = vmatpush.msra.mxu2 %v7000_v32  ;;  %v604_v7 = vsub.f32 %v7166_v30, %v7187_v52  ;;  %v7223_v10 = vand.u32 4294901760, %v592_v59  ;;  %v610_v59 = vsub.f32 %v7176_v37, %v7203_v63 }
  0x1c   :  { %9805 = vst [vmem:[#allocation27_spill] sm:$0xff] %v7051_v48  ;;  %308 = vmatpush.msrb.mxu1 %v6921_v3  ;;  %216 = vmatmul.f32.vlgmr.msrb.gmra.mxu2 %v6982_v25 }
  0x1d   :  { %9806 = vst [vmem:[#allocation28_spill] sm:$0xff] %v7054_v49  ;;  %240 = vmatpush.msrb.mxu3 %v6923_v4  ;;  %285 = vmatpush.msrb.mxu0 %v6979_v24 }
  0x1e   :  { %9807 = vst [vmem:[#allocation29_spill] sm:$0xff] %v7061_v50  ;;  %310 = vmatpush.msrb.mxu1 %v6923_v4  ;;  %341 = vmatpush.msra.mxu2 %v7028_v42 }
  0x1f   :  { %9808 = vst [vmem:[#allocation30_spill] sm:$0xff] %v7064_v51  ;;  %242 = vmatpush.msrb.mxu3 %v6925_v5  ;;  %287 = vmatmul.f32.vlgmr.msrb.gmra.mxu0 %v6959_v18 }
  0x20   :  { %9809 = vst [vmem:[#allocation31_spill] sm:$0xff] %v7073_v53  ;;  %312 = vmatpush.msrb.mxu1 %v6925_v5  ;;  %343 = vmatpush.msra.mxu2 %v7041_v46 }
  0x21   :  { %9810 = vst [vmem:[#allocation32_spill] sm:$0xff] %v7082_v55  ;;  %244 = vmatpush.msrb.mxu3 %v6936_v9  ;;  %420 = vmatpush.msra.mxu0 %v7031_v43 }
  0x22   :  { %9811 = vst [vmem:[#allocation33_spill] sm:$0xff] %v7088_v56  ;;  %248 = vmatmul.f32.vlgmr.msrb.gmra.mxu3 %v6998_v31  ;;  %314 = vmatpush.msrb.mxu1 %v6936_v9 }
  0x23   :  { %9812 = vst [vmem:[#allocation34_spill] sm:$0xff] %v7096_v58  ;;  %378 = vmatpush.msra.mxu3 %v7088_v56  ;;  %316 = vmatmul.f32.vlgmr.msrb.gmra.mxu1 %v6959_v18 }
  0x24   :  { %9813 = vst [vmem:[#allocation35_spill] sm:$0xff] %v7104_v60  ;;  %221 = vmatmul.f32.gmra.mxu2 %v6966_v20  ;;  %423 = vmatpush.msra.mxu0 %v7044_v47 }
  0x25   :  { %384 = vmatpush.msra.mxu3 %v7096_v58  ;;  %9814 = vst [vmem:[#allocation36_spill] sm:$0xff] %v7110_v61  ;;  %454 = vmatpush.msra.mxu1 %v6984_v26  ;;  %v62_v58 = vld [vmem:[%s9432_s2 + $0xf0] sm:$0xff] }
  0x26   :  { %489 = vmatpush.msrb.mxu2 %v7051_v48  ;;  %426 = vmatpush.msra.mxu0 %v7054_v49  ;;  %9815 = vst [vmem:[#allocation37_spill] sm:$0xff] %v7133_v1  ;;  %v7410_v56 = vand.u32 4294901760, %v62_v58 }
  0x27   :  { %390 = vmatpush.msra.mxu3 %v7104_v60  ;;  %456 = vmatpush.msra.mxu1 %v7000_v32  ;;  %9816 = vst [vmem:[#allocation38_spill] sm:$0xff] %v7135_v2 }
  0x28   :  { %291 = vmatmul.f32.gmra.mxu0 %v6944_v13  ;;  %493 = vmatpush.msrb.mxu2 %v7061_v50  ;;  %9817 = vst [vmem:[#allocation39_spill] sm:$0xff] %v7137_v6  ;;  %v36_v50 = vld [vmem:[%s9432_s2 + $0x20] sm:$0xff] }
  0x29   :  { %396 = vmatpush.msra.mxu3 %v7110_v61  ;;  %429 = vmatpush.msra.mxu0 %v7064_v51  ;;  %9818 = vst [vmem:[#allocation40_spill] sm:$0xff] %v7150_v11  ;;  %v7286_v51 = vand.u32 4294901760, %v36_v50 }
  0x2a   :  { %254 = vmatmul.f32.gmra.mxu3 %v6990_v28  ;;  %458 = vmatpush.msra.mxu1 %v7028_v42  ;;  %9819 = vst [vmem:[#allocation41_spill] sm:$0xff] %v7152_v16 }
  0x2b   :  { %320 = vmatmul.f32.gmra.mxu1 %v6944_v13  ;;  %497 = vmatpush.msrb.mxu2 %v7073_v53  ;;  %9820 = vst [vmem:[#allocation42_spill] sm:$0xff] %v7160_v27  ;;  %v37_v53 = vld [vmem:[%s9432_s2 + $0x28] sm:$0xff] }
  0x2c   :  { %349 = vmatmul.f32.vlgmr.msra.gmra.mxu2 %v7034_v44  ;;  %460 = vmatpush.msra.mxu1 %v7041_v46  ;;  %9821 = vst [vmem:[#allocation43_spill] sm:$0xff] %v7163_v29  ;;  %v7184_v44 = vand.u32 4294901760, %v7163_v29 }
  0x2d   :  { %9822 = vst [vmem:[#allocation44_spill] sm:$0xff] %v7166_v30  ;;  %501 = vmatpush.msrb.mxu2 %v7082_v55  ;;  %524 = vmatpush.msrb.mxu3 %v6984_v26  ;;  %v7234_v55 = vsub.f32 %v40_v35, %v7195_v57  ;;  %v7251_v35 = vand.u32 4294901760, %v604_v7  ;;  %v7267_v7 = vand.u32 4294901760, %v37_v53 }
  0x2e   :  { %9823 = vst [vmem:[#allocation45_spill] sm:$0xff] %v7168_v33  ;;  %541 = vmatpush.msrb.mxu0 %v7133_v1  ;;  %v598_v62 = vsub.f32 %v7163_v29, %v7184_v44  ;;  %594 = vmatpush.msrb.mxu1 %v7223_v10 }
  0x2f   :  { %9824 = vst [vmem:[#allocation46_spill] sm:$0xff] %v7176_v37  ;;  %696 = vmatpush.msra.mxu2 %v7160_v27  ;;  %526 = vmatpush.msrb.mxu3 %v7000_v32  ;;  %v7226_v27 = vand.u32 4294901760, %v7192_v54 }
  0x30   :  { %9825 = vst [vmem:[#allocation47_spill] sm:$0xff] %v7178_v38  ;;  %432 = vmatmul.f32.vlgmr.msra.gmra.mxu0 %v6982_v25  ;;  %v7214_v25 = vsub.f32 %v41_v23, %v7178_v38  ;;  %v7230_v23 = vand.u32 4294901760, %v598_v62  ;;  %v7246_v62 = vand.u32 4294901760, %v39_v8 }
  0x31   :  { %9826 = vst [vmem:[#allocation48_spill] sm:$0xff] %v7181_v39  ;;  %699 = vmatpush.msra.mxu2 %v7163_v29  ;;  %543 = vmatpush.msrb.mxu0 %v7135_v2  ;;  %v38_v29 = vld [vmem:[%s9432_s2 + $0x30] sm:$0xff]  ;;  %v616_v48 = vsub.f32 %v7192_v54, %v7226_v27 }
  0x32   :  { %9827 = vst [vmem:[#allocation49_spill] sm:$0xff] %v7184_v44  ;;  %398 = vmatmul.f32.vlgmr.msra.gmra.mxu3 %v6959_v18  ;;  %600 = vmatpush.msrb.mxu1 %v7230_v23 }
  0x33   :  { %9828 = vst [vmem:[#allocation50_spill] sm:$0xff] %v7187_v52  ;;  %528 = vmatpush.msrb.mxu3 %v7028_v42  ;;  %702 = vmatpush.msra.mxu2 %v7166_v30  ;;  %v7248_v30 = vand.u32 4294901760, %v38_v29  ;;  %v35_v42 = vld [vmem:[%s9432_s2 + $0x18] sm:$0xff] }
  0x34   :  { %9829 = vst [vmem:[#allocation51_spill] sm:$0xff] %v7192_v54  ;;  %464 = vmatmul.f32.vlgmr.msra.gmra.mxu1 %v6998_v31  ;;  %545 = vmatpush.msrb.mxu0 %v7137_v6  ;;  %v7244_v31 = vand.u32 4294901760, %v7207_v0 }
  0x35   :  { %9830 = vst [vmem:[#allocation52_spill] sm:$0xff] %v7195_v57  ;;  %357 = vmatmul.f32.gmra.mxu2 %v7023_v40  ;;  %530 = vmatpush.msrb.mxu3 %v7041_v46  ;;  %v7255_v40 = vand.u32 4294901760, %v7214_v25  ;;  %v7272_v46 = vand.u32 4294901760, %v7234_v55 }
  0x36   :  { %9831 = vst [vmem:[#allocation53_spill] sm:$0xff] %v7203_v63  ;;  %705 = vmatpush.msra.mxu2 %v7176_v37  ;;  %547 = vmatpush.msrb.mxu0 %v7150_v11  ;;  %v7278_v37 = vand.u32 4294901760, %v610_v59  ;;  %v7295_v59 = vand.u32 4294901760, %v616_v48  ;;  %v33_v48 = vld [vmem:[%s9432_s2 + $0x8] sm:$0xff] }
  0x37   :  { %9832 = vst [vmem:[#allocation54_spill] sm:$0xff] %v7207_v0  ;;  %754 = vmatpush.msra.mxu3 %v7133_v1  ;;  %606 = vmatpush.msrb.mxu1 %v7251_v35  ;;  %v628_v32 = vsub.f32 %v7214_v25, %v7255_v40  ;;  %v634_v49 = vsub.f32 %v7234_v55, %v7272_v46 }
  0x38   :  { %9833 = vst [vmem:[#allocation55_spill] sm:$0xff] %v7214_v25  ;;  %437 = vmatmul.f32.gmra.mxu0 %v6966_v20  ;;  %708 = vmatpush.msra.mxu2 %v7192_v54  ;;  %v34_v20 = vld [vmem:[%s9432_s2 + $0x10] sm:$0xff]  ;;  %v7303_v54 = vsub.f32 %v37_v53, %v7267_v7 }
  0x39   :  { %9834 = vst [vmem:[#allocation56_spill] sm:$0xff] %v7223_v10  ;;  %v7265_v10 = vsub.f32 %v39_v8, %v7246_v62  ;;  %756 = vmatpush.msra.mxu3 %v7135_v2  ;;  %v622_v8 = vsub.f32 %v7207_v0, %v7244_v31  ;;  %549 = vmatpush.msrb.mxu0 %v7152_v16  ;;  %v7324_v61 = vand.u32 4294901760, %v34_v20  ;;  %v7327_v26 = vand.u32 4294901760, %v628_v32 }
  0x3a   :  { %9835 = vst [vmem:[#allocation57_spill] sm:$0xff] %v7226_v27  ;;  %402 = vmatmul.f32.gmra.mxu3 %v6944_v13  ;;  %711 = vmatpush.msra.mxu2 %v7207_v0  ;;  %v7343_v32 = vand.u32 4294901760, %v33_v48 }
  0x3b   :  { %9836 = vst [vmem:[#allocation58_spill] sm:$0xff] %v7230_v23  ;;  %v7284_v23 = vsub.f32 %v38_v29, %v7248_v30  ;;  %758 = vmatpush.msra.mxu3 %v7137_v6  ;;  %v7300_v29 = vand.u32 4294901760, %v7265_v10  ;;  %612 = vmatpush.msrb.mxu1 %v7278_v37  ;;  %v7316_v0 = vand.u32 4294901760, %v622_v8 }
  0x3c   :  { %9837 = vst [vmem:[#allocation59_spill] sm:$0xff] %v7234_v55  ;;  %470 = vmatmul.f32.gmra.mxu1 %v6990_v28  ;;  %v7322_v28 = vsub.f32 %v36_v50, %v7286_v51  ;;  %714 = vmatpush.msra.mxu2 %v7214_v25  ;;  %v7338_v50 = vand.u32 4294901760, %v7303_v54  ;;  %v7346_v25 = vand.u32 4294901760, %v634_v49 }
  0x3d   :  { %9838 = vst [vmem:[#allocation60_spill] sm:$0xff] %v7244_v31  ;;  %503 = vmatmul.f32.vlgmr.msrb.gmra.mxu2 %v6959_v18  ;;  %v7319_v53 = vand.u32 4294901760, %v7284_v23  ;;  %760 = vmatpush.msra.mxu3 %v7150_v11  ;;  %v640_v8 = vsub.f32 %v7265_v10, %v7300_v29 }
  0x3e   :  { %9839 = vst [vmem:[#allocation61_spill] sm:$0xff] %v7246_v62  ;;  %618 = vmatpush.msrb.mxu1 %v7295_v59  ;;  %551 = vmatpush.msrb.mxu0 %v7168_v33  ;;  %v7354_v60 = vand.u32 4294901760, %v7322_v28 }
  0x3f   :  { %9840 = vst [vmem:[#allocation62_spill] sm:$0xff] %v7248_v30  ;;  %762 = vmatpush.msra.mxu3 %v7152_v16  ;;  %717 = vmatpush.msra.mxu2 %v7234_v55  ;;  %v7365_v49 = vand.u32 4294901760, %v640_v8  ;;  %v652_v55 = vsub.f32 %v7303_v54, %v7338_v50 }
  0x40   :  { %9841 = vst [vmem:[#allocation63_spill] sm:$0xff] %v7251_v35  ;;  %v7305_v35 = vand.u32 4294901760, %v35_v42  ;;  %624 = vmatpush.msrb.mxu1 %v7316_v0  ;;  %553 = vmatpush.msrb.mxu0 %v7178_v38 }
  0x41   :  { %9842 = vst [vmem:[#allocation64_spill] sm:$0xff] %v7255_v40  ;;  %720 = vmatpush.msra.mxu2 %v7265_v10  ;;  %764 = vmatpush.msra.mxu3 %v7168_v33 }
  0x42   :  { %9843 = vst [vmem:[#allocation65_spill] sm:$0xff] %v7265_v10  ;;  %v7341_v47 = vsub.f32 %v35_v42, %v7305_v35  ;;  %v7357_v42 = vsub.f32 %v34_v20, %v7324_v61  ;;  %532 = vmatmul.f32.vlgmr.msrb.gmra.mxu3 %v6959_v18  ;;  %630 = vmatpush.msrb.mxu1 %v7327_v26  ;;  %v63_v18 = vld [vmem:[%s9432_s2 + $0xf8] sm:$0xff] }
  0x43   :  { %9844 = vst [vmem:[#allocation66_spill] sm:$0xff] %v7267_v7  ;;  %v7373_v20 = vsub.f32 %v33_v48, %v7343_v32  ;;  %555 = vmatpush.msrb.mxu0 %v7195_v57  ;;  %723 = vmatpush.msra.mxu2 %v7284_v23  ;;  %v658_v10 = vsub.f32 %v7322_v28, %v7354_v60 }
  0x44   :  { %9845 = vst [vmem:[#allocation67_spill] sm:$0xff] %v7272_v46  ;;  %636 = vmatpush.msrb.mxu1 %v7346_v25  ;;  %v7387_v48 = vand.u32 4294901760, %v7357_v42  ;;  %766 = vmatpush.msra.mxu3 %v7178_v38 }
  0x45   :  { %9846 = vst [vmem:[#allocation68_spill] sm:$0xff] %v7278_v37  ;;  %v32_v37 = vld [vmem:[%s9432_s2] sm:$0xff]  ;;  %507 = vmatmul.f32.gmra.mxu2 %v6944_v13  ;;  %557 = vmatpush.msrb.mxu0 %v7246_v62  ;;  %v7413_v17 = vand.u32 4294901760, %v658_v10 }
  0x46   :  { %9847 = vst [vmem:[#allocation69_spill] sm:$0xff] %v7284_v23  ;;  %v7359_v43 = vand.u32 4294901760, %v32_v37  ;;  %642 = vmatpush.msrb.mxu1 %v7365_v49  ;;  %726 = vmatpush.msra.mxu2 %v7303_v54 }
  0x47   :  { %9848 = vst [vmem:[#allocation70_spill] sm:$0xff] %v7286_v51  ;;  %768 = vmatpush.msra.mxu3 %v7195_v57  ;;  %559 = vmatpush.msrb.mxu0 %v7248_v30 }
  0x48   :  { %9849 = vst [vmem:[#allocation71_spill] sm:$0xff] %v7295_v59  ;;  %v646_v59 = vsub.f32 %v7284_v23, %v7319_v53  ;;  %v7397_v23 = vand.u32 4294901760, %v63_v18  ;;  %729 = vmatpush.msra.mxu2 %v7322_v28 }
  0x49   :  { %9850 = vst [vmem:[#allocation72_spill] sm:$0xff] %v7300_v29  ;;  %561 = vmatpush.msrb.mxu0 %v7267_v7  ;;  %770 = vmatpush.msra.mxu3 %v7246_v62 }
  0x4a   :  { %9851 = vst [vmem:[#allocation73_spill] sm:$0xff] %v7303_v54  ;;  %v7382_v8 = vand.u32 4294901760, %v646_v59  ;;  %v7400_v59 = vand.u32 4294901760, %v652_v55  ;;  %v670_v55 = vsub.f32 %v7357_v42, %v7387_v48  ;;  %536 = vmatmul.f32.gmra.mxu3 %v6944_v13  ;;  %732 = vmatpush.msra.mxu2 %v7341_v47  ;;  %v7435_v13 = vsub.f32 %v62_v58, %v7410_v56 }
  0x4b   :  { %9852 = vst [vmem:[#allocation74_spill] sm:$0xff] %v7305_v35  ;;  %563 = vmatpush.msrb.mxu0 %v7286_v51  ;;  %772 = vmatpush.msra.mxu3 %v7248_v30 }
  0x4c   :  { %9853 = vst [vmem:[#allocation75_spill] sm:$0xff] %v7316_v0  ;;  %v7370_v0 = vand.u32 4294901760, %v7341_v47  ;;  %648 = vmatpush.msrb.mxu1 %v7382_v8  ;;  %735 = vmatpush.msra.mxu2 %v7357_v42 }
  0x4d   :  { %9854 = vst [vmem:[#allocation76_spill] sm:$0xff] %v7319_v53  ;;  %565 = vmatpush.msrb.mxu0 %v7305_v35  ;;  %774 = vmatpush.msra.mxu3 %v7267_v7 }
  0x4e   :  { %9855 = vst [vmem:[#allocation77_spill] sm:$0xff] %v7322_v28  ;;  %654 = vmatpush.msrb.mxu1 %v7400_v59  ;;  %738 = vmatpush.msra.mxu2 %v7373_v20 }
  0x4f   :  { %9856 = vst [vmem:[#allocation78_spill] sm:$0xff] %v7324_v61  ;;  %567 = vmatpush.msrb.mxu0 %v7324_v61  ;;  %776 = vmatpush.msra.mxu3 %v7286_v51 }
  0x50   :  { %9857 = vst [vmem:[#allocation79_spill] sm:$0xff] %v7327_v26  ;;  %v7390_v26 = vsub.f32 %v32_v37, %v7359_v43  ;;  %v7406_v37 = vand.u32 4294901760, %v7373_v20  ;;  %660 = vmatpush.msrb.mxu1 %v7413_v17 }
  0x51   :  { %9858 = vst [vmem:[#allocation80_spill] sm:$0xff] %v7338_v50  ;;  %569 = vmatpush.msrb.mxu0 %v7343_v32  ;;  %778 = vmatpush.msra.mxu3 %v7305_v35 }
  0x52   :  { %9859 = vst [vmem:[#allocation81_spill] sm:$0xff] %v7341_v47  ;;  %v7419_v54 = vand.u32 4294901760, %v7390_v26  ;;  %741 = vmatpush.msra.mxu2 %v7390_v26 }
  0x53   :  { %9860 = vst [vmem:[#allocation82_spill] sm:$0xff] %v7343_v32  ;;  %571 = vmatpush.msrb.mxu0 %v7359_v43  ;;  %780 = vmatpush.msra.mxu3 %v7324_v61 }
  0x54   :  { %9861 = vst [vmem:[#allocation83_spill] sm:$0xff] %v7346_v25  ;;  %v664_v25 = vsub.f32 %v7341_v47, %v7370_v0  ;;  %913 = vmatpush.msrb.mxu2 %v7397_v23 }
  0x55   :  { %9862 = vst [vmem:[#allocation84_spill] sm:$0xff] %v7354_v60  ;;  %782 = vmatpush.msra.mxu3 %v7343_v32  ;;  %801 = vmatpush.msra.mxu0 %v7181_v39 }
  0x56   :  { %9863 = vst [vmem:[#allocation85_spill] sm:$0xff] %v7357_v42  ;;  %v7428_v10 = vand.u32 4294901760, %v664_v25  ;;  %v682_v25 = vsub.f32 %v7390_v26, %v7419_v54  ;;  %915 = vmatpush.msrb.mxu2 %v7410_v56 }
  0x57   :  { %9864 = vst [vmem:[#allocation86_spill] sm:$0xff] %v7359_v43  ;;  %784 = vmatpush.msra.mxu3 %v7359_v43  ;;  %805 = vmatpush.msra.mxu0 %v7184_v44 }
  0x58   :  { %9865 = vst [vmem:[#allocation87_spill] sm:$0xff] %v7365_v49  ;;  %v7424_v49 = vsub.f32 %v63_v18, %v7397_v23  ;;  %v7439_v18 = vand.u32 4294901760, %v670_v55  ;;  %666 = vmatpush.msrb.mxu1 %v7428_v10  ;;  %v7455_v55 = vand.u32 4294901760, %v7435_v13  ;;  %v7459_v42 = vand.u32 4294901760, %v682_v25 }
  0x59   :  { %9866 = vst [vmem:[#allocation88_spill] sm:$0xff] %v7370_v0  ;;  %809 = vmatpush.msra.mxu0 %v7187_v52 }
  0x5a   :  { %9867 = vst [vmem:[#allocation89_spill] sm:$0xff] %v7373_v20  ;;  %v7446_v47 = vand.u32 4294901760, %v7424_v49  ;;  %672 = vmatpush.msrb.mxu1 %v7439_v18 }
  0x5b   :  { %9868 = vst [vmem:[#allocation90_spill] sm:$0xff] %v7382_v8  ;;  %v676_v8 = vsub.f32 %v7373_v20, %v7406_v37  ;;  %813 = vmatpush.msra.mxu0 %v7203_v63  ;;  %v57_v63 = vld [vmem:[%s9432_s2 + $0xc8] sm:$0xff]  ;;  %v56_v20 = vld [vmem:[%s9432_s2 + $0xc0] sm:$0xff] }
  0x5c   :  { %9869 = vst [vmem:[#allocation91_spill] sm:$0xff] %v7387_v48  ;;  %v964_v28 = vsub.f32 %v7424_v49, %v7446_v47  ;;  %v7568_v39 = vand.u32 4294901760, %v57_v63 }
  0x5d   :  { %9870 = vst [vmem:[#allocation92_spill] sm:$0xff] %v7390_v26  ;;  %v7450_v58 = vand.u32 4294901760, %v676_v8  ;;  %v970_v8 = vsub.f32 %v7435_v13, %v7455_v55  ;;  %817 = vmatpush.msra.mxu0 %v7226_v27 }
  0x5e   :  { %9871 = vst [vmem:[#allocation93_spill] sm:$0xff] %v7397_v23  ;;  %v7474_v25 = vand.u32 4294901760, %v964_v28  ;;  %v61_v28 = vld [vmem:[%s9432_s2 + $0xe8] sm:$0xff] }
  0x5f   :  { %9872 = vst [vmem:[#allocation94_spill] sm:$0xff] %v7400_v59  ;;  %678 = vmatpush.msrb.mxu1 %v7450_v58  ;;  %v7480_v26 = vand.u32 4294901760, %v970_v8  ;;  %821 = vmatpush.msra.mxu0 %v7244_v31  ;;  %v7509_v8 = vand.u32 4294901760, %v61_v28 }
  0x60   :  { %9873 = vst [vmem:[#allocation95_spill] sm:$0xff] %v7406_v37  ;;  %966 = vmatpush.msrb.mxu3 %v7474_v25 }
  0x61   :  { %9874 = vst [vmem:[#allocation96_spill] sm:$0xff] %v7410_v56  ;;  %684 = vmatpush.msrb.mxu1 %v7459_v42  ;;  %825 = vmatpush.msra.mxu0 %v7255_v40  ;;  %v58_v40 = vld [vmem:[%s9432_s2 + $0xd0] sm:$0xff] }
  0x62   :  { %9875 = vst [vmem:[#allocation97_spill] sm:$0xff] %v7413_v17  ;;  %972 = vmatpush.msrb.mxu3 %v7480_v26  ;;  %917 = vmatpush.msrb.mxu2 %v7509_v8  ;;  %v7550_v27 = vand.u32 4294901760, %v58_v40 }
  0x63   :  { %9876 = vst [vmem:[#allocation98_spill] sm:$0xff] %v7419_v54  ;;  %872 = vmatpush.msra.mxu1 %v7133_v1  ;;  %829 = vmatpush.msra.mxu0 %v7272_v46 }
  0x64   :  { %9877 = vst [vmem:[#allocation99_spill] sm:$0xff] %v7424_v49  ;;  %v7565_v44 = vsub.f32 %v58_v40, %v7550_v27  ;;  %v7581_v40 = vand.u32 4294901760, %v56_v20 }
  0x65   :  { %9878 = vst [vmem:[#allocation100_spill] sm:$0xff] %v7428_v10  ;;  %874 = vmatpush.msra.mxu1 %v7135_v2  ;;  %833 = vmatpush.msra.mxu0 %v7300_v29 }
  0x66   :  { %9879 = vst [vmem:[#allocation101_spill] sm:$0xff] %v7435_v13 }
  0x67   :  { %9880 = vst [vmem:[#allocation102_spill] sm:$0xff] %v7439_v18  ;;  %876 = vmatpush.msra.mxu1 %v7137_v6  ;;  %837 = vmatpush.msra.mxu0 %v7319_v53  ;;  %v60_v53 = vld [vmem:[%s9432_s2 + $0xe0] sm:$0xff] }
  0x68   :  { %9881 = vst [vmem:[#allocation103_spill] sm:$0xff] %v7446_v47  ;;  %v7520_v29 = vand.u32 4294901760, %v60_v53 }
  0x69   :  { %9882 = vst [vmem:[#allocation104_spill] sm:$0xff] %v7450_v58  ;;  %878 = vmatpush.msra.mxu1 %v7150_v11  ;;  %841 = vmatpush.msra.mxu0 %v7338_v50  ;;  %v7517_v50 = vsub.f32 %v61_v28, %v7509_v8  ;;  %v53_v58 = vld [vmem:[%s9432_s2 + $0xa8] sm:$0xff] }
  0x6a   :  { %9883 = vst [vmem:[#allocation105_spill] sm:$0xff] %v7455_v55  ;;  %919 = vmatpush.msrb.mxu2 %v7520_v29 }
  0x6b   :  { %9884 = vst [vmem:[#allocation106_spill] sm:$0xff] %v7459_v42  ;;  %880 = vmatpush.msra.mxu1 %v7152_v16  ;;  %845 = vmatpush.msra.mxu0 %v7354_v60  ;;  %v59_v60 = vld [vmem:[%s9432_s2 + $0xd8] sm:$0xff]  ;;  %v7528_v46 = vand.u32 4294901760, %v7517_v50  ;;  %v54_v42 = vld [vmem:[%s9432_s2 + $0xb0] sm:$0xff] }
  0x6c   :  { %9885 = vst [vmem:[#allocation107_spill] sm:$0xff] %v7474_v25  ;;  %v7534_v28 = vand.u32 4294901760, %v59_v60  ;;  %v7584_v25 = vsub.f32 %v57_v63, %v7568_v39 }
  0x6d   :  { %9886 = vst [vmem:[#allocation108_spill] sm:$0xff] %v7480_v26  ;;  %882 = vmatpush.msra.mxu1 %v7168_v33  ;;  %849 = vmatpush.msra.mxu0 %v7370_v0  ;;  %v7531_v0 = vsub.f32 %v60_v53, %v7520_v29  ;;  %v7579_v26 = vand.u32 4294901760, %v7565_v44 }
  0x6e   :  { %9887 = vst [vmem:[#allocation109_spill] sm:$0xff] %v7509_v8  ;;  %v7547_v53 = vsub.f32 %v59_v60, %v7534_v28  ;;  %921 = vmatpush.msrb.mxu2 %v7534_v28  ;;  %v7601_v63 = vand.u32 4294901760, %v7584_v25 }
  0x6f   :  { %884 = vmatpush.msra.mxu1 %v7178_v38  ;;  %9888 = vst [vmem:[#allocation110_spill] sm:$0xff] %v7517_v50  ;;  %853 = vmatpush.msra.mxu0 %v7387_v48  ;;  %v976_v48 = vsub.f32 %v7517_v50, %v7528_v46  ;;  %v7544_v31 = vand.u32 4294901760, %v7531_v0 }
  0x70   :  { %9889 = vst [vmem:[#allocation111_spill] sm:$0xff] %v7520_v29  ;;  %v7562_v60 = vand.u32 4294901760, %v7547_v53  ;;  %923 = vmatpush.msrb.mxu2 %v7550_v27 }
  0x71   :  { %886 = vmatpush.msra.mxu1 %v7195_v57  ;;  %9890 = vst [vmem:[#allocation112_spill] sm:$0xff] %v7528_v46  ;;  %857 = vmatpush.msra.mxu0 %v7406_v37  ;;  %v7557_v37 = vand.u32 4294901760, %v976_v48  ;;  %v982_v52 = vsub.f32 %v7531_v0, %v7544_v31 }
  0x72   :  { %9891 = vst [vmem:[#allocation113_spill] sm:$0xff] %v7531_v0  ;;  %925 = vmatpush.msrb.mxu2 %v7568_v39 }
  0x73   :  { %888 = vmatpush.msra.mxu1 %v7246_v62  ;;  %9892 = vst [vmem:[#allocation114_spill] sm:$0xff] %v7534_v28  ;;  %861 = vmatpush.msra.mxu0 %v7419_v54  ;;  %v7574_v48 = vand.u32 4294901760, %v982_v52  ;;  %v988_v54 = vsub.f32 %v7547_v53, %v7562_v60 }
  0x74   :  { %9893 = vst [vmem:[#allocation115_spill] sm:$0xff] %v7544_v31  ;;  %978 = vmatpush.msrb.mxu3 %v7557_v37  ;;  %927 = vmatpush.msrb.mxu2 %v7581_v40 }
  0x75   :  { %890 = vmatpush.msra.mxu1 %v7248_v30  ;;  %9894 = vst [vmem:[#allocation116_spill] sm:$0xff] %v7547_v53  ;;  %v7591_v52 = vand.u32 4294901760, %v988_v54  ;;  %v52_v30 = vld [vmem:[%s9432_s2 + $0xa0] sm:$0xff] }
  0x76   :  { %9895 = vst [vmem:[#allocation117_spill] sm:$0xff] %v7550_v27  ;;  %984 = vmatpush.msrb.mxu3 %v7574_v48 }
  0x77   :  { %892 = vmatpush.msra.mxu1 %v7267_v7  ;;  %9896 = vst [vmem:[#allocation118_spill] sm:$0xff] %v7557_v37  ;;  %v994_v37 = vsub.f32 %v7565_v44, %v7579_v26  ;;  %v7633_v7 = vand.u32 4294901760, %v53_v58 }
  0x78   :  { %9897 = vst [vmem:[#allocation119_spill] sm:$0xff] %v7562_v60  ;;  %990 = vmatpush.msrb.mxu3 %v7591_v52 }
  0x79   :  { %894 = vmatpush.msra.mxu1 %v7286_v51  ;;  %9898 = vst [vmem:[#allocation120_spill] sm:$0xff] %v7565_v44  ;;  %v7608_v54 = vand.u32 4294901760, %v994_v37  ;;  %v1000_v51 = vsub.f32 %v7584_v25, %v7601_v63 }
  0x7a   :  { %9899 = vst [vmem:[#allocation121_spill] sm:$0xff] %v7568_v39 }
  0x7b   :  { %896 = vmatpush.msra.mxu1 %v7305_v35  ;;  %9900 = vst [vmem:[#allocation122_spill] sm:$0xff] %v7574_v48  ;;  %v7616_v35 = vand.u32 4294901760, %v54_v42  ;;  %996 = vmatpush.msrb.mxu3 %v7608_v54  ;;  %v7635_v18 = vand.u32 4294901760, %v1000_v51  ;;  %v7653_v51 = vand.u32 4294901760, %v52_v30 }
  0x7c   :  { %9901 = vst [vmem:[#allocation123_spill] sm:$0xff] %v7579_v26 }
  0x7d   :  { %898 = vmatpush.msra.mxu1 %v7324_v61  ;;  %9902 = vst [vmem:[#allocation124_spill] sm:$0xff] %v7581_v40  ;;  %1002 = vmatpush.msrb.mxu3 %v7635_v18 }
  0x7e   :  { %9903 = vst [vmem:[#allocation125_spill] sm:$0xff] %v7584_v25 }
  0x7f   :  { %900 = vmatpush.msra.mxu1 %v7343_v32  ;;  %9904 = vst [vmem:[#allocation126_spill] sm:$0xff] %v7591_v52  ;;  %v7596_v32 = vsub.f32 %v56_v20, %v7581_v40 }
  0x80   :  { %9907 = vst [vmem:[#allocation129_spill] sm:$0xff] %v7601_v63 }
  0x81   :  { %902 = vmatpush.msra.mxu1 %v7359_v43  ;;  %v55_v43 = vld [vmem:[%s9432_s2 + $0xb8] sm:$0xff]  ;;  %9905 = vst [vmem:[#allocation127_spill] sm:$0xff] %v7596_v32  ;;  %v7611_v48 = vand.u32 4294901760, %v7596_v32 }
  0x82   :  { %v7598_v61 = vand.u32 4294901760, %v55_v43  ;;  %9908 = vst [vmem:[#allocation130_spill] sm:$0xff] %v7608_v54 }
  0x83   :  { %9909 = vst [vmem:[#allocation131_spill] sm:$0xff] %v7611_v48  ;;  %v1006_v37 = vsub.f32 %v7596_v32, %v7611_v48 }
  0x84   :  { %9906 = vst [vmem:[#allocation128_spill] sm:$0xff] %v7598_v61  ;;  %v7614_v20 = vsub.f32 %v55_v43, %v7598_v61  ;;  %929 = vmatpush.msrb.mxu2 %v7598_v61  ;;  %v7631_v43 = vsub.f32 %v54_v42, %v7616_v35  ;;  %v7649_v42 = vsub.f32 %v53_v58, %v7633_v7 }
  0x85   :  { %9911 = vst [vmem:[#allocation133_spill] sm:$0xff] %v7616_v35  ;;  %v7641_v54 = vand.u32 4294901760, %v1006_v37  ;;  %v51_v37 = vld [vmem:[%s9432_s2 + $0x98] sm:$0xff] }
  0x86   :  { %9910 = vst [vmem:[#allocation132_spill] sm:$0xff] %v7614_v20  ;;  %v7628_v52 = vand.u32 4294901760, %v7614_v20  ;;  %931 = vmatpush.msrb.mxu2 %v7616_v35  ;;  %v7646_v62 = vand.u32 4294901760, %v7631_v43  ;;  %v7663_v38 = vand.u32 4294901760, %v7649_v42  ;;  %v7665_v58 = vand.u32 4294901760, %v51_v37 }
  0x87   :  { %9913 = vst [vmem:[#allocation135_spill] sm:$0xff] %v7631_v43  ;;  %1008 = vmatpush.msrb.mxu3 %v7641_v54 }
  0x88   :  { %9912 = vst [vmem:[#allocation134_spill] sm:$0xff] %v7628_v52  ;;  %v1012_v10 = vsub.f32 %v7614_v20, %v7628_v52  ;;  %933 = vmatpush.msrb.mxu2 %v7633_v7  ;;  %v1018_v57 = vsub.f32 %v7631_v43, %v7646_v62  ;;  %v1024_v33 = vsub.f32 %v7649_v42, %v7663_v38 }
  0x89   :  { %9914 = vst [vmem:[#allocation136_spill] sm:$0xff] %v7633_v7  ;;  %v7680_v16 = vsub.f32 %v51_v37, %v7665_v58 }
  0x8a   :  { %9915 = vst [vmem:[#allocation137_spill] sm:$0xff] %v7635_v18  ;;  %v7658_v17 = vand.u32 4294901760, %v1012_v10  ;;  %v7669_v18 = vsub.f32 %v52_v30, %v7653_v51  ;;  %935 = vmatpush.msrb.mxu2 %v7653_v51  ;;  %v50_v10 = vld [vmem:[%s9432_s2 + $0x90] sm:$0xff]  ;;  %v7675_v59 = vand.u32 4294901760, %v1018_v57  ;;  %v49_v57 = vld [vmem:[%s9432_s2 + $0x88] sm:$0xff] }
  0x8b   :  { %9916 = vst [vmem:[#allocation138_spill] sm:$0xff] %v7641_v54  ;;  %v7682_v11 = vand.u32 4294901760, %v50_v10  ;;  %v7692_v54 = vand.u32 4294901760, %v1024_v33  ;;  %v7695_v6 = vand.u32 4294901760, %v7680_v16  ;;  %v7700_v2 = vand.u32 4294901760, %v49_v57  ;;  %v48_v33 = vld [vmem:[%s9432_s2 + $0x80] sm:$0xff] }
  0x8c   :  { %9917 = vst [vmem:[#allocation139_spill] sm:$0xff] %v7646_v62  ;;  %1014 = vmatpush.msrb.mxu3 %v7658_v17  ;;  %v7686_v30 = vand.u32 4294901760, %v7669_v18  ;;  %937 = vmatpush.msrb.mxu2 %v7665_v58  ;;  %v7717_v24 = vand.u32 4294901760, %v48_v33 }
  0x8d   :  { %9918 = vst [vmem:[#allocation140_spill] sm:$0xff] %v7649_v42  ;;  %v7698_v37 = vsub.f32 %v50_v10, %v7682_v11  ;;  %v1036_v1 = vsub.f32 %v7680_v16, %v7695_v6  ;;  %v7715_v10 = vsub.f32 %v49_v57, %v7700_v2 }
  0x8e   :  { %9919 = vst [vmem:[#allocation141_spill] sm:$0xff] %v7653_v51  ;;  %1020 = vmatpush.msrb.mxu3 %v7675_v59  ;;  %939 = vmatpush.msrb.mxu2 %v7682_v11  ;;  %v7731_v21 = vsub.f32 %v48_v33, %v7717_v24 }
  0x8f   :  { %9920 = vst [vmem:[#allocation142_spill] sm:$0xff] %v7658_v17  ;;  %v1030_v17 = vsub.f32 %v7669_v18, %v7686_v30  ;;  %v7712_v15 = vand.u32 4294901760, %v7698_v37  ;;  %v7723_v14 = vand.u32 4294901760, %v1036_v1  ;;  %v7728_v22 = vand.u32 4294901760, %v7715_v10 }
  0x90   :  { %9921 = vst [vmem:[#allocation143_spill] sm:$0xff] %v7663_v38  ;;  %1026 = vmatpush.msrb.mxu3 %v7692_v54  ;;  %941 = vmatpush.msrb.mxu2 %v7700_v2  ;;  %v7740_v1 = vand.u32 4294901760, %v7731_v21 }
  0x91   :  { %9922 = vst [vmem:[#allocation144_spill] sm:$0xff] %v7665_v58  ;;  %v1042_v12 = vsub.f32 %v7698_v37, %v7712_v15 }
  0x92   :  { %9923 = vst [vmem:[#allocation145_spill] sm:$0xff] %v7669_v18  ;;  %943 = vmatpush.msrb.mxu2 %v7717_v24  ;;  %v1054_v33 = vsub.f32 %v7731_v21, %v7740_v1 }
  0x93   :  { %9924 = vst [vmem:[#allocation146_spill] sm:$0xff] %v7675_v59  ;;  %v7720_v59 = vand.u32 4294901760, %v1030_v17  ;;  %v7735_v57 = vand.u32 4294901760, %v1042_v12  ;;  %v1048_v17 = vsub.f32 %v7715_v10, %v7728_v22  ;;  %v134_v19 = vpop.f32.mrf.mxu0 }
  0x94   :  { %9925 = vst [vmem:[#allocation147_spill] sm:$0xff] %v7680_v16 }
  0x95   :  { %9926 = vst [vmem:[#allocation148_spill] sm:$0xff] %v7682_v11  ;;  %1032 = vmatpush.msrb.mxu3 %v7720_v59 }
  0x96   :  { %9927 = vst [vmem:[#allocation149_spill] sm:$0xff] %v7686_v30 }
  0x97   :  { %9928 = vst [vmem:[#allocation150_spill] sm:$0xff] %v7692_v54  ;;  %1038 = vmatpush.msrb.mxu3 %v7723_v14  ;;  %v7743_v54 = vand.u32 4294901760, %v1048_v17  ;;  %v142_v12 = vpop.f32.mrf.mxu2 }
  0x98   :  { %9929 = vst [vmem:[#allocation151_spill] sm:$0xff] %v7695_v6  ;;  %v183_v45 = vpop.f32.mrf.mxu1 }
  0x99   :  { %9930 = vst [vmem:[#allocation152_spill] sm:$0xff] %v7698_v37  ;;  %1044 = vmatpush.msrb.mxu3 %v7735_v57  ;;  %v184_v36 = vadd.f32 %v183_v45, %v134_v19 }
  0x9a   :  { %9931 = vst [vmem:[#allocation153_spill] sm:$0xff] %v7700_v2 }
  0x9b   :  { %9932 = vst [vmem:[#allocation154_spill] sm:$0xff] %v7712_v15  ;;  %1050 = vmatpush.msrb.mxu3 %v7743_v54 }
  0x9c   :  { %9933 = vst [vmem:[#allocation155_spill] sm:$0xff] %v7715_v10  ;;  %v187_v41 = vpop.f32.mrf.mxu3  ;;  %v288_v17 = vpop.f32.mrf.mxu0 }
  0x9d   :  { %9934 = vst [vmem:[#allocation156_spill] sm:$0xff] %v7717_v24 }
  0x9e   :  { %9935 = vst [vmem:[#allocation157_spill] sm:$0xff] %v7720_v59  ;;  %v7748_v59 = vand.u32 4294901760, %v1054_v33 }
  0x9f   :  { %9936 = vst [vmem:[#allocation158_spill] sm:$0xff] %v7723_v14  ;;  %v217_v34 = vpop.f32.mrf.mxu2 }
  0xa0   :  { %9937 = vst [vmem:[#allocation159_spill] sm:$0xff] %v7728_v22  ;;  %1056 = vmatpush.msrb.mxu3 %v7748_v59  ;;  %v218_v14 = vadd.f32 %v217_v34, %v184_v36  ;;  %v317_v5 = vpop.f32.mrf.mxu1 }
  0xa1   :  { %9938 = vst [vmem:[#allocation160_spill] sm:$0xff] %v7731_v21 }
  0xa2   :  { %9939 = vst [vmem:[#allocation161_spill] sm:$0xff] %v7735_v57  ;;  %v188_v57 = vadd.f32 %v187_v41, %v142_v12 }
  0xa3   :  { %9940 = vst [vmem:[#allocation162_spill] sm:$0xff] %v7740_v1 }
  0xa4   :  { %9941 = vst [vmem:[#allocation163_spill] sm:$0xff] %v7743_v54 }
  0xa5   :  { %9942 = vst [vmem:[#allocation164_spill] sm:$0xff] %v7748_v59  ;;  %v249_v9 = vpop.f32.mrf.mxu3  ;;  %v292_v59 = vpop.f32.mrf.mxu0 }
  0xa6   :  { %v250_v4 = vadd.f32 %v249_v9, %v218_v14 }
  0xa7   :  { %v222_v3 = vpop.f32.mrf.mxu2 }
  0xa8   :  { %v289_v21 = vadd.f32 %v288_v17, %v250_v4  ;;  %v223_v10 = vadd.f32 %v222_v3, %v188_v57  ;;  %v321_v19 = vpop.f32.mrf.mxu1  ;;  %v64_v57 = vld [vmem:[%s9433_s3] sm:$0xf] }
  0xa9   :  { %1285 = vst [vmem:[#allocation1] ss:$4 sm:$0xff] %v64_v57 }
  0xaa   :  { %v318_v33 = vadd.f32 %v317_v5, %v289_v21 }
  0xac   :  { %v7752_v1 = vand.u32 4294901760, %v318_v33 }
  0xad   :  { %v255_v54 = vpop.f32.mrf.mxu3 }
  0xae   :  { %v7755_v37 = vsub.f32 %v318_v33, %v7752_v1  ;;  %v256_v22 = vadd.f32 %v255_v54, %v223_v10  ;;  %686 = vmatmul.f32.vlgmr.msrb.gmra.mxu1 %v7752_v1 }
  0xaf   :  { %1126 = vmatpush.msrb.mxu1 %v7397_v23  ;;  %v350_v9 = vpop.f32.mrf.mxu2 }
  0xb0   :  { %v293_v34 = vadd.f32 %v292_v59, %v256_v22  ;;  %744 = vmatmul.f32.vlgmr.msra.gmra.mxu2 %v7755_v37  ;;  %v7761_v4 = vand.u32 4294901760, %v7755_v37  ;;  %v433_v59 = vpop.f32.mrf.mxu0 }
  0xb1   :  { %1128 = vmatpush.msrb.mxu1 %v7410_v56  ;;  %1173 = vmatpush.msra.mxu2 %v7446_v47  ;;  %v465_v17 = vpop.f32.mrf.mxu1 }
  0xb2   :  { %v322_v3 = vadd.f32 %v321_v19, %v293_v34  ;;  %788 = vmatmul.f32.vlgmr.msra.gmra.mxu3 %v7761_v4  ;;  %v575_v5 = vsub.f32 %v7755_v37, %v7761_v4 }
  0xb3   :  { %1130 = vmatpush.msrb.mxu1 %v7509_v8  ;;  %1244 = vmatpush.msra.mxu3 %v7397_v23 }
  0xb4   :  { %v7770_v14 = vand.u32 4294901760, %v322_v3  ;;  %1177 = vmatpush.msra.mxu2 %v7455_v55  ;;  %v7773_v21 = vand.u32 4294901760, %v575_v5 }
  0xb5   :  { %1132 = vmatpush.msrb.mxu1 %v7520_v29  ;;  %1246 = vmatpush.msra.mxu3 %v7410_v56  ;;  %v399_v22 = vpop.f32.mrf.mxu3  ;;  %v70_v56 = vld [vmem:[%s9434_s4 + $0x18] sm:$0xff] }
  0xb6   :  { %v7778_v36 = vsub.f32 %v322_v3, %v7770_v14  ;;  %577 = vmatmul.f32.vlgmr.msrb.gmra.mxu0 %v7773_v21  ;;  %690 = vmatmul.f32.gmra.mxu1 %v7770_v14  ;;  %v400_v54 = vadd.f32 %v399_v22, %v350_v9 }
  0xb7   :  { %1068 = vmatpush.msrb.mxu0 %v7424_v49  ;;  %1134 = vmatpush.msrb.mxu1 %v7534_v28 }
  0xb8   :  { %1248 = vmatpush.msra.mxu3 %v7509_v8  ;;  %v358_v41 = vpop.f32.mrf.mxu2  ;;  %1181 = vmatpush.msra.mxu2 %v7528_v46  ;;  %v7787_v45 = vand.u32 4294901760, %v7778_v36  ;;  %v434_v19 = vadd.f32 %v433_v59, %v400_v54  ;;  %v438_v5 = vpop.f32.mrf.mxu0  ;;  %v7824_v54 = vld.sshfl [vmem:[#allocation1 + $0x8] sm:$0xff pattern:$0x73625140] }
  0xb9   :  { %749 = vmatmul.f32.gmra.mxu2 %v7778_v36  ;;  %1071 = vmatpush.msrb.mxu0 %v7435_v13  ;;  %v80_v13 = vld [vmem:[%s9434_s4 + $0x68] sm:$0xff] }
  0xba   :  { %1136 = vmatpush.msrb.mxu1 %v7550_v27  ;;  %1250 = vmatpush.msra.mxu3 %v7520_v29  ;;  %v583_v10 = vsub.f32 %v7778_v36, %v7787_v45  ;;  %v466_v9 = vadd.f32 %v465_v17, %v434_v19 }
  0xbb   :  { %1185 = vmatpush.msra.mxu2 %v7544_v31  ;;  %794 = vmatmul.f32.gmra.mxu3 %v7787_v45 }
  0xbc   :  { %1074 = vmatpush.msrb.mxu0 %v7517_v50  ;;  %1138 = vmatpush.msrb.mxu1 %v7568_v39  ;;  %v7802_v12 = vand.u32 4294901760, %v583_v10 }
  0xbd   :  { %1252 = vmatpush.msra.mxu3 %v7534_v28  ;;  %1189 = vmatpush.msra.mxu2 %v7562_v60  ;;  %v403_v33 = vpop.f32.mrf.mxu3  ;;  %v81_v60 = vld [vmem:[%s9434_s4 + $0x70] sm:$0xff] }
  0xbe   :  { %1077 = vmatpush.msrb.mxu0 %v7531_v0  ;;  %1140 = vmatpush.msrb.mxu1 %v7581_v40  ;;  %v404_v3 = vadd.f32 %v403_v33, %v358_v41  ;;  %v7822_v41 = vld.sshfl [vmem:[#allocation1] sm:$0xff pattern:$0x73625140]  ;;  %v471_v33 = vpop.f32.mrf.mxu1 }
  0xbf   :  { %1254 = vmatpush.msra.mxu3 %v7550_v27  ;;  %1193 = vmatpush.msra.mxu2 %v7579_v26  ;;  %4580 = vst [vmem:[#allocation1] ss:$4 sm:$0xff] %v64_v57 }
  0xc0   :  { %585 = vmatmul.f32.gmra.mxu0 %v7802_v12  ;;  %904 = vmatmul.f32.vlgmr.msra.gmra.mxu1 %v7752_v1  ;;  %v504_v34 = vpop.f32.mrf.mxu2  ;;  %v439_v10 = vadd.f32 %v438_v5, %v404_v3 }
  0xc1   :  { %1080 = vmatpush.msrb.mxu0 %v7547_v53  ;;  %1142 = vmatpush.msrb.mxu1 %v7598_v61  ;;  %v505_v22 = vadd.f32 %v504_v34, %v466_v9 }
  0xc2   :  { %1256 = vmatpush.msra.mxu3 %v7568_v39  ;;  %1197 = vmatpush.msra.mxu2 %v7601_v63  ;;  %v472_v9 = vadd.f32 %v471_v33, %v439_v10 }
  0xc3   :  { %1083 = vmatpush.msrb.mxu0 %v7565_v44  ;;  %1144 = vmatpush.msrb.mxu1 %v7616_v35 }
  0xc4   :  { %1258 = vmatpush.msra.mxu3 %v7581_v40  ;;  %1201 = vmatpush.msra.mxu2 %v7611_v48 }
  0xc5   :  { %1086 = vmatpush.msrb.mxu0 %v7584_v25  ;;  %1146 = vmatpush.msrb.mxu1 %v7633_v7  ;;  %v533_v59 = vpop.f32.mrf.mxu3 }
  0xc6   :  { %1260 = vmatpush.msra.mxu3 %v7598_v61  ;;  %1205 = vmatpush.msra.mxu2 %v7628_v52  ;;  %v534_v17 = vadd.f32 %v533_v59, %v505_v22 }
  0xc7   :  { %1089 = vmatpush.msrb.mxu0 %v7596_v32  ;;  %1148 = vmatpush.msrb.mxu1 %v7653_v51 }
  0xc8   :  { %1262 = vmatpush.msra.mxu3 %v7616_v35  ;;  %v7831_v19 = vand.u32 4294901760, %v534_v17  ;;  %1209 = vmatpush.msra.mxu2 %v7646_v62  ;;  %v508_v34 = vpop.f32.mrf.mxu2 }
  0xc9   :  { %863 = vmatmul.f32.vlgmr.msra.gmra.mxu0 %v7752_v1  ;;  %908 = vmatmul.f32.gmra.mxu1 %v7770_v14  ;;  %v509_v57 = vadd.f32 %v508_v34, %v472_v9 }
  0xca   :  { %v7837_v3 = vsub.f32 %v534_v17, %v7831_v19  ;;  %1092 = vmatpush.msrb.mxu0 %v7614_v20  ;;  %1150 = vmatpush.msrb.mxu1 %v7665_v58 }
  0xcb   :  { %1264 = vmatpush.msra.mxu3 %v7633_v7  ;;  %1213 = vmatpush.msra.mxu2 %v7663_v38 }
  0xcc   :  { %1095 = vmatpush.msrb.mxu0 %v7631_v43  ;;  %1152 = vmatpush.msrb.mxu1 %v7682_v11  ;;  %v7846_v5 = vand.u32 4294901760, %v7837_v3 }
  0xcd   :  { %1266 = vmatpush.msra.mxu3 %v7653_v51  ;;  %1217 = vmatpush.msra.mxu2 %v7686_v30  ;;  %v537_v22 = vpop.f32.mrf.mxu3 }
  0xce   :  { %1058 = vmatmul.f32.vlgmr.msrb.gmra.mxu3 %v7831_v19  ;;  %1098 = vmatpush.msrb.mxu0 %v7649_v42  ;;  %v538_v59 = vadd.f32 %v537_v22, %v509_v57  ;;  %v947_v17 = vsub.f32 %v7837_v3, %v7846_v5  ;;  %v9943_v57 = vld [vmem:[#allocation159_spill] sm:$0xff]  ;;  %v9944_v22 = vld [vmem:[#allocation152_spill] sm:$0xff] }
  0xcf   :  { %1154 = vmatpush.msrb.mxu1 %v7700_v2  ;;  %1268 = vmatpush.msra.mxu3 %v7665_v58 }
  0xd0   :  { %1221 = vmatpush.msra.mxu2 %v7695_v6  ;;  %1101 = vmatpush.msrb.mxu0 %v7669_v18  ;;  %v7856_v10 = vand.u32 4294901760, %v538_v59  ;;  %v7871_v34 = vand.u32 4294901760, %v947_v17 }
  0xd1   :  { %1156 = vmatpush.msrb.mxu1 %v7717_v24  ;;  %1270 = vmatpush.msra.mxu3 %v7682_v11 }
  0xd2   :  { %v7863_v33 = vsub.f32 %v538_v59, %v7856_v10  ;;  %1225 = vmatpush.msra.mxu2 %v7712_v15  ;;  %867 = vmatmul.f32.gmra.mxu0 %v7770_v14  ;;  %v9945_v59 = vld [vmem:[#allocation162_spill] sm:$0xff] }
  0xd3   :  { %1336 = vmatpush.xpose.msra.mxu1 %v7802_v12  ;;  %1104 = vmatpush.msrb.mxu0 %v7680_v16  ;;  %v9946_v16 = vld [vmem:[#allocation155_spill] sm:$0xff] }
  0xd4   :  { %1160 = vmatmul.f32.vlgmr.msrb.gmra.mxu1 %v7846_v5  ;;  %1272 = vmatpush.msra.mxu3 %v7700_v2  ;;  %v7874_v9 = vand.u32 4294901760, %v7863_v33 }
  0xd5   :  { %1229 = vmatpush.msra.mxu2 %v9943_v57  ;;  %1107 = vmatpush.msrb.mxu0 %v9944_v22  ;;  %v1308_v57 = vand.u32 4294901760, %v7822_v41 }
  0xd6   :  { %1274 = vmatpush.msra.mxu3 %v7717_v24  ;;  %949 = vmatmul.f32.vlgmr.msrb.gmra.mxu2 %v7871_v34  ;;  %v955_v17 = vsub.f32 %v7863_v33, %v7874_v9 }
  0xd7   :  { %1233 = vmatpush.msra.mxu2 %v9945_v59  ;;  %1342 = vmatpush.xpose.msra.mxu1 %v7773_v21  ;;  %v9947_v59 = vld [vmem:[#allocation160_spill] sm:$0xff]  ;;  %v1309_v15 = vsub.f32 %v7822_v41, %v1308_v57  ;;  %v1467_v41 = vand.u32 4294901760, %v7824_v54 }
  0xd8   :  { %1389 = vmatpush.xpose.msrb.mxu3 %v7770_v14  ;;  %1110 = vmatpush.msrb.mxu0 %v9946_v16  ;;  %v956_v22 = vand.u32 4294901760, %v955_v17 }
  0xd9   :  { %1062 = vmatmul.f32.gmra.mxu3 %v7856_v10  ;;  %1364 = vmatpush.xpose.msrb.mxu2 %v7778_v36  ;;  %v1468_v18 = vsub.f32 %v7824_v54, %v1467_v41 }
  0xda   :  { %1113 = vmatpush.msrb.mxu0 %v9947_v59  ;;  %v1310_v59 = vand.u32 4294901760, %v1309_v15 }
  0xdb   :  { %1441 = vmatpush.xpose.msrb.mxu1 %v7770_v14  ;;  %1116 = vmatmul.f32.vlgmr.msrb.gmra.mxu0 %v7837_v3  ;;  %v1469_v6 = vand.u32 4294901760, %v1468_v18 }
  0xdc   :  { %1166 = vmatmul.f32.gmra.mxu1 %v7874_v9  ;;  %1305 = vmatpush.xpose.msra.mxu0 %v7770_v14  ;;  %v1311_v17 = vsub.f32 %v1309_v15, %v1310_v59 }
  0xdd   :  { %1391 = vmatpush.xpose.msrb.mxu3 %v7752_v1  ;;  %1367 = vmatpush.xpose.msrb.mxu2 %v7755_v37 }
  0xde   :  { %957 = vmatmul.f32.gmra.mxu2 %v956_v22  ;;  %v1312_v16 = vand.u32 4294901760, %v1311_v17 }
  0xdf   :  { %1443 = vmatpush.xpose.msrb.mxu1 %v7752_v1 }
  0xe0   :  { %1307 = vmatpush.xpose.msra.mxu0 %v7752_v1 }
  0xe1   :  { %1276 = vmatmul.f32.vlgmr.msra.gmra.mxu3 %v7831_v19 }
  0xe2   :  { %1495 = vmatpush.xpose.msra.mxu3 %v956_v22 }
  0xe3   :  { %1121 = vmatmul.f32.gmra.mxu0 %v7863_v33 }
  0xe4   :  { %1416 = vmatpush.xpose.msrb.mxu0 %v7787_v45  ;;  %1344 = vmatmul.f32.vlgmr.msra.gmra.mxu1 %v1308_v57 }
  0xe5   :  { %1548 = vmatpush.xpose.msra.mxu1 %v7856_v10 }
  0xe6   :  { %1501 = vmatpush.xpose.msra.mxu3 %v7871_v34  ;;  %1235 = vmatmul.f32.vlgmr.msra.gmra.mxu2 %v7831_v19 }
  0xe7   :  { %1464 = vmatpush.xpose.msra.mxu2 %v7856_v10 }
  0xe8   :  { %1420 = vmatpush.xpose.msrb.mxu0 %v7761_v4 }
  0xe9   :  { %1550 = vmatpush.xpose.msra.mxu1 %v7831_v19  ;;  %1280 = vmatmul.f32.gmra.mxu3 %v7856_v10 }
  0xeb   :  { %1313 = vmatmul.f32.vlgmr.msra.gmra.mxu0 %v1312_v16  ;;  %1466 = vmatpush.xpose.msra.mxu2 %v7831_v19  ;;  %v1470_v16 = vsub.f32 %v1468_v18, %v1469_v6 }
  0xec   :  { %1445 = vmatmul.f32.vlgmr.msrb.gmra.mxu1 %v1308_v57  ;;  %1523 = vmatpush.xpose.msra.mxu0 %v7863_v33 }
  0xed   :  { %1756 = vmatpush.msrb.mxu1 %v7802_v12 }
  0xee   :  { %1239 = vmatmul.f32.gmra.mxu2 %v7856_v10 }
  0xef   :  { %1762 = vmatpush.msrb.mxu1 %v7773_v21  ;;  %v1471_v21 = vand.u32 4294901760, %v1470_v16 }
  0xf0   :  { %1526 = vmatpush.xpose.msra.mxu0 %v7837_v3 }
  0xf1   :  { %1395 = vmatmul.f32.vlgmr.msrb.gmra.mxu3 %v1310_v59 }
  0xf2   :  { %1600 = vmatpush.xpose.msrb.mxu3 %v7856_v10 }
  0xf3   :  { %1422 = vmatmul.f32.vlgmr.msrb.gmra.mxu0 %v1308_v57 }
  0xf4   :  { %1554 = vmatmul.f32.vlgmr.msra.gmra.mxu1 %v1469_v6  ;;  %1717 = vmatpush.msrb.mxu0 %v7770_v14 }
  0xf5   :  { %1880 = vmatpush.msra.mxu1 %v7770_v14 }
  0xf6   :  { %1602 = vmatpush.xpose.msrb.mxu3 %v7831_v19  ;;  %1719 = vmatpush.msrb.mxu0 %v7752_v1 }
  0xf7   :  { %1882 = vmatpush.msra.mxu1 %v7752_v1  ;;  %1370 = vmatmul.f32.vlgmr.msrb.gmra.mxu2 %v1309_v15 }
  0xf8   :  { %1575 = vmatpush.xpose.msrb.mxu2 %v7874_v9 }
  0xf9   :  { %1503 = vmatmul.f32.vlgmr.msra.gmra.mxu3 %v1467_v41 }
  0xfa   :  { %1818 = vmatpush.msra.mxu3 %v7770_v14 }
  0xfb   :  { %1529 = vmatmul.f32.vlgmr.msra.gmra.mxu0 %v1468_v18 }
  0xfc   :  { %1820 = vmatpush.msra.mxu3 %v7752_v1  ;;  %1579 = vmatpush.xpose.msrb.mxu2 %v7846_v5 }
  0xfd   :  { %1851 = vmatpush.msra.mxu0 %v7787_v45  ;;  %v9594_v45 = vmov 1  }
  0xfe   :  { %6740 = vset.pattern.permute.xlu1 %v9594_v45  ;;  %6742 = vset.pattern.permute.xlu2 %v9594_v45 }
  0xff   :  { %1855 = vmatpush.msra.mxu0 %v7761_v4  ;;  %1472 = vmatmul.f32.vlgmr.msra.gmra.mxu2 %v1471_v21 }
 0x100   :  { %1788 = vmatpush.msra.mxu2 %v7778_v36  ;;  %v6873_v36 = vmov 0  }
 0x101   :  { %1604 = vmatmul.f32.vlgmr.msrb.gmra.mxu3 %v1467_v41  ;;  %6739 = vset.pattern.permute.xlu0 %v6873_v36 }
 0x102   :  { %2049 = vmatpush.msrb.mxu3 %v956_v22  ;;  %1791 = vmatpush.msra.mxu2 %v7755_v37 }
 0x104   :  { %2055 = vmatpush.msrb.mxu3 %v7871_v34 }
 0x107   :  { %1581 = vmatmul.f32.vlgmr.msrb.gmra.mxu2 %v1467_v41 }
 0x108   :  { %2010 = vmatpush.msrb.mxu2 %v7856_v10 }
 0x10a   :  { %2012 = vmatpush.msrb.mxu2 %v7831_v19 }
 0x12b   :  { %v687_v6 = vpop.f32.mrf.mxu1 }
 0x133   :  { %v578_v15 = vpop.f32.mrf.mxu0  ;;  %v691_v14 = vpop.f32.mrf.mxu1 }
 0x134   :  { %v745_v4 = vpop.f32.mrf.mxu2  ;;  %v688_v12 = vadd.f32 %v687_v6, %v578_v15 }
 0x135   :  { %v789_v18 = vpop.f32.mrf.mxu3 }
 0x136   :  { %v746_v34 = vadd.f32 %v745_v4, %v688_v12 }
 0x138   :  { %v790_v59 = vadd.f32 %v789_v18, %v746_v34 }
 0x13c   :  { %v750_v57 = vpop.f32.mrf.mxu2 }
 0x13d   :  { %v586_v1 = vpop.f32.mrf.mxu0  ;;  %v905_v22 = vpop.f32.mrf.mxu1 }
 0x13e   :  { %v795_v37 = vpop.f32.mrf.mxu3  ;;  %v692_v17 = vadd.f32 %v691_v14, %v586_v1 }
 0x140   :  { %v751_v42 = vadd.f32 %v750_v57, %v692_v17 }
 0x142   :  { %v796_v20 = vadd.f32 %v795_v37, %v751_v42 }
 0x146   :  { %v864_v54 = vpop.f32.mrf.mxu0  ;;  %v909_v38 = vpop.f32.mrf.mxu1 }
 0x147   :  { %v865_v16 = vadd.f32 %v864_v54, %v790_v59 }
 0x149   :  { %v906_v43 = vadd.f32 %v905_v22, %v865_v16 }
 0x14f   :  { %v868_v21 = vpop.f32.mrf.mxu0 }
 0x150   :  { %v869_v32 = vadd.f32 %v868_v21, %v796_v20 }
 0x151   :  { %v1059_v41 = vpop.f32.mrf.mxu3  ;;  %v1161_v48 = vpop.f32.mrf.mxu1 }
 0x152   :  { %v910_v25 = vadd.f32 %v909_v38, %v869_v32 }
 0x158   :  { %v1117_v45 = vpop.f32.mrf.mxu0 }
 0x159   :  { %v950_v30 = vpop.f32.mrf.mxu2 }
 0x15a   :  { %v951_v62 = vadd.f32 %v950_v30, %v906_v43  ;;  %v1167_v43 = vpop.f32.mrf.mxu1 }
 0x15c   :  { %v1063_v15 = vpop.f32.mrf.mxu3  ;;  %v1060_v6 = vadd.f32 %v1059_v41, %v951_v62 }
 0x15e   :  { %v1118_v12 = vadd.f32 %v1117_v45, %v1060_v6 }
 0x160   :  { %v1162_v1 = vadd.f32 %v1161_v48, %v1118_v12  ;;  %v1122_v57 = vpop.f32.mrf.mxu0 }
 0x161   :  { %v958_v52 = vpop.f32.mrf.mxu2 }
 0x162   :  { %v959_v4 = vadd.f32 %v958_v52, %v910_v25  ;;  %v1345_v38 = vpop.f32.mrf.mxu1 }
 0x164   :  { %v1064_v18 = vadd.f32 %v1063_v15, %v959_v4  ;;  %v1277_v14 = vpop.f32.mrf.mxu3 }
 0x166   :  { %v1123_v22 = vadd.f32 %v1122_v57, %v1064_v18 }
 0x168   :  { %v1168_v20 = vadd.f32 %v1167_v43, %v1123_v22  ;;  %v1314_v32 = vpop.f32.mrf.mxu0 }
 0x169   :  { %v1236_v54 = vpop.f32.mrf.mxu2  ;;  %v1346_v25 = vadd.f32 %v1345_v38, %v1314_v32 }
 0x16a   :  { %v1237_v34 = vadd.f32 %v1236_v54, %v1162_v1  ;;  %v1446_v21 = vpop.f32.mrf.mxu1 }
 0x16c   :  { %v1278_v59 = vadd.f32 %v1277_v14, %v1237_v34  ;;  %v1281_v30 = vpop.f32.mrf.mxu3 }
 0x16e   :  { %1905 = vperm.xlu1 %6740, %v1278_v59   ;;  %1610 = vperm.xlu0 %6739, %v1278_v59  }
 0x170   :  { %v1423_v41 = vpop.f32.mrf.mxu0 }
 0x171   :  { %v1240_v42 = vpop.f32.mrf.mxu2 }
 0x172   :  { %v1241_v62 = vadd.f32 %v1240_v42, %v1168_v20  ;;  %v1555_v54 = vpop.f32.mrf.mxu1 }
 0x174   :  { %v1282_v37 = vadd.f32 %v1281_v30, %v1241_v62  ;;  %v1396_v45 = vpop.f32.mrf.mxu3 }
 0x176   :  { %1909 = vperm.xlu1 %6740, %v1282_v37   ;;  %1615 = vperm.xlu0 %6739, %v1282_v37  }
 0x178   :  { %v1530_v1 = vpop.f32.mrf.mxu0 }
 0x17a   :  { %v1371_v48 = vpop.f32.mrf.mxu2 }
 0x17b   :  { %v1372_v52 = vadd.f32 %v1371_v48, %v1346_v25 }
 0x17c   :  { %v1504_v12 = vpop.f32.mrf.mxu3 }
 0x17d   :  { %v1397_v17 = vadd.f32 %v1396_v45, %v1372_v52 }
 0x17e   :  { %6741 = vset.pattern.permute.xlu1 %v6873_v36 }
 0x17f   :  { %v1424_v16 = vadd.f32 %v1423_v41, %v1397_v17 }
 0x181   :  { %v1447_v15 = vadd.f32 %v1446_v21, %v1424_v16 }
 0x182   :  { %v1473_v6 = vpop.f32.mrf.mxu2 }
 0x183   :  { %v1474_v4 = vadd.f32 %v1473_v6, %v1447_v15 }
 0x184   :  { %v1605_v59 = vpop.f32.mrf.mxu3 }
 0x185   :  { %v1505_v18 = vadd.f32 %v1504_v12, %v1474_v4 }
 0x187   :  { %v1531_v14 = vadd.f32 %v1530_v1, %v1505_v18 }
 0x189   :  { %v1556_v34 = vadd.f32 %v1555_v54, %v1531_v14 }
 0x18a   :  { %v1582_v36 = vpop.f32.mrf.mxu2 }
 0x18b   :  { %v1583_v57 = vadd.f32 %v1582_v36, %v1556_v34 }
 0x18d   :  { %v1606_v22 = vadd.f32 %v1605_v59, %v1583_v57 }
 0x18f   :  { %v1912_v43 = vperm.slane %v1606_v22, 1  ;;  %v1618_v20 = vperm.slane %v1606_v22, 0 }
 0x1e0   :  { %v1906_v42 = vpop.permute.xlu1 %1905  ;;  %v1611_v62 = vpop.permute.xlu0 %1610 }
 0x1e1   :  { %v1913_v30 = vadd.f32 %v1912_v43, %v1906_v42  ;;  %v1619_v37 = vadd.f32 %v1618_v20, %v1611_v62 }
 0x1e3   :  { %vm1915_vm1 = vcmp.gt.f32.partialorder %v1913_v30, 0.0  ;;  %v1917_v38 = vmul.f32 0.2, %v1913_v30  ;;  %vm1621_vm2 = vcmp.gt.f32.partialorder %v1619_v37, 0.0  ;;  %v1623_v32 = vmul.f32 0.2, %v1619_v37 }
 0x1e5   :  { %v1919_v25 = vsel %vm1915_vm1, %v1913_v30, %v1917_v38  ;;  %v1625_v48 = vsel %vm1621_vm2, %v1619_v37, %v1623_v32 }
 0x1e6   :  { %v6708_v52 = vmul.f32 -1.442695, %v1919_v25  ;;  %v6704_v45 = vmul.f32 -1.442695, %v1625_v48 }
 0x1e8   :  { %6745 = vpow2.f32 %v6708_v52  ;;  %v1910_v17 = vpop.permute.xlu1 %1909  ;;  %v1616_v41 = vpop.permute.xlu0 %1615 }
 0x1e9   :  { %6747 = vpow2.f32 %v6704_v45  ;;  %v1914_v16 = vadd.f32 %v1912_v43, %v1910_v17  ;;  %v1620_v21 = vadd.f32 %v1618_v20, %v1616_v41 }
 0x1eb   :  { %vm1916_vm3 = vcmp.gt.f32.partialorder %v1914_v16, 0.0  ;;  %v1918_v15 = vmul.f32 0.2, %v1914_v16  ;;  %vm1622_vm4 = vcmp.gt.f32.partialorder %v1620_v21, 0.0  ;;  %v1624_v6 = vmul.f32 0.2, %v1620_v21 }
 0x1ed   :  { %v1920_v4 = vsel %vm1916_vm3, %v1914_v16, %v1918_v15  ;;  %v1626_v12 = vsel %vm1622_vm4, %v1620_v21, %v1624_v6 }
 0x1ee   :  { %v6746_v18 = vpop.eup %6745  ;;  %v6709_v1 = vmul.f32 -1.442695, %v1920_v4  ;;  %v6705_v34 = vmul.f32 -1.442695, %v1626_v12 }
 0x1ef   :  { %v6748_v14 = vpop.eup %6747  ;;  %v1927_v54 = vadd.f32 1.0, %v6746_v18 }
 0x1f0   :  { %v1633_v36 = vadd.f32 1.0, %v6748_v14  ;;  %6749 = vpow2.f32 %v6709_v1 }
 0x1f1   :  { %6751 = vrcp.f32 %v1927_v54  ;;  %v1940_v25 = vand.u32 2147483648, %v1927_v54  ;;  %vm1934_vm6 = vweird.f32 %v1927_v54  ;;  %v1938_v45 = vand.u32 2147483647, %v1927_v54 }
 0x1f2   :  { %6753 = vrcp.f32 %v1633_v36  ;;  %v1646_v21 = vand.u32 2147483648, %v1633_v36  ;;  %vm1640_vm9 = vweird.f32 %v1633_v36  ;;  %v1644_v4 = vand.u32 2147483647, %v1633_v36 }
 0x1f3   :  { %6755 = vpow2.f32 %v6705_v34  ;;  %v1941_v6 = vor.u32 1.1754944e-38, %v1940_v25  ;;  %vm1939_vm10 = vcmp.eq.f32.partialorder %v1938_v45, 8.507059e+37 }
 0x1f4   :  { %vm1645_vm14 = vcmp.eq.f32.partialorder %v1644_v4, 8.507059e+37 }
 0x1f6   :  { %v6750_v57 = vpop.eup %6749 }
 0x1f7   :  { %v6752_v59 = vpop.eup %6751  ;;  %v1928_v22 = vadd.f32 1.0, %v6750_v57 }
 0x1f8   :  { %v6754_v43 = vpop.eup %6753  ;;  %v1930_v20 = vmul.f32 %v6752_v59, %v1927_v54  ;;  %vm1935_vm5 = vweird.f32 %v6752_v59 }
 0x1f9   :  { %v6756_v42 = vpop.eup %6755  ;;  %v1636_v62 = vmul.f32 %v6754_v43, %v1633_v36  ;;  %6757 = vrcp.f32 %v1928_v22  ;;  %vm1936_vm7 = vmor %vm1934_vm6, %vm1935_vm5  ;;  %vm1641_vm8 = vweird.f32 %v6754_v43  ;;  %v1955_v34 = vand.u32 2147483648, %v1928_v22 }
 0x1fa   :  { %v1931_v30 = vsub.f32 1.0, %v1930_v20  ;;  %v1634_v37 = vadd.f32 1.0, %v6756_v42  ;;  %vm7936_vm11 = vmor %vm1640_vm9, %vm1641_vm8  ;;  %v1647_v20 = vor.u32 1.1754944e-38, %v1646_v21  ;;  %v1953_v42 = vand.u32 2147483647, %v1928_v22 }
 0x1fb   :  { %v1637_v38 = vsub.f32 1.0, %v1636_v62  ;;  %vm1949_vm13 = vweird.f32 %v1928_v22  ;;  %v1956_v25 = vor.u32 1.1754944e-38, %v1955_v34  ;;  %vm1669_vm6 = vcmask 130048  }
 0x1fc   :  { %v1932_v32 = vmul.f32 %v6752_v59, %v1931_v30  ;;  %6759 = vrcp.f32 %v1634_v37  ;;  %v1661_v30 = vand.u32 2147483648, %v1634_v37  ;;  %vm1954_vm2 = vcmp.eq.f32.partialorder %v1953_v42, 8.507059e+37 }
 0x1fd   :  { %v1638_v48 = vmul.f32 %v6754_v43, %v1637_v38  ;;  %vm1655_vm3 = vweird.f32 %v1634_v37 }
 0x1fe   :  { %v1933_v52 = vadd.f32 %v6752_v59, %v1932_v32 }
 0x1ff   :  { %v6758_v17 = vpop.eup %6757  ;;  %v1639_v41 = vadd.f32 %v6754_v43, %v1638_v48 }
 0x200   :  { %v1937_v16 = vsel %vm1936_vm7, %v6752_v59, %v1933_v52  ;;  %v1945_v15 = vmul.f32 %v6758_v17, %v1928_v22  ;;  %vm1950_vm12 = vweird.f32 %v6758_v17  ;;  %v1659_v52 = vand.u32 2147483647, %v1634_v37 }
 0x201   :  { %v1942_v14 = vsel %vm1939_vm10, %v1941_v6, %v1937_v16  ;;  %v1643_v57 = vsel %vm7936_vm11, %v6754_v43, %v1639_v41  ;;  %vm1951_vm15 = vmor %vm1949_vm13, %vm1950_vm12  ;;  %v1662_v22 = vor.u32 1.1754944e-38, %v1661_v30 }
 0x202   :  { %v6760_v12 = vpop.eup %6759  ;;  %v1946_v1 = vsub.f32 1.0, %v1945_v15  ;;  %v1648_v38 = vsel %vm1645_vm14, %v1647_v20, %v1643_v57  ;;  %v1959_v32 = vmul.f32 1.442695, %v1942_v14  ;;  %vm1660_vm5 = vcmp.eq.f32.partialorder %v1659_v52, 8.507059e+37 }
 0x203   :  { %v1651_v54 = vmul.f32 %v6760_v12, %v1634_v37  ;;  %vm1656_vm1 = vweird.f32 %v6760_v12  ;;  %v1665_v41 = vmul.f32 1.442695, %v1648_v38 }
 0x204   :  { %v1947_v59 = vmul.f32 %v6758_v17, %v1946_v1  ;;  %vm1657_vm4 = vmor %vm1655_vm3, %vm1656_vm1  ;;  %6761 = vpow2.f32 %v1959_v32 }
 0x205   :  { %v1652_v62 = vsub.f32 1.0, %v1651_v54 }
 0x206   :  { %v1948_v36 = vadd.f32 %v6758_v17, %v1947_v59 }
 0x207   :  { %v1653_v48 = vmul.f32 %v6760_v12, %v1652_v62 }
 0x208   :  { %v1952_v45 = vsel %vm1951_vm15, %v6758_v17, %v1948_v36 }
 0x209   :  { %v1957_v16 = vsel %vm1954_vm2, %v1956_v25, %v1952_v45  ;;  %v1654_v43 = vadd.f32 %v6760_v12, %v1653_v48 }
 0x20a   :  { %v1961_v21 = vmul.f32 1.442695, %v1957_v16  ;;  %v6762_v18 = vpop.eup %6761 }
 0x20b   :  { %v1658_v15 = vsel %vm1657_vm4, %v6760_v12, %v1654_v43  ;;  %v1963_v14 = vsel %vm1669_vm6, %v6762_v18, 0.0 }
 0x20c   :  { %6763 = vpow2.f32 %v1961_v21  ;;  %v1663_v6 = vsel %vm1660_vm5, %v1662_v22, %v1658_v15 }
 0x20d   :  { %v1667_v4 = vmul.f32 1.442695, %v1663_v6  ;;  %6765 = vpow2.f32 %v1665_v41 }
 0x20f   :  { %6767 = vpow2.f32 %v1667_v4 }
 0x212   :  { %v7942_v1 = vpop.eup %6763 }
 0x213   :  { %v6766_v17 = vpop.eup %6765  ;;  %v1964_v37 = vsel %vm1669_vm6, %v7942_v1, 0.0 }
 0x214   :  { %v1965_v34 = vadd.f32 %v1964_v37, %v1963_v14  ;;  %v1670_v12 = vsel %vm1669_vm6, %v6766_v17, 0.0 }
 0x215   :  { %v6768_v54 = vpop.eup %6767 }
 0x216   :  { %v1671_v57 = vsel %vm1669_vm6, %v6768_v54, 0.0  ;;  %v1966_v20 = vrot.slane %v1965_v34, 4 }
 0x217   :  { %v1672_v59 = vadd.f32 %v1671_v57, %v1670_v12 }
 0x218   :  { %v1967_v42 = vadd.f32 %v1966_v20, %v1965_v34 }
 0x219   :  { %v1673_v62 = vrot.slane %v1672_v59, 4 }
 0x21a   :  { %v1968_v36 = vrot.slane %v1967_v42, 2 }
 0x21b   :  { %v1674_v30 = vadd.f32 %v1673_v62, %v1672_v59 }
 0x21c   :  { %v1969_v38 = vadd.f32 %v1968_v36, %v1967_v42 }
 0x21d   :  { %v1675_v32 = vrot.slane %v1674_v30, 2 }
 0x21e   :  { %v1970_v25 = vrot.slane %v1969_v38, 1 }
 0x21f   :  { %v1676_v48 = vadd.f32 %v1675_v32, %v1674_v30 }
 0x220   :  { %v1971_v52 = vadd.f32 %v1970_v25, %v1969_v38 }
 0x221   :  { %v1677_v45 = vrot.slane %v1676_v48, 1 }
 0x222   :  { %6769 = vrcp.f32 %v1971_v52  ;;  %v1983_v6 = vand.u32 2147483648, %v1971_v52  ;;  %v1981_v37 = vand.u32 2147483647, %v1971_v52  ;;  %vm1977_vm8 = vweird.f32 %v1971_v52 }
 0x223   :  { %v1678_v16 = vadd.f32 %v1677_v45, %v1676_v48 }
 0x224   :  { %v1984_v59 = vor.u32 1.1754944e-38, %v1983_v6  ;;  %vm1982_vm11 = vcmp.eq.f32.partialorder %v1981_v37, 8.507059e+37 }
 0x225   :  { %6771 = vrcp.f32 %v1678_v16  ;;  %v1690_v34 = vand.u32 2147483648, %v1678_v16  ;;  %v1688_v20 = vand.u32 2147483647, %v1678_v16  ;;  %vm1684_vm12 = vweird.f32 %v1678_v16 }
 0x227   :  { %v1691_v30 = vor.u32 1.1754944e-38, %v1690_v34  ;;  %vm1689_vm14 = vcmp.eq.f32.partialorder %v1688_v20, 8.507059e+37 }
 0x228   :  { %v6770_v43 = vpop.eup %6769 }
 0x229   :  { %v1973_v41 = vmul.f32 %v6770_v43, %v1971_v52  ;;  %vm1978_vm7 = vweird.f32 %v6770_v43 }
 0x22a   :  { %vm1979_vm10 = vmor %vm1977_vm8, %vm1978_vm7 }
 0x22b   :  { %v6772_v21 = vpop.eup %6771  ;;  %v1974_v22 = vsub.f32 1.0, %v1973_v41 }
 0x22c   :  { %v1680_v15 = vmul.f32 %v6772_v21, %v1678_v16  ;;  %vm1685_vm9 = vweird.f32 %v6772_v21 }
 0x22d   :  { %v1975_v4 = vmul.f32 %v6770_v43, %v1974_v22  ;;  %vm1686_vm13 = vmor %vm1684_vm12, %vm1685_vm9 }
 0x22e   :  { %v1681_v14 = vsub.f32 1.0, %v1680_v15 }
 0x22f   :  { %v1976_v12 = vadd.f32 %v6770_v43, %v1975_v4 }
 0x230   :  { %v1682_v57 = vmul.f32 %v6772_v21, %v1681_v14 }
 0x231   :  { %v1980_v42 = vsel %vm1979_vm10, %v6770_v43, %v1976_v12 }
 0x232   :  { %v1683_v62 = vadd.f32 %v6772_v21, %v1682_v57  ;;  %v1985_v36 = vsel %vm1982_vm11, %v1984_v59, %v1980_v42 }
 0x233   :  { %v1987_v32 = vmul.f32 %v6762_v18, %v1985_v36 }
 0x234   :  { %v1687_v38 = vsel %vm1686_vm13, %v6772_v21, %v1683_v62  ;;  %v1988_v21 = vmul.f32 %v7942_v1, %v1985_v36  ;;  %v97_v62 = vld [vmem:[%s9434_s4 + $0xf0] sm:$0xff] }
 0x235   :  { %v1692_v25 = vsel %vm1689_vm14, %v1691_v30, %v1687_v38  ;;  %v1990_v22 = vsel %vm1669_vm6, %v1987_v32, 0  ;;  %v7973_v30 = vand.u32 4294901760, %v97_v62  ;;  %v96_v38 = vld [vmem:[%s9434_s4 + $0xe8] sm:$0xff] }
 0x236   :  { %v1694_v48 = vmul.f32 %v6766_v17, %v1692_v25  ;;  %v1695_v45 = vmul.f32 %v6768_v54, %v1692_v25  ;;  %v2013_v16 = vand.u32 4294901760, %v1990_v22  ;;  %v1993_v37 = vsel %vm1669_vm6, %v1988_v21, 0 }
 0x237   :  { %v2021_v12 = vand.u32 4294901760, %v1993_v37  ;;  %9952 = vst [vmem:[#allocation167_spill] sm:$0xff] %v7973_v30  ;;  %v7984_v25 = vsub.f32 %v97_v62, %v7973_v30 }
 0x238   :  { %v1697_v52 = vsel %vm1669_vm6, %v1694_v48, 0  ;;  %v1700_v41 = vsel %vm1669_vm6, %v1695_v45, 0  ;;  %v2014_v54 = vsub.f32 %v1990_v22, %v2013_v16  ;;  %v7987_v48 = vand.u32 4294901760, %v96_v38  ;;  %v95_v45 = vld [vmem:[%s9434_s4 + $0xe0] sm:$0xff] }
 0x239   :  { %v1720_v15 = vand.u32 4294901760, %v1697_v52  ;;  %v1728_v43 = vand.u32 4294901760, %v1700_v41  ;;  %v2022_v57 = vsub.f32 %v1993_v37, %v2021_v12  ;;  %9954 = vst [vmem:[#allocation169_spill] sm:$0xff] %v7984_v25 }
 0x23a   :  { %v2015_v1 = vand.u32 4294901760, %v2014_v54  ;;  %9955 = vst [vmem:[#allocation170_spill] sm:$0xff] %v7987_v48  ;;  %v8000_v22 = vsub.f32 %v96_v38, %v7987_v48 }
 0x23b   :  { %1764 = vmatmul.f32.vlgmr.msrb.gmra.mxu1 %v1720_v15  ;;  %v1721_v6 = vsub.f32 %v1697_v52, %v1720_v15  ;;  %v1729_v4 = vsub.f32 %v1700_v41, %v1728_v43  ;;  %v2023_v59 = vand.u32 4294901760, %v2022_v57  ;;  %v7997_v41 = vand.u32 4294901760, %v7984_v25 }
 0x23c   :  { %2111 = vmatpush.msrb.mxu1 %v7856_v10  ;;  %9957 = vst [vmem:[#allocation172_spill] sm:$0xff] %v8000_v22  ;;  %v8015_v21 = vand.u32 4294901760, %v8000_v22 }
 0x23d   :  { %1794 = vmatmul.f32.vlgmr.msra.gmra.mxu2 %v1721_v6  ;;  %v1722_v18 = vand.u32 4294901760, %v1721_v6  ;;  %v1730_v34 = vand.u32 4294901760, %v1729_v4  ;;  %9956 = vst [vmem:[#allocation171_spill] sm:$0xff] %v7997_v41 }
 0x23e   :  { %2113 = vmatpush.msrb.mxu1 %v7831_v19  ;;  %2144 = vmatpush.msra.mxu2 %v7874_v9  ;;  %9960 = vst [vmem:[#allocation175_spill] sm:$0xff] %v8015_v21  ;;  %v2261_v37 = vsub.f32 %v8000_v22, %v8015_v21 }
 0x23f   :  { %1824 = vmatmul.f32.vlgmr.msra.gmra.mxu3 %v1722_v18  ;;  %v1723_v17 = vsub.f32 %v1721_v6, %v1722_v18  ;;  %v1731_v9 = vsub.f32 %v1729_v4, %v1730_v34 }
 0x240   :  { %2148 = vmatpush.msra.mxu2 %v7846_v5  ;;  %2173 = vmatpush.msra.mxu3 %v7856_v10  ;;  %v2016_v5 = vsub.f32 %v2014_v54, %v2015_v1 }
 0x241   :  { %v1724_v14 = vand.u32 4294901760, %v1723_v17  ;;  %v1732_v10 = vand.u32 4294901760, %v1731_v9  ;;  %v93_v17 = vld [vmem:[%s9434_s4 + $0xd0] sm:$0xff]  ;;  %v8048_v9 = vand.u32 4294901760, %v2261_v37 }
 0x242   :  { %2175 = vmatpush.msra.mxu3 %v7831_v19  ;;  %v2017_v20 = vand.u32 4294901760, %v2016_v5  ;;  %v2024_v19 = vsub.f32 %v2022_v57, %v2023_v59 }
 0x243   :  { %1725 = vmatmul.f32.vlgmr.msrb.gmra.mxu0 %v1724_v14  ;;  %1768 = vmatmul.f32.gmra.mxu1 %v1728_v43  ;;  %9967 = vst [vmem:[#allocation182_spill] sm:$0xff] %v8048_v9 }
 0x244   :  { %2081 = vmatpush.msrb.mxu0 %v7863_v33  ;;  %v2025_v42 = vand.u32 4294901760, %v2024_v19 }
 0x245   :  { %1799 = vmatmul.f32.gmra.mxu2 %v1729_v4 }
 0x246   :  { %2084 = vmatpush.msrb.mxu0 %v7837_v3  ;;  %v98_v3 = vld [vmem:[%s9434_s4 + $0xf8] sm:$0xff] }
 0x247   :  { %1830 = vmatmul.f32.gmra.mxu3 %v1730_v34  ;;  %v7965_v33 = vand.u32 4294901760, %v98_v3  ;;  %v8037_v34 = vand.u32 4294901760, %v93_v17 }
 0x249   :  { %9950 = vst [vmem:[#allocation165_spill] sm:$0xff] %v7965_v33  ;;  %v7971_v36 = vsub.f32 %v98_v3, %v7965_v33 }
 0x24a   :  { %9965 = vst [vmem:[#allocation180_spill] sm:$0xff] %v8037_v34 }
 0x24b   :  { %1733 = vmatmul.f32.gmra.mxu0 %v1732_v10  ;;  %1884 = vmatmul.f32.vlgmr.msra.gmra.mxu1 %v1720_v15  ;;  %9951 = vst [vmem:[#allocation166_spill] sm:$0xff] %v7971_v36  ;;  %v7981_v32 = vand.u32 4294901760, %v7971_v36 }
 0x24d   :  { %2018 = vmatmul.f32.vlgmr.msrb.gmra.mxu2 %v2017_v20  ;;  %9953 = vst [vmem:[#allocation168_spill] sm:$0xff] %v7981_v32  ;;  %v2249_v52 = vsub.f32 %v7971_v36, %v7981_v32 }
 0x24e   :  { %2353 = vmatpush.msrb.mxu2 %v7971_v36 }
 0x24f   :  { %2057 = vmatmul.f32.vlgmr.msrb.gmra.mxu3 %v2013_v16  ;;  %v8010_v6 = vand.u32 4294901760, %v2249_v52 }
 0x250   :  { %2411 = vmatpush.msrb.mxu3 %v7965_v33  ;;  %2356 = vmatpush.msrb.mxu2 %v7984_v25 }
 0x251   :  { %9959 = vst [vmem:[#allocation174_spill] sm:$0xff] %v8010_v6  ;;  %2251 = vmatpush.msra.mxu1 %v8010_v6 }
 0x252   :  { %2413 = vmatpush.msrb.mxu3 %v7973_v30  ;;  %2359 = vmatpush.msrb.mxu2 %v8000_v22 }
 0x253   :  { %1857 = vmatmul.f32.vlgmr.msra.gmra.mxu0 %v1720_v15  ;;  %1888 = vmatmul.f32.gmra.mxu1 %v1728_v43  ;;  %v8003_v15 = vand.u32 4294901760, %v95_v45 }
 0x254   :  { %2198 = vmatpush.msra.mxu0 %v7965_v33  ;;  %2415 = vmatpush.msrb.mxu3 %v7987_v48 }
 0x255   :  { %2026 = vmatmul.f32.gmra.mxu2 %v2025_v42  ;;  %9958 = vst [vmem:[#allocation173_spill] sm:$0xff] %v8003_v15  ;;  %v8018_v18 = vsub.f32 %v95_v45, %v8003_v15  ;;  %v90_v45 = vld [vmem:[%s9434_s4 + $0xb8] sm:$0xff] }
 0x256   :  { %2200 = vmatpush.msra.mxu0 %v7973_v30  ;;  %2417 = vmatpush.msrb.mxu3 %v8003_v15 }
 0x257   :  { %2061 = vmatmul.f32.gmra.mxu3 %v2021_v12  ;;  %9961 = vst [vmem:[#allocation176_spill] sm:$0xff] %v8018_v18  ;;  %v8034_v14 = vand.u32 4294901760, %v8018_v18  ;;  %2362 = vmatpush.msrb.mxu2 %v8018_v18 }
 0x258   :  { %2202 = vmatpush.msra.mxu0 %v7987_v48 }
 0x259   :  { %9964 = vst [vmem:[#allocation179_spill] sm:$0xff] %v8034_v14  ;;  %v2267_v5 = vsub.f32 %v8018_v18, %v8034_v14 }
 0x25a   :  { %2204 = vmatpush.msra.mxu0 %v8003_v15 }
 0x25b   :  { %1861 = vmatmul.f32.gmra.mxu0 %v1728_v43  ;;  %2117 = vmatmul.f32.vlgmr.msrb.gmra.mxu1 %v2015_v1  ;;  %v94_v43 = vld [vmem:[%s9434_s4 + $0xd8] sm:$0xff]  ;;  %v8066_v19 = vand.u32 4294901760, %v2267_v5 }
 0x25c   :  { %v8022_v4 = vand.u32 4294901760, %v94_v43 }
 0x25d   :  { %2150 = vmatmul.f32.vlgmr.msra.gmra.mxu2 %v2013_v16  ;;  %9971 = vst [vmem:[#allocation186_spill] sm:$0xff] %v8066_v19 }
 0x25e   :  { %9962 = vst [vmem:[#allocation177_spill] sm:$0xff] %v8022_v4  ;;  %v8040_v1 = vsub.f32 %v94_v43, %v8022_v4  ;;  %2419 = vmatpush.msrb.mxu3 %v8022_v4  ;;  %2206 = vmatpush.msra.mxu0 %v8022_v4 }
 0x25f   :  { %2177 = vmatmul.f32.vlgmr.msra.gmra.mxu3 %v2013_v16  ;;  %v2255_v16 = vsub.f32 %v7984_v25, %v7997_v41 }
 0x260   :  { %9966 = vst [vmem:[#allocation181_spill] sm:$0xff] %v8040_v1  ;;  %v8058_v20 = vand.u32 4294901760, %v8040_v1  ;;  %2365 = vmatpush.msrb.mxu2 %v8040_v1  ;;  %2421 = vmatpush.msrb.mxu3 %v8037_v34 }
 0x261   :  { %2208 = vmatpush.msra.mxu0 %v8037_v34 }
 0x262   :  { %9970 = vst [vmem:[#allocation185_spill] sm:$0xff] %v8058_v20  ;;  %v2273_v38 = vsub.f32 %v8040_v1, %v8058_v20 }
 0x263   :  { %2087 = vmatmul.f32.vlgmr.msrb.gmra.mxu0 %v2014_v54  ;;  %2123 = vmatmul.f32.gmra.mxu1 %v2023_v59  ;;  %v8029_v54 = vand.u32 4294901760, %v2255_v16  ;;  %v91_v59 = vld [vmem:[%s9434_s4 + $0xc0] sm:$0xff] }
 0x264   :  { %v8074_v62 = vand.u32 4294901760, %v91_v59  ;;  %v8096_v37 = vand.u32 4294901760, %v2273_v38 }
 0x265   :  { %2154 = vmatmul.f32.gmra.mxu2 %v2021_v12  ;;  %9963 = vst [vmem:[#allocation178_spill] sm:$0xff] %v8029_v54  ;;  %2257 = vmatpush.msra.mxu1 %v8029_v54 }
 0x266   :  { %9974 = vst [vmem:[#allocation189_spill] sm:$0xff] %v8074_v62  ;;  %v8091_v16 = vsub.f32 %v91_v59, %v8074_v62 }
 0x267   :  { %2181 = vmatmul.f32.gmra.mxu3 %v2021_v12  ;;  %v92_v12 = vld [vmem:[%s9434_s4 + $0xc8] sm:$0xff]  ;;  %2263 = vmatpush.msra.mxu1 %v8048_v9  ;;  %9978 = vst [vmem:[#allocation193_spill] sm:$0xff] %v8096_v37 }
 0x268   :  { %v8055_v10 = vand.u32 4294901760, %v92_v12  ;;  %9976 = vst [vmem:[#allocation191_spill] sm:$0xff] %v8091_v16 }
 0x269   :  { %2269 = vmatpush.msra.mxu1 %v8066_v19 }
 0x26a   :  { %9969 = vst [vmem:[#allocation184_spill] sm:$0xff] %v8055_v10  ;;  %v8072_v3 = vsub.f32 %v92_v12, %v8055_v10  ;;  %2423 = vmatpush.msrb.mxu3 %v8055_v10  ;;  %2210 = vmatpush.msra.mxu0 %v8055_v10  ;;  %v89_v12 = vld [vmem:[%s9434_s4 + $0xb0] sm:$0xff] }
 0x26b   :  { %2092 = vmatmul.f32.gmra.mxu0 %v2022_v57  ;;  %v8053_v57 = vsub.f32 %v93_v17, %v8037_v34  ;;  %v8093_v17 = vand.u32 4294901760, %v90_v45  ;;  %2275 = vmatpush.msra.mxu1 %v8096_v37  ;;  %v8116_v38 = vand.u32 4294901760, %v89_v12 }
 0x26c   :  { %9973 = vst [vmem:[#allocation188_spill] sm:$0xff] %v8072_v3  ;;  %v8088_v43 = vand.u32 4294901760, %v8072_v3  ;;  %2425 = vmatpush.msrb.mxu3 %v8074_v62  ;;  %2212 = vmatpush.msra.mxu0 %v8074_v62 }
 0x26d   :  { %9968 = vst [vmem:[#allocation183_spill] sm:$0xff] %v8053_v57  ;;  %v8069_v42 = vand.u32 4294901760, %v8053_v57  ;;  %2368 = vmatpush.msrb.mxu2 %v8053_v57  ;;  %v8111_v1 = vsub.f32 %v90_v45, %v8093_v17  ;;  %v8134_v37 = vsub.f32 %v89_v12, %v8116_v38 }
 0x26e   :  { %9975 = vst [vmem:[#allocation190_spill] sm:$0xff] %v8088_v43  ;;  %v2285_v59 = vsub.f32 %v8072_v3, %v8088_v43  ;;  %2427 = vmatpush.msrb.mxu3 %v8093_v17  ;;  %2214 = vmatpush.msra.mxu0 %v8093_v17 }
 0x26f   :  { %9972 = vst [vmem:[#allocation187_spill] sm:$0xff] %v8069_v42  ;;  %v2279_v52 = vsub.f32 %v8053_v57, %v8069_v42  ;;  %2371 = vmatpush.msrb.mxu2 %v8072_v3  ;;  %v8108_v57 = vand.u32 4294901760, %v8091_v16  ;;  %v8126_v45 = vand.u32 4294901760, %v8111_v1  ;;  %v8153_v12 = vand.u32 4294901760, %v8134_v37 }
 0x270   :  { %9977 = vst [vmem:[#allocation192_spill] sm:$0xff] %v8093_v17  ;;  %v8121_v18 = vand.u32 4294901760, %v2285_v59  ;;  %v87_v59 = vld [vmem:[%s9434_s4 + $0xa0] sm:$0xff]  ;;  %2429 = vmatpush.msrb.mxu3 %v8116_v38  ;;  %2216 = vmatpush.msra.mxu0 %v8116_v38 }
 0x271   :  { %v8103_v5 = vand.u32 4294901760, %v2279_v52  ;;  %9980 = vst [vmem:[#allocation195_spill] sm:$0xff] %v8108_v57  ;;  %2374 = vmatpush.msrb.mxu2 %v8091_v16  ;;  %v88_v52 = vld [vmem:[%s9434_s4 + $0xa8] sm:$0xff]  ;;  %v2291_v3 = vsub.f32 %v8091_v16, %v8108_v57  ;;  %v2297_v19 = vsub.f32 %v8111_v1, %v8126_v45  ;;  %v8147_v9 = vand.u32 4294901760, %v87_v59 }
 0x272   :  { %9981 = vst [vmem:[#allocation196_spill] sm:$0xff] %v8111_v1  ;;  %v8128_v22 = vand.u32 4294901760, %v88_v52 }
 0x273   :  { %9979 = vst [vmem:[#allocation194_spill] sm:$0xff] %v8103_v5  ;;  %2281 = vmatpush.msra.mxu1 %v8103_v5  ;;  %2377 = vmatpush.msrb.mxu2 %v8111_v1  ;;  %v8140_v16 = vand.u32 4294901760, %v2291_v3  ;;  %v86_v3 = vld [vmem:[%s9434_s4 + $0x98] sm:$0xff]  ;;  %v8159_v1 = vand.u32 4294901760, %v2297_v19  ;;  %v8165_v5 = vsub.f32 %v87_v59, %v8147_v9  ;;  %v85_v19 = vld [vmem:[%s9434_s4 + $0x90] sm:$0xff] }
 0x274   :  { %9982 = vst [vmem:[#allocation197_spill] sm:$0xff] %v8116_v38  ;;  %v8145_v25 = vsub.f32 %v88_v52, %v8128_v22  ;;  %v8167_v36 = vand.u32 4294901760, %v86_v3  ;;  %2431 = vmatpush.msrb.mxu3 %v8128_v22  ;;  %2218 = vmatpush.msra.mxu0 %v8128_v22  ;;  %v8186_v44 = vand.u32 4294901760, %v85_v19 }
 0x275   :  { %9983 = vst [vmem:[#allocation198_spill] sm:$0xff] %v8121_v18  ;;  %2287 = vmatpush.msra.mxu1 %v8121_v18  ;;  %2380 = vmatpush.msrb.mxu2 %v8134_v37  ;;  %v2303_v18 = vsub.f32 %v8134_v37, %v8153_v12  ;;  %v8181_v54 = vand.u32 4294901760, %v8165_v5 }
 0x276   :  { %9984 = vst [vmem:[#allocation199_spill] sm:$0xff] %v8126_v45  ;;  %v8162_v52 = vand.u32 4294901760, %v8145_v25  ;;  %v8184_v6 = vsub.f32 %v86_v3, %v8167_v36  ;;  %2433 = vmatpush.msrb.mxu3 %v8147_v9  ;;  %2220 = vmatpush.msra.mxu0 %v8147_v9  ;;  %v8205_v53 = vsub.f32 %v85_v19, %v8186_v44 }
 0x277   :  { %9985 = vst [vmem:[#allocation200_spill] sm:$0xff] %v8128_v22  ;;  %2293 = vmatpush.msra.mxu1 %v8140_v16  ;;  %2383 = vmatpush.msrb.mxu2 %v8145_v25  ;;  %v2315_v3 = vsub.f32 %v8165_v5, %v8181_v54 }
 0x278   :  { %9986 = vst [vmem:[#allocation201_spill] sm:$0xff] %v8134_v37  ;;  %v2309_v59 = vsub.f32 %v8145_v25, %v8162_v52  ;;  %v8191_v37 = vand.u32 4294901760, %v2303_v18  ;;  %v8202_v63 = vand.u32 4294901760, %v8184_v6  ;;  %2435 = vmatpush.msrb.mxu3 %v8167_v36  ;;  %2222 = vmatpush.msra.mxu0 %v8167_v36 }
 0x279   :  { %9987 = vst [vmem:[#allocation202_spill] sm:$0xff] %v8140_v16  ;;  %2299 = vmatpush.msra.mxu1 %v8159_v1  ;;  %2386 = vmatpush.msrb.mxu2 %v8165_v5 }
 0x27a   :  { %9988 = vst [vmem:[#allocation203_spill] sm:$0xff] %v8145_v25  ;;  %v84_v25 = vld [vmem:[%s9434_s4 + $0x88] sm:$0xff]  ;;  %v8197_v16 = vand.u32 4294901760, %v2309_v59  ;;  %v83_v59 = vld [vmem:[%s9434_s4 + $0x80] sm:$0xff]  ;;  %v2321_v19 = vsub.f32 %v8184_v6, %v8202_v63  ;;  %2437 = vmatpush.msrb.mxu3 %v8186_v44  ;;  %2224 = vmatpush.msra.mxu0 %v8186_v44 }
 0x27b   :  { %9989 = vst [vmem:[#allocation204_spill] sm:$0xff] %v8147_v9  ;;  %2305 = vmatpush.msra.mxu1 %v8191_v37  ;;  %2389 = vmatpush.msrb.mxu2 %v8184_v6  ;;  %v8211_v18 = vand.u32 4294901760, %v84_v25  ;;  %v8223_v26 = vand.u32 4294901760, %v83_v59 }
 0x27c   :  { %9990 = vst [vmem:[#allocation205_spill] sm:$0xff] %v8153_v12 }
 0x27d   :  { %9991 = vst [vmem:[#allocation206_spill] sm:$0xff] %v8159_v1  ;;  %v8221_v1 = vand.u32 4294901760, %v8205_v53  ;;  %2311 = vmatpush.msra.mxu1 %v8197_v16  ;;  %2392 = vmatpush.msrb.mxu2 %v8205_v53  ;;  %v8237_v0 = vsub.f32 %v83_v59, %v8223_v26  ;;  %v82_v59 = vld [vmem:[%s9434_s4 + $0x78] sm:$0xff] }
 0x27e   :  { %9992 = vst [vmem:[#allocation207_spill] sm:$0xff] %v8162_v52  ;;  %2439 = vmatpush.msrb.mxu3 %v8211_v18  ;;  %2226 = vmatpush.msra.mxu0 %v8211_v18 }
 0x27f   :  { %9993 = vst [vmem:[#allocation208_spill] sm:$0xff] %v8165_v5  ;;  %v8216_v5 = vand.u32 4294901760, %v2315_v3  ;;  %v8232_v3 = vand.u32 4294901760, %v2321_v19  ;;  %v8249_v19 = vand.u32 4294901760, %v8237_v0 }
 0x280   :  { %9994 = vst [vmem:[#allocation209_spill] sm:$0xff] %v8167_v36  ;;  %2441 = vmatpush.msrb.mxu3 %v8223_v26  ;;  %2228 = vmatpush.msra.mxu0 %v8223_v26 }
 0x281   :  { %9995 = vst [vmem:[#allocation210_spill] sm:$0xff] %v8181_v54  ;;  %2317 = vmatpush.msra.mxu1 %v8216_v5 }
 0x282   :  { %9996 = vst [vmem:[#allocation211_spill] sm:$0xff] %v8184_v6  ;;  %v2327_v6 = vsub.f32 %v8205_v53, %v8221_v1  ;;  %2458 = vmatpush.msrb.mxu0 %v7981_v32  ;;  %v8290_v32 = vand.u32 4294901760, %v80_v13 }
 0x283   :  { %9997 = vst [vmem:[#allocation212_spill] sm:$0xff] %v8186_v44  ;;  %2323 = vmatpush.msra.mxu1 %v8232_v3 }
 0x284   :  { %9998 = vst [vmem:[#allocation213_spill] sm:$0xff] %v8191_v37  ;;  %v8229_v37 = vsub.f32 %v84_v25, %v8211_v18  ;;  %v8246_v25 = vand.u32 4294901760, %v2327_v6  ;;  %v8260_v6 = vand.u32 4294901760, %v82_v59  ;;  %2462 = vmatpush.msrb.mxu0 %v7997_v41 }
 0x285   :  { %9999 = vst [vmem:[#allocation214_spill] sm:$0xff] %v8197_v16 }
 0x286   :  { %10000 = vst [vmem:[#allocation215_spill] sm:$0xff] %v8202_v63  ;;  %v8243_v16 = vand.u32 4294901760, %v8229_v37  ;;  %2395 = vmatpush.msrb.mxu2 %v8229_v37  ;;  %2329 = vmatpush.msra.mxu1 %v8246_v25  ;;  %v8277_v31 = vsub.f32 %v82_v59, %v8260_v6 }
 0x287   :  { %10001 = vst [vmem:[#allocation216_spill] sm:$0xff] %v8205_v53  ;;  %2466 = vmatpush.msrb.mxu0 %v8015_v21  ;;  %v78_v21 = vld [vmem:[%s9434_s4 + $0x58] sm:$0xff] }
 0x288   :  { %10002 = vst [vmem:[#allocation217_spill] sm:$0xff] %v8211_v18  ;;  %v2333_v53 = vsub.f32 %v8229_v37, %v8243_v16  ;;  %2398 = vmatpush.msrb.mxu2 %v8237_v0 }
 0x289   :  { %10003 = vst [vmem:[#allocation218_spill] sm:$0xff] %v8216_v5  ;;  %v2339_v5 = vsub.f32 %v8237_v0, %v8249_v19  ;;  %2470 = vmatpush.msrb.mxu0 %v8034_v14 }
 0x28a   :  { %10004 = vst [vmem:[#allocation219_spill] sm:$0xff] %v8221_v1  ;;  %2570 = vmatpush.msra.mxu2 %v8260_v6 }
 0x28b   :  { %10005 = vst [vmem:[#allocation220_spill] sm:$0xff] %v8223_v26  ;;  %2474 = vmatpush.msrb.mxu0 %v8058_v20 }
 0x28c   :  { %10006 = vst [vmem:[#allocation221_spill] sm:$0xff] %v8229_v37  ;;  %v8274_v37 = vand.u32 4294901760, %v81_v60 }
 0x28d   :  { %10007 = vst [vmem:[#allocation222_spill] sm:$0xff] %v8232_v3  ;;  %v8271_v3 = vand.u32 4294901760, %v2333_v53  ;;  %v8288_v53 = vand.u32 4294901760, %v8277_v31  ;;  %2478 = vmatpush.msrb.mxu0 %v8069_v42 }
 0x28e   :  { %10008 = vst [vmem:[#allocation223_spill] sm:$0xff] %v8237_v0  ;;  %v8279_v0 = vand.u32 4294901760, %v2339_v5  ;;  %2572 = vmatpush.msra.mxu2 %v8274_v37  ;;  %v8293_v59 = vsub.f32 %v81_v60, %v8274_v37  ;;  %v79_v5 = vld [vmem:[%s9434_s4 + $0x60] sm:$0xff]  ;;  %v8309_v60 = vsub.f32 %v80_v13, %v8290_v32  ;;  %v8324_v13 = vand.u32 4294901760, %v78_v21 }
 0x28f   :  { %10009 = vst [vmem:[#allocation224_spill] sm:$0xff] %v8243_v16  ;;  %2335 = vmatpush.msra.mxu1 %v8271_v3  ;;  %v2621_v41 = vsub.f32 %v8277_v31, %v8288_v53  ;;  %2482 = vmatpush.msrb.mxu0 %v8088_v43  ;;  %v74_v43 = vld [vmem:[%s9434_s4 + $0x38] sm:$0xff] }
 0x290   :  { %10010 = vst [vmem:[#allocation225_spill] sm:$0xff] %v8246_v25  ;;  %2574 = vmatpush.msra.mxu2 %v8290_v32  ;;  %v8306_v25 = vand.u32 4294901760, %v79_v5  ;;  %v8322_v49 = vand.u32 4294901760, %v8309_v60  ;;  %v8407_v61 = vand.u32 4294901760, %v74_v43 }
 0x291   :  { %10011 = vst [vmem:[#allocation226_spill] sm:$0xff] %v8249_v19  ;;  %2341 = vmatpush.msra.mxu1 %v8279_v0  ;;  %2486 = vmatpush.msrb.mxu0 %v8108_v57 }
 0x292   :  { %10012 = vst [vmem:[#allocation227_spill] sm:$0xff] %v8271_v3  ;;  %v8304_v3 = vand.u32 4294901760, %v8293_v59  ;;  %2576 = vmatpush.msra.mxu2 %v8306_v25  ;;  %v2633_v47 = vsub.f32 %v8309_v60, %v8322_v49 }
 0x293   :  { %10013 = vst [vmem:[#allocation228_spill] sm:$0xff] %v8279_v0  ;;  %2529 = vmatpush.msrb.mxu1 %v7965_v33  ;;  %v8316_v0 = vand.u32 4294901760, %v2621_v41  ;;  %v8328_v33 = vsub.f32 %v79_v5, %v8306_v25  ;;  %v77_v41 = vld [vmem:[%s9434_s4 + $0x50] sm:$0xff]  ;;  %v8345_v5 = vsub.f32 %v78_v21, %v8324_v13  ;;  %2490 = vmatpush.msrb.mxu0 %v8126_v45 }
 0x294   :  { %10014 = vst [vmem:[#allocation229_spill] sm:$0xff] %v8309_v60  ;;  %v2627_v46 = vsub.f32 %v8293_v59, %v8304_v3  ;;  %2578 = vmatpush.msra.mxu2 %v8324_v13  ;;  %v8362_v21 = vand.u32 4294901760, %v2633_v47  ;;  %v75_v47 = vld [vmem:[%s9434_s4 + $0x40] sm:$0xff] }
 0x295   :  { %10015 = vst [vmem:[#allocation230_spill] sm:$0xff] %v8316_v0  ;;  %2531 = vmatpush.msrb.mxu1 %v7973_v30  ;;  %2623 = vmatpush.msra.mxu3 %v8316_v0  ;;  %v8342_v30 = vand.u32 4294901760, %v77_v41  ;;  %v8351_v20 = vand.u32 4294901760, %v8328_v33 }
 0x296   :  { %10016 = vst [vmem:[#allocation231_spill] sm:$0xff] %v8328_v33  ;;  %v8337_v55 = vand.u32 4294901760, %v2627_v46  ;;  %v76_v46 = vld [vmem:[%s9434_s4 + $0x48] sm:$0xff]  ;;  %2494 = vmatpush.msrb.mxu0 %v8153_v12 }
 0x297   :  { %10018 = vst [vmem:[#allocation233_spill] sm:$0xff] %v8345_v5  ;;  %2533 = vmatpush.msrb.mxu1 %v7987_v48  ;;  %2580 = vmatpush.msra.mxu2 %v8342_v30  ;;  %v8366_v48 = vand.u32 4294901760, %v8345_v5  ;;  %v8368_v11 = vand.u32 4294901760, %v76_v46  ;;  %v8371_v58 = vsub.f32 %v77_v41, %v8342_v30  ;;  %v2639_v42 = vsub.f32 %v8328_v33, %v8351_v20 }
 0x298   :  { %10017 = vst [vmem:[#allocation232_spill] sm:$0xff] %v8337_v55  ;;  %2629 = vmatpush.msra.mxu3 %v8337_v55  ;;  %2498 = vmatpush.msrb.mxu0 %v8162_v52  ;;  %v8490_v52 = vand.u32 4294901760, %v70_v56 }
 0x299   :  { %10019 = vst [vmem:[#allocation234_spill] sm:$0xff] %v8362_v21  ;;  %2535 = vmatpush.msrb.mxu1 %v8003_v15  ;;  %v2645_v55 = vsub.f32 %v8345_v5, %v8366_v48  ;;  %2582 = vmatpush.msra.mxu2 %v8368_v11  ;;  %v8385_v41 = vand.u32 4294901760, %v8371_v58  ;;  %v8387_v15 = vand.u32 4294901760, %v75_v47  ;;  %v8390_v51 = vsub.f32 %v76_v46, %v8368_v11 }
 0x29a   :  { %10020 = vst [vmem:[#allocation235_spill] sm:$0xff] %v8366_v48  ;;  %2635 = vmatpush.msra.mxu3 %v8362_v21  ;;  %v8393_v7 = vand.u32 4294901760, %v2639_v42  ;;  %2502 = vmatpush.msrb.mxu0 %v8181_v54 }
 0x29b   :  { %10021 = vst [vmem:[#allocation236_spill] sm:$0xff] %v8371_v58  ;;  %2537 = vmatpush.msrb.mxu1 %v8022_v4  ;;  %v8399_v21 = vand.u32 4294901760, %v2645_v55  ;;  %v2651_v35 = vsub.f32 %v8371_v58, %v8385_v41  ;;  %2584 = vmatpush.msra.mxu2 %v8387_v15  ;;  %v8405_v46 = vand.u32 4294901760, %v8390_v51  ;;  %v8412_v42 = vsub.f32 %v75_v47, %v8387_v15  ;;  %v73_v55 = vld [vmem:[%s9434_s4 + $0x30] sm:$0xff] }
 0x29c   :  { %10022 = vst [vmem:[#allocation237_spill] sm:$0xff] %v8385_v41  ;;  %2641 = vmatpush.msra.mxu3 %v8393_v7  ;;  %v8424_v39 = vand.u32 4294901760, %v73_v55  ;;  %2506 = vmatpush.msrb.mxu0 %v8202_v63 }
 0x29d   :  { %10023 = vst [vmem:[#allocation238_spill] sm:$0xff] %v8390_v51  ;;  %2539 = vmatpush.msrb.mxu1 %v8037_v34  ;;  %v8419_v4 = vand.u32 4294901760, %v2651_v35  ;;  %v2657_v40 = vsub.f32 %v8390_v51, %v8405_v46  ;;  %2586 = vmatpush.msra.mxu2 %v8407_v61  ;;  %v8435_v35 = vand.u32 4294901760, %v8412_v42  ;;  %v72_v34 = vld [vmem:[%s9434_s4 + $0x28] sm:$0xff] }
 0x29e   :  { %10024 = vst [vmem:[#allocation239_spill] sm:$0xff] %v8393_v7  ;;  %v8427_v7 = vsub.f32 %v74_v43, %v8407_v61  ;;  %2647 = vmatpush.msra.mxu3 %v8399_v21  ;;  %v8448_v45 = vand.u32 4294901760, %v72_v34  ;;  %2510 = vmatpush.msrb.mxu0 %v8221_v1 }
 0x29f   :  { %10025 = vst [vmem:[#allocation240_spill] sm:$0xff] %v8399_v21  ;;  %2541 = vmatpush.msrb.mxu1 %v8055_v10  ;;  %v8442_v28 = vand.u32 4294901760, %v2657_v40  ;;  %2588 = vmatpush.msra.mxu2 %v8424_v39  ;;  %v8451_v21 = vsub.f32 %v73_v55, %v8424_v39  ;;  %v2663_v40 = vsub.f32 %v8412_v42, %v8435_v35  ;;  %v71_v10 = vld [vmem:[%s9434_s4 + $0x20] sm:$0xff] }
 0x2a0   :  { %10026 = vst [vmem:[#allocation241_spill] sm:$0xff] %v8405_v46  ;;  %v8446_v43 = vand.u32 4294901760, %v8427_v7  ;;  %2653 = vmatpush.msra.mxu3 %v8419_v4  ;;  %v8469_v12 = vand.u32 4294901760, %v71_v10  ;;  %2514 = vmatpush.msrb.mxu0 %v8243_v16 }
 0x2a1   :  { %10027 = vst [vmem:[#allocation242_spill] sm:$0xff] %v8412_v42  ;;  %2543 = vmatpush.msrb.mxu1 %v8074_v62  ;;  %2590 = vmatpush.msra.mxu2 %v8448_v45  ;;  %v8467_v55 = vand.u32 4294901760, %v8451_v21  ;;  %v8477_v62 = vand.u32 4294901760, %v2663_v40 }
 0x2a2   :  { %10028 = vst [vmem:[#allocation243_spill] sm:$0xff] %v8419_v4  ;;  %v2669_v8 = vsub.f32 %v8427_v7, %v8446_v43  ;;  %v8472_v4 = vsub.f32 %v72_v34, %v8448_v45  ;;  %2659 = vmatpush.msra.mxu3 %v8442_v28  ;;  %v8496_v40 = vsub.f32 %v71_v10, %v8469_v12 }
 0x2a3   :  { %10029 = vst [vmem:[#allocation244_spill] sm:$0xff] %v8427_v7  ;;  %2545 = vmatpush.msrb.mxu1 %v8093_v17  ;;  %v2675_v7 = vsub.f32 %v8451_v21, %v8467_v55  ;;  %2592 = vmatpush.msra.mxu2 %v8469_v12 }
 0x2a4   :  { %10030 = vst [vmem:[#allocation245_spill] sm:$0xff] %v8435_v35  ;;  %v8482_v23 = vand.u32 4294901760, %v2669_v8  ;;  %v8488_v34 = vand.u32 4294901760, %v8472_v4  ;;  %2665 = vmatpush.msra.mxu3 %v8477_v62  ;;  %v69_v8 = vld [vmem:[%s9434_s4 + $0x10] sm:$0xff]  ;;  %2518 = vmatpush.msrb.mxu0 %v8249_v19 }
 0x2a5   :  { %10031 = vst [vmem:[#allocation246_spill] sm:$0xff] %v8442_v28  ;;  %2547 = vmatpush.msrb.mxu1 %v8116_v38  ;;  %v8501_v17 = vand.u32 4294901760, %v2675_v7  ;;  %2594 = vmatpush.msra.mxu2 %v8490_v52  ;;  %v8506_v54 = vand.u32 4294901760, %v69_v8  ;;  %v8509_v38 = vsub.f32 %v70_v56, %v8490_v52  ;;  %v8517_v7 = vand.u32 4294901760, %v8496_v40 }
 0x2a6   :  { %10032 = vst [vmem:[#allocation247_spill] sm:$0xff] %v8446_v43  ;;  %2671 = vmatpush.msra.mxu3 %v8482_v23 }
 0x2a7   :  { %10033 = vst [vmem:[#allocation248_spill] sm:$0xff] %v8451_v21  ;;  %v2681_v21 = vsub.f32 %v8472_v4, %v8488_v34  ;;  %2549 = vmatpush.msrb.mxu1 %v8128_v22  ;;  %2596 = vmatpush.msra.mxu2 %v8506_v54  ;;  %v8526_v63 = vand.u32 4294901760, %v8509_v38 }
 0x2a8   :  { %10034 = vst [vmem:[#allocation249_spill] sm:$0xff] %v8467_v55  ;;  %2677 = vmatpush.msra.mxu3 %v8501_v17 }
 0x2a9   :  { %10035 = vst [vmem:[#allocation250_spill] sm:$0xff] %v8472_v4  ;;  %v68_v4 = vld [vmem:[%s9434_s4 + $0x8] sm:$0xff]  ;;  %v8522_v56 = vand.u32 4294901760, %v2681_v21  ;;  %2551 = vmatpush.msrb.mxu1 %v8147_v9  ;;  %v2687_v21 = vsub.f32 %v8496_v40, %v8517_v7  ;;  %v2693_v22 = vsub.f32 %v8509_v38, %v8526_v63 }
 0x2aa   :  { %10036 = vst [vmem:[#allocation251_spill] sm:$0xff] %v8477_v62 }
 0x2ab   :  { %10037 = vst [vmem:[#allocation252_spill] sm:$0xff] %v8482_v23  ;;  %v67_v23 = vld [vmem:[%s9434_s4] sm:$0xff]  ;;  %2553 = vmatpush.msrb.mxu1 %v8167_v36  ;;  %2683 = vmatpush.msra.mxu3 %v8522_v56 }
 0x2ac   :  { %10038 = vst [vmem:[#allocation253_spill] sm:$0xff] %v8488_v34  ;;  %v8547_v1 = vand.u32 4294901760, %v67_v23 }
 0x2ad   :  { %10039 = vst [vmem:[#allocation254_spill] sm:$0xff] %v8496_v40  ;;  %v8556_v40 = vand.u32 4294901760, %v2687_v21  ;;  %2555 = vmatpush.msrb.mxu1 %v8186_v44 }
 0x2ae   :  { %10040 = vst [vmem:[#allocation255_spill] sm:$0xff] %v8501_v17  ;;  %v8567_v16 = vsub.f32 %v67_v23, %v8547_v1 }
 0x2af   :  { %10041 = vst [vmem:[#allocation256_spill] sm:$0xff] %v8506_v54  ;;  %2689 = vmatpush.msra.mxu3 %v8556_v40  ;;  %2557 = vmatpush.msrb.mxu1 %v8211_v18 }
 0x2b0   :  { %10042 = vst [vmem:[#allocation257_spill] sm:$0xff] %v8509_v38  ;;  %v8577_v21 = vand.u32 4294901760, %v8567_v16 }
 0x2b1   :  { %10043 = vst [vmem:[#allocation258_spill] sm:$0xff] %v8517_v7  ;;  %2559 = vmatpush.msrb.mxu1 %v8223_v26 }
 0x2b2   :  { %10044 = vst [vmem:[#allocation259_spill] sm:$0xff] %v8522_v56 }
 0x2b3   :  { %10045 = vst [vmem:[#allocation260_spill] sm:$0xff] %v8526_v63  ;;  %v8558_v63 = vand.u32 4294901760, %v2693_v22 }
 0x2b4   :  { %10049 = vst [vmem:[#allocation264_spill] sm:$0xff] %v8556_v40 }
 0x2b5   :  { %10050 = vst [vmem:[#allocation265_spill] sm:$0xff] %v8558_v63  ;;  %2695 = vmatpush.msra.mxu3 %v8558_v63 }
 0x2b6   :  { %10052 = vst [vmem:[#allocation267_spill] sm:$0xff] %v8567_v16 }
 0x2b7   :  { %10054 = vst [vmem:[#allocation269_spill] sm:$0xff] %v8577_v21 }
 0x2b8   :  { %v8268_v50 = vpop.f32.mrf.mxu1 }
 0x2c0   :  { %v8334_v14 = vpop.f32.mrf.mxu0  ;;  %v8347_v24 = vpop.f32.mrf.mxu2 }
 0x2c1   :  { %v8357_v0 = vpop.f32.mrf.mxu1  ;;  %v1766_v10 = vadd.f32 %v8268_v50, %v8334_v14  ;;  %v8528_v50 = vand.u32 4294901760, %v68_v4  ;;  %v8531_v14 = vsub.f32 %v69_v8, %v8506_v54 }
 0x2c2   :  { %v8359_v2 = vpop.f32.mrf.mxu3 }
 0x2c3   :  { %10046 = vst [vmem:[#allocation261_spill] sm:$0xff] %v8531_v14  ;;  %2598 = vmatpush.msra.mxu2 %v8528_v50  ;;  %v8545_v8 = vand.u32 4294901760, %v8531_v14  ;;  %v8550_v9 = vsub.f32 %v68_v4, %v8528_v50  ;;  %v1796_v17 = vadd.f32 %v8347_v24, %v1766_v10 }
 0x2c5   :  { %10047 = vst [vmem:[#allocation262_spill] sm:$0xff] %v8545_v8  ;;  %v2699_v54 = vsub.f32 %v8531_v14, %v8545_v8  ;;  %2600 = vmatpush.msra.mxu2 %v8547_v1  ;;  %v8564_v4 = vand.u32 4294901760, %v8550_v9  ;;  %v1826_v23 = vadd.f32 %v8359_v2, %v1796_v17 }
 0x2c6   :  { %10048 = vst [vmem:[#allocation263_spill] sm:$0xff] %v8550_v9 }
 0x2c7   :  { %10051 = vst [vmem:[#allocation266_spill] sm:$0xff] %v8564_v4  ;;  %v8572_v22 = vand.u32 4294901760, %v2699_v54  ;;  %v2705_v10 = vsub.f32 %v8550_v9, %v8564_v4  ;;  %v2711_v54 = vsub.f32 %v8567_v16, %v8577_v21 }
 0x2c8   :  { %v8417_v57 = vpop.f32.mrf.mxu0  ;;  %v8430_v47 = vpop.f32.mrf.mxu2 }
 0x2c9   :  { %v8461_v29 = vpop.f32.mrf.mxu1  ;;  %10053 = vst [vmem:[#allocation268_spill] sm:$0xff] %v8572_v22  ;;  %v8582_v44 = vand.u32 4294901760, %v2705_v10  ;;  %2701 = vmatpush.msra.mxu3 %v8572_v22  ;;  %v1770_v40 = vadd.f32 %v8357_v0, %v8417_v57  ;;  %v8590_v9 = vand.u32 4294901760, %v2711_v54 }
 0x2ca   :  { %v8440_v27 = vpop.f32.mrf.mxu3 }
 0x2cb   :  { %10055 = vst [vmem:[#allocation270_spill] sm:$0xff] %v8582_v44  ;;  %2707 = vmatpush.msra.mxu3 %v8582_v44  ;;  %v1801_v2 = vadd.f32 %v8430_v47, %v1770_v40 }
 0x2cc   :  { %10056 = vst [vmem:[#allocation271_spill] sm:$0xff] %v8590_v9 }
 0x2cd   :  { %2713 = vmatpush.msra.mxu3 %v8590_v9  ;;  %v1832_v14 = vadd.f32 %v8440_v27, %v1801_v2 }
 0x2d0   :  { %v1858_v28 = vpop.f32.mrf.mxu0  ;;  %v2019_v62 = vpop.f32.mrf.mxu2 }
 0x2d1   :  { %v1889_v38 = vpop.f32.mrf.mxu1  ;;  %v1859_v36 = vadd.f32 %v1858_v28, %v1826_v23 }
 0x2d2   :  { %v2058_v34 = vpop.f32.mrf.mxu3 }
 0x2d3   :  { %v2059_v63 = vadd.f32 %v2058_v34, %v2019_v62  ;;  %v1886_v17 = vadd.f32 %v8461_v29, %v1859_v36 }
 0x2d5   :  { %v1894_v0 = vmin.f32 %v1886_v17, 0.0  ;;  %vm1892_vm1 = vcmp.gt.f32.partialorder %v1886_v17, 0.0 }
 0x2d7   :  { %v1896_v62 = vmul.f32 1.442695, %v1894_v0 }
 0x2d8   :  { %v1862_v24 = vpop.f32.mrf.mxu0  ;;  %v2027_v56 = vpop.f32.mrf.mxu2 }
 0x2d9   :  { %v2118_v10 = vpop.f32.mrf.mxu1  ;;  %v1863_v23 = vadd.f32 %v1862_v24, %v1832_v14  ;;  %6773 = vpow2.f32 %v1896_v62 }
 0x2da   :  { %v2062_v19 = vpop.f32.mrf.mxu3 }
 0x2db   :  { %v2063_v54 = vadd.f32 %v2062_v19, %v2027_v56  ;;  %v1890_v47 = vadd.f32 %v1889_v38, %v1863_v23 }
 0x2dd   :  { %vm1893_vm3 = vcmp.gt.f32.partialorder %v1890_v47, 0.0 }
 0x2e0   :  { %v2088_v18 = vpop.f32.mrf.mxu0  ;;  %v2151_v16 = vpop.f32.mrf.mxu2 }
 0x2e1   :  { %v2089_v26 = vadd.f32 %v2088_v18, %v2059_v63  ;;  %v2124_v40 = vpop.f32.mrf.mxu1  ;;  %v1895_v18 = vmin.f32 %v1890_v47, 0.0 }
 0x2e2   :  { %v2178_v28 = vpop.f32.mrf.mxu3 }
 0x2e3   :  { %v2119_v22 = vadd.f32 %v2118_v10, %v2089_v26  ;;  %v1898_v14 = vmul.f32 1.442695, %v1895_v18 }
 0x2e5   :  { %v2152_v57 = vadd.f32 %v2151_v16, %v2119_v22  ;;  %v6774_v16 = vpop.eup %6773 }
 0x2e6   :  { %v6706_v22 = vadd.f32 -1.0, %v6774_v16 }
 0x2e7   :  { %v2179_v44 = vadd.f32 %v2178_v28, %v2152_v57 }
 0x2e8   :  { %v2093_v34 = vpop.f32.mrf.mxu0  ;;  %v2155_v63 = vpop.f32.mrf.mxu2 }
 0x2e9   :  { %v2187_v9 = vmin.f32 %v2179_v44, 0.0  ;;  %v2094_v21 = vadd.f32 %v2093_v34, %v2063_v54  ;;  %vm2185_vm15 = vcmp.gt.f32.partialorder %v2179_v44, 0.0 }
 0x2ea   :  { %v2182_v27 = vpop.f32.mrf.mxu3 }
 0x2eb   :  { %v2189_v29 = vmul.f32 1.442695, %v2187_v9  ;;  %v2125_v36 = vadd.f32 %v2124_v40, %v2094_v21  ;;  %v1902_v21 = vsel %vm1892_vm1, %v1886_v17, %v6706_v22  ;;  %v10057_v22 = vld [vmem:[#allocation253_spill] sm:$0xff] }
 0x2ec   :  { %v8602_v54 = vand.u32 4294901760, %v1902_v21 }
 0x2ed   :  { %6775 = vpow2.f32 %v2189_v29  ;;  %v2156_v26 = vadd.f32 %v2155_v63, %v2125_v36 }
 0x2ee   :  { %v8612_v36 = vsub.f32 %v1902_v21, %v8602_v54 }
 0x2ef   :  { %v2183_v2 = vadd.f32 %v2182_v27, %v2156_v26 }
 0x2f0   :  { %v2603_v27 = vand.u32 4294901760, %v8612_v36 }
 0x2f1   :  { %v2188_v10 = vmin.f32 %v2183_v2, 0.0  ;;  %vm2186_vm2 = vcmp.gt.f32.partialorder %v2183_v2, 0.0 }
 0x2f2   :  { %v2604_v16 = vsub.f32 %v8612_v36, %v2603_v27 }
 0x2f3   :  { %v6776_v19 = vpop.eup %6775  ;;  %v2191_v56 = vmul.f32 1.442695, %v2188_v10 }
 0x2f4   :  { %v6710_v24 = vadd.f32 -1.0, %v6776_v19  ;;  %v2605_v19 = vand.u32 4294901760, %v2604_v16 }
 0x2f5   :  { %6777 = vpow2.f32 %v2191_v56 }
 0x2f6   :  { %6779 = vpow2.f32 %v1898_v14  ;;  %v2195_v38 = vsel %vm2185_vm15, %v2179_v44, %v6710_v24 }
 0x2f7   :  { %v8597_v9 = vand.u32 4294901760, %v2195_v38 }
 0x2f9   :  { %v2230_v0 = vsub.f32 %v2195_v38, %v8597_v9  ;;  %2343 = vmatmul.f32.vlgmr.msra.gmra.mxu1 %v8597_v9  ;;  %v10058_v38 = vld [vmem:[#allocation244_spill] sm:$0xff] }
 0x2fa   :  { %2783 = vmatpush.msra.mxu1 %v8260_v6 }
 0x2fb   :  { %v6778_v28 = vpop.eup %6777  ;;  %2401 = vmatmul.f32.vlgmr.msrb.gmra.mxu2 %v2230_v0  ;;  %v2231_v57 = vand.u32 4294901760, %v2230_v0 }
 0x2fc   :  { %v6780_v23 = vpop.eup %6779  ;;  %v6711_v62 = vadd.f32 -1.0, %v6778_v28  ;;  %2785 = vmatpush.msra.mxu1 %v8274_v37  ;;  %2830 = vmatpush.msrb.mxu2 %v8288_v53  ;;  %v10060_v28 = vld [vmem:[#allocation256_spill] sm:$0xff] }
 0x2fd   :  { %2445 = vmatmul.f32.vlgmr.msrb.gmra.mxu3 %v2231_v57  ;;  %v2232_v44 = vsub.f32 %v2230_v0, %v2231_v57  ;;  %v6707_v34 = vadd.f32 -1.0, %v6780_v23  ;;  %v10059_v0 = vld [vmem:[#allocation248_spill] sm:$0xff]  ;;  %v10063_v23 = vld [vmem:[#allocation254_spill] sm:$0xff] }
 0x2fe   :  { %v2196_v17 = vsel %vm2186_vm2, %v2183_v2, %v6711_v62  ;;  %2787 = vmatpush.msra.mxu1 %v8290_v32  ;;  %2834 = vmatpush.msrb.mxu2 %v8304_v3  ;;  %v10061_v57 = vld [vmem:[#allocation260_spill] sm:$0xff]  ;;  %v10064_v62 = vld [vmem:[#allocation257_spill] sm:$0xff] }
 0x2ff   :  { %v8608_v40 = vand.u32 4294901760, %v2196_v17  ;;  %2901 = vmatpush.msrb.mxu3 %v8260_v6  ;;  %v2233_v29 = vand.u32 4294901760, %v2232_v44  ;;  %v1903_v26 = vsel %vm1893_vm3, %v1890_v47, %v6707_v34  ;;  %v10065_v44 = vld [vmem:[#allocation269_spill] sm:$0xff]  ;;  %v10067_v34 = vld [vmem:[#allocation263_spill] sm:$0xff] }
 0x300   :  { %2789 = vmatpush.msra.mxu1 %v8306_v25  ;;  %2838 = vmatpush.msrb.mxu2 %v8322_v49  ;;  %v8626_v10 = vand.u32 4294901760, %v1903_v26 }
 0x301   :  { %2903 = vmatpush.msrb.mxu3 %v8274_v37  ;;  %2234 = vmatmul.f32.vlgmr.msra.gmra.mxu0 %v2233_v29  ;;  %v2238_v63 = vsub.f32 %v2196_v17, %v8608_v40  ;;  %v10066_v17 = vld [vmem:[#allocation261_spill] sm:$0xff] }
 0x302   :  { %2347 = vmatmul.f32.gmra.mxu1 %v8608_v40  ;;  %2725 = vmatpush.msra.mxu0 %v8277_v31  ;;  %v2610_v14 = vsub.f32 %v1903_v26, %v8626_v10 }
 0x303   :  { %2791 = vmatpush.msra.mxu1 %v8324_v13  ;;  %2842 = vmatpush.msrb.mxu2 %v8351_v20  ;;  %v2239_v18 = vand.u32 4294901760, %v2238_v63 }
 0x304   :  { %2905 = vmatpush.msrb.mxu3 %v8290_v32  ;;  %2406 = vmatmul.f32.gmra.mxu2 %v2238_v63  ;;  %v2611_v56 = vand.u32 4294901760, %v2610_v14 }
 0x305   :  { %2728 = vmatpush.msra.mxu0 %v8293_v59  ;;  %2793 = vmatpush.msra.mxu1 %v8342_v30  ;;  %v2240_v2 = vsub.f32 %v2238_v63, %v2239_v18 }
 0x306   :  { %2846 = vmatpush.msrb.mxu2 %v8366_v48  ;;  %2907 = vmatpush.msrb.mxu3 %v8306_v25  ;;  %v2612_v24 = vsub.f32 %v2610_v14, %v2611_v56 }
 0x307   :  { %2451 = vmatmul.f32.gmra.mxu3 %v2239_v18  ;;  %2731 = vmatpush.msra.mxu0 %v8309_v60  ;;  %v2241_v47 = vand.u32 4294901760, %v2240_v2 }
 0x308   :  { %2795 = vmatpush.msra.mxu1 %v8368_v11  ;;  %2850 = vmatpush.msrb.mxu2 %v8385_v41  ;;  %v2613_v21 = vand.u32 4294901760, %v2612_v24 }
 0x309   :  { %2909 = vmatpush.msrb.mxu3 %v8324_v13  ;;  %2734 = vmatpush.msra.mxu0 %v8328_v33 }
 0x30a   :  { %2797 = vmatpush.msra.mxu1 %v8387_v15  ;;  %2854 = vmatpush.msrb.mxu2 %v8405_v46 }
 0x30b   :  { %2911 = vmatpush.msrb.mxu3 %v8342_v30  ;;  %2242 = vmatmul.f32.gmra.mxu0 %v2241_v47 }
 0x30c   :  { %2561 = vmatmul.f32.vlgmr.msrb.gmra.mxu1 %v8597_v9  ;;  %2737 = vmatpush.msra.mxu0 %v8345_v5 }
 0x30d   :  { %2799 = vmatpush.msra.mxu1 %v8407_v61  ;;  %2858 = vmatpush.msrb.mxu2 %v8435_v35 }
 0x30e   :  { %2913 = vmatpush.msrb.mxu3 %v8368_v11  ;;  %2606 = vmatmul.f32.vlgmr.msra.gmra.mxu2 %v2605_v19 }
 0x30f   :  { %2740 = vmatpush.msra.mxu0 %v8371_v58  ;;  %2801 = vmatpush.msra.mxu1 %v8424_v39 }
 0x310   :  { %2862 = vmatpush.msrb.mxu2 %v8446_v43  ;;  %2915 = vmatpush.msrb.mxu3 %v8387_v15 }
 0x311   :  { %2715 = vmatmul.f32.vlgmr.msra.gmra.mxu3 %v8602_v54  ;;  %2743 = vmatpush.msra.mxu0 %v8390_v51 }
 0x312   :  { %2803 = vmatpush.msra.mxu1 %v8448_v45  ;;  %2866 = vmatpush.msrb.mxu2 %v8467_v55 }
 0x313   :  { %2917 = vmatpush.msrb.mxu3 %v8407_v61  ;;  %2746 = vmatpush.msra.mxu0 %v8412_v42 }
 0x314   :  { %2805 = vmatpush.msra.mxu1 %v8469_v12  ;;  %2870 = vmatpush.msrb.mxu2 %v10057_v22 }
 0x315   :  { %2919 = vmatpush.msrb.mxu3 %v8424_v39  ;;  %2520 = vmatmul.f32.vlgmr.msrb.gmra.mxu0 %v8597_v9  ;;  %v10062_v9 = vld [vmem:[#allocation250_spill] sm:$0xff] }
 0x316   :  { %2565 = vmatmul.f32.gmra.mxu1 %v8608_v40  ;;  %2749 = vmatpush.msra.mxu0 %v10058_v38 }
 0x317   :  { %2807 = vmatpush.msra.mxu1 %v8490_v52  ;;  %2874 = vmatpush.msrb.mxu2 %v8517_v7 }
 0x318   :  { %2921 = vmatpush.msrb.mxu3 %v8448_v45  ;;  %2614 = vmatmul.f32.gmra.mxu2 %v2613_v21 }
 0x319   :  { %2752 = vmatpush.msra.mxu0 %v10059_v0  ;;  %2809 = vmatpush.msra.mxu1 %v10060_v28 }
 0x31a   :  { %2878 = vmatpush.msrb.mxu2 %v10061_v57  ;;  %2923 = vmatpush.msrb.mxu3 %v8469_v12 }
 0x31b   :  { %2719 = vmatmul.f32.gmra.mxu3 %v8626_v10  ;;  %2755 = vmatpush.msra.mxu0 %v10062_v9 }
 0x31c   :  { %2811 = vmatpush.msra.mxu1 %v8528_v50  ;;  %2882 = vmatpush.msrb.mxu2 %v8545_v8 }
 0x31d   :  { %2925 = vmatpush.msrb.mxu3 %v8490_v52  ;;  %2758 = vmatpush.msra.mxu0 %v10063_v23 }
 0x31e   :  { %2813 = vmatpush.msra.mxu1 %v8547_v1  ;;  %2886 = vmatpush.msrb.mxu2 %v8564_v4 }
 0x31f   :  { %2927 = vmatpush.msrb.mxu3 %v10060_v28  ;;  %2524 = vmatmul.f32.gmra.mxu0 %v8608_v40  ;;  %v10068_v40 = vld [vmem:[#allocation267_spill] sm:$0xff] }
 0x320   :  { %2817 = vmatmul.f32.vlgmr.msra.gmra.mxu1 %v2603_v27  ;;  %2761 = vmatpush.msra.mxu0 %v10064_v62 }
 0x321   :  { %2890 = vmatpush.msrb.mxu2 %v10065_v44  ;;  %2929 = vmatpush.msrb.mxu3 %v8528_v50 }
 0x322   :  { %2892 = vmatmul.f32.vlgmr.msrb.gmra.mxu2 %v8602_v54  ;;  %2764 = vmatpush.msra.mxu0 %v10066_v17 }
 0x323   :  { %2931 = vmatpush.msrb.mxu3 %v8547_v1 }
 0x324   :  { %2933 = vmatmul.f32.vlgmr.msrb.gmra.mxu3 %v8602_v54  ;;  %2767 = vmatpush.msra.mxu0 %v10067_v34 }
 0x326   :  { %2770 = vmatpush.msra.mxu0 %v10068_v40 }
 0x327   :  { %2773 = vmatmul.f32.vlgmr.msra.gmra.mxu0 %v8612_v36 }
 0x328   :  { %2823 = vmatmul.f32.gmra.mxu1 %v2611_v56 }
 0x32a   :  { %2896 = vmatmul.f32.gmra.mxu2 %v8626_v10 }
 0x32c   :  { %2937 = vmatmul.f32.gmra.mxu3 %v8626_v10 }
 0x32f   :  { %2778 = vmatmul.f32.gmra.mxu0 %v2610_v14 }
 0x376   :  { %v2344_v29 = vpop.f32.mrf.mxu1 }
 0x37e   :  { %v2235_v63 = vpop.f32.mrf.mxu0  ;;  %v2402_v26 = vpop.f32.mrf.mxu2 }
 0x37f   :  { %v2348_v27 = vpop.f32.mrf.mxu1  ;;  %v2345_v16 = vadd.f32 %v2344_v29, %v2235_v63 }
 0x380   :  { %v2446_v18 = vpop.f32.mrf.mxu3 }
 0x381   :  { %v2403_v24 = vadd.f32 %v2402_v26, %v2345_v16 }
 0x383   :  { %v2447_v56 = vadd.f32 %v2446_v18, %v2403_v24  ;;  %v66_v18 = vld [vmem:[%s9435_s5 + $0x1] sm:$0x1] }
 0x387   :  { %v2407_v47 = vpop.f32.mrf.mxu2 }
 0x388   :  { %v2243_v2 = vpop.f32.mrf.mxu0 }
 0x389   :  { %v2562_v19 = vpop.f32.mrf.mxu1  ;;  %v2349_v34 = vadd.f32 %v2348_v27, %v2243_v2 }
 0x38a   :  { %v2452_v54 = vpop.f32.mrf.mxu3 }
 0x38b   :  { %v2408_v44 = vadd.f32 %v2407_v47, %v2349_v34 }
 0x38d   :  { %v2453_v23 = vadd.f32 %v2452_v54, %v2408_v44  ;;  %v6744_v44 = vld [vmem:[%s9435_s5] ss:$0 sm:$0xff] }
 0x391   :  { %v2607_v40 = vpop.f32.mrf.mxu2 }
 0x392   :  { %v2521_v21 = vpop.f32.mrf.mxu0 }
 0x393   :  { %v2522_v17 = vadd.f32 %v2521_v21, %v2447_v56  ;;  %v2566_v10 = vpop.f32.mrf.mxu1 }
 0x394   :  { %v2716_v36 = vpop.f32.mrf.mxu3 }
 0x395   :  { %v2563_v14 = vadd.f32 %v2562_v19, %v2522_v17 }
 0x397   :  { %v2608_v9 = vadd.f32 %v2607_v40, %v2563_v14 }
 0x399   :  { %v2717_v0 = vadd.f32 %v2716_v36, %v2608_v9 }
 0x39b   :  { %v2615_v4 = vpop.f32.mrf.mxu2 }
 0x39c   :  { %v2525_v62 = vpop.f32.mrf.mxu0 }
 0x39d   :  { %v2526_v57 = vadd.f32 %v2525_v62, %v2453_v23  ;;  %v2818_v29 = vpop.f32.mrf.mxu1  ;;  %v2951_v23 = vsel %vm101_vm0, %v66_v18, 0 }
 0x39e   :  { %v2720_v8 = vpop.f32.mrf.mxu3  ;;  %v8701_v40 = vand.u32 4294901760, %v2951_v23 }
 0x39f   :  { %v2567_v7 = vadd.f32 %v2566_v10, %v2526_v57 }
 0x3a0   :  { %10069 = vst [vmem:[#allocation256_spill] sm:$0xff] %v8701_v40  ;;  %v8706_v36 = vsub.f32 %v2951_v23, %v8701_v40 }
 0x3a1   :  { %v2616_v27 = vadd.f32 %v2615_v4, %v2567_v7 }
 0x3a2   :  { %10070 = vst [vmem:[#allocation272_spill] sm:$0xff] %v8706_v36 }
 0x3a3   :  { %v2721_v9 = vadd.f32 %v2720_v8, %v2616_v27 }
 0x3a4   :  { %v2774_v63 = vpop.f32.mrf.mxu0 }
 0x3a5   :  { %v2775_v26 = vadd.f32 %v2774_v63, %v2717_v0  ;;  %v2893_v16 = vpop.f32.mrf.mxu2  ;;  %v2824_v54 = vpop.f32.mrf.mxu1  ;;  %v8709_v63 = vand.u32 4294901760, %v8706_v36 }
 0x3a7   :  { %v2819_v34 = vadd.f32 %v2818_v29, %v2775_v26  ;;  %v2934_v2 = vpop.f32.mrf.mxu3  ;;  %10071 = vst [vmem:[#allocation273_spill] sm:$0xff] %v8709_v63 }
 0x3a9   :  { %v2894_v17 = vadd.f32 %v2893_v16, %v2819_v34 }
 0x3ab   :  { %v2935_v57 = vadd.f32 %v2934_v2, %v2894_v17 }
 0x3ac   :  { %v2779_v62 = vpop.f32.mrf.mxu0 }
 0x3ad   :  { %v2780_v0 = vadd.f32 %v2779_v62, %v2721_v9  ;;  %v2942_v47 = vmul.f32 %v6744_v44, %v2935_v57  ;;  %v2897_v4 = vpop.f32.mrf.mxu2  ;;  %v2954_v24 = vsel %vm101_vm0, %v2935_v57, 0  ;;  %v3217_v21 = vand.u32 4294901760, %v2935_v57 }
 0x3ae   :  { %v2975_v14 = vand.u32 4294901760, %v2954_v24  ;;  %v2980_v62 = vsub.f32 %v8706_v36, %v8709_v63 }
 0x3af   :  { %v2825_v19 = vadd.f32 %v2824_v54, %v2780_v0  ;;  %v2944_v7 = vsel %vm101_vm0, %v2942_v47, 0.0  ;;  %v2938_v8 = vpop.f32.mrf.mxu3  ;;  %v3257_v29 = vsub.f32 %v2935_v57, %v3217_v21 }
 0x3b0   :  { %2945 = vadd.xlane.f32.xlu2 %v2944_v7  ;;  %v3007_v2 = vsub.f32 %v2954_v24, %v2975_v14  ;;  %v8715_v7 = vand.u32 4294901760, %v2980_v62 }
 0x3b1   :  { %v2898_v56 = vadd.f32 %v2897_v4, %v2825_v19  ;;  %v3258_v9 = vand.u32 4294901760, %v3257_v29 }
 0x3b2   :  { %v3008_v54 = vand.u32 4294901760, %v3007_v2  ;;  %10072 = vst [vmem:[#allocation274_spill] sm:$0xff] %v8715_v7 }
 0x3b3   :  { %v2939_v10 = vadd.f32 %v2938_v8, %v2898_v56  ;;  %v3259_v19 = vsub.f32 %v3257_v29, %v3258_v9 }
 0x3b4   :  { %v3009_v56 = vsub.f32 %v3007_v2, %v3008_v54 }
 0x3b5   :  { %v2957_v26 = vsel %vm101_vm0, %v2939_v10, 0  ;;  %v2943_v16 = vmul.f32 %v6744_v44, %v2939_v10  ;;  %v3215_v18 = vand.u32 4294901760, %v2939_v10  ;;  %v3260_v8 = vand.u32 4294901760, %v3259_v19 }
 0x3b6   :  { %v2973_v27 = vand.u32 4294901760, %v2957_v26 }
 0x3b7   :  { %v2947_v34 = vsel %vm101_vm0, %v2943_v16, 0.0  ;;  %v3251_v17 = vsub.f32 %v2939_v10, %v3215_v18  ;;  %v3010_v10 = vand.u32 4294901760, %v3009_v56  ;;  %v10074_v16 = vld [vmem:[#allocation6_spill] sm:$0xff] }
 0x3b8   :  { %2974 = vmatpush.xpose.msrb.mxu0 %v2973_v27  ;;  %3058 = vmatpush.xpose.msra.mxu3 %v2973_v27  ;;  %v3001_v23 = vsub.f32 %v2957_v26, %v2973_v27  ;;  %v10073_v26 = vld [vmem:[#allocation5_spill] sm:$0xff] }
 0x3b9   :  { %2948 = vadd.xlane.f32.xlu2 %v2947_v34  ;;  %v3252_v57 = vand.u32 4294901760, %v3251_v17  ;;  %v10075_v34 = vld [vmem:[#allocation7_spill] sm:$0xff] }
 0x3ba   :  { %3033 = vmatpush.xpose.msra.mxu2 %v3001_v23  ;;  %v3002_v0 = vand.u32 4294901760, %v3001_v23 }
 0x3bb   :  { %v3253_v47 = vsub.f32 %v3251_v17, %v3252_v57 }
 0x3bc   :  { %2976 = vmatpush.xpose.msrb.mxu0 %v2975_v14  ;;  %3060 = vmatpush.xpose.msra.mxu3 %v2975_v14  ;;  %v3003_v44 = vsub.f32 %v3001_v23, %v3002_v0  ;;  %v10080_v23 = vld [vmem:[#allocation24_spill] sm:$0xff] }
 0x3bd   :  { %v3254_v4 = vand.u32 4294901760, %v3253_v47 }
 0x3be   :  { %3036 = vmatpush.xpose.msra.mxu2 %v3007_v2  ;;  %v3004_v24 = vand.u32 4294901760, %v3003_v44  ;;  %v10076_v2 = vld [vmem:[#allocation8_spill] sm:$0xff] }
 0x3bf   :  { %2982 = vmatmul.f32.vlgmr.msrb.gmra.mxu0 %v8715_v7  ;;  %3064 = vmatmul.f32.vlgmr.msra.gmra.mxu3 %v8709_v63 }
 0x3c0   :  { %3085 = vmatpush.xpose.msra.mxu0 %v3002_v0  ;;  %3255 = vmatpush.msrb.mxu3 %v3254_v4 }
 0x3c1   :  { %3005 = vmatpush.xpose.msrb.mxu1 %v3004_v24  ;;  %3039 = vmatmul.f32.vlgmr.msra.gmra.mxu2 %v8706_v36 }
 0x3c2   :  { %3216 = vmatpush.msrb.mxu2 %v3215_v18  ;;  %3261 = vmatpush.msrb.mxu3 %v3260_v8 }
 0x3c4   :  { %3089 = vmatpush.xpose.msra.mxu0 %v3008_v54  ;;  %3218 = vmatpush.msrb.mxu2 %v3217_v21 }
 0x3c5   :  { %3379 = vmatpush.msra.mxu3 %v3215_v18  ;;  %3011 = vmatpush.xpose.msrb.mxu1 %v3010_v10 }
 0x3c6   :  { %3350 = vmatpush.msra.mxu2 %v3252_v57 }
 0x3c7   :  { %3381 = vmatpush.msra.mxu3 %v3217_v21  ;;  %3091 = vmatmul.f32.vlgmr.msra.gmra.mxu0 %v8701_v40 }
 0x3c8   :  { %3287 = vmatpush.msrb.mxu0 %v3251_v17  ;;  %3354 = vmatpush.msra.mxu2 %v3258_v9  ;;  %v10079_v17 = vld [vmem:[#allocation21_spill] sm:$0xff] }
 0x3c9   :  { %3110 = vmatpush.xpose.msra.mxu1 %v2973_v27  ;;  %v10078_v27 = vld [vmem:[#allocation20_spill] sm:$0xff] }
 0x3ca   :  { %3290 = vmatpush.msrb.mxu0 %v3257_v29  ;;  %3013 = vmatmul.f32.vlgmr.msrb.gmra.mxu1 %v8701_v40  ;;  %v10077_v29 = vld [vmem:[#allocation19_spill] sm:$0xff] }
 0x3cc   :  { %3417 = vmatpush.msra.mxu0 %v10073_v26 }
 0x3cd   :  { %3112 = vmatpush.xpose.msra.mxu1 %v2975_v14 }
 0x3ce   :  { %3419 = vmatpush.msra.mxu0 %v10074_v16 }
 0x3d0   :  { %3421 = vmatpush.msra.mxu0 %v10075_v34 }
 0x3d1   :  { %3317 = vmatpush.msrb.mxu1 %v3215_v18 }
 0x3d2   :  { %3423 = vmatpush.msra.mxu0 %v10076_v2  ;;  %3114 = vmatmul.f32.vlgmr.msra.gmra.mxu1 %v8701_v40 }
 0x3d3   :  { %3319 = vmatpush.msrb.mxu1 %v3217_v21 }
 0x3d5   :  { %3458 = vmatpush.msra.mxu1 %v10077_v29 }
 0x3d7   :  { %3464 = vmatpush.msra.mxu1 %v10078_v27 }
 0x3d9   :  { %3470 = vmatpush.msra.mxu1 %v10079_v17 }
 0x3db   :  { %3476 = vmatpush.msra.mxu1 %v10080_v23 }
 0x423   :  { %v2946_v18 = vpop.xlane.xlu2 %2945 }
 0x42c   :  { %v2949_v56 = vpop.xlane.xlu2 %2948 }
 0x43c   :  { %v2983_v9 = vpop.f32.mrf.mxu0 }
 0x442   :  { %v3065_v0 = vpop.f32.mrf.mxu3 }
 0x444   :  { %v3040_v62 = vpop.f32.mrf.mxu2  ;;  %v3092_v21 = vpop.f32.mrf.mxu0 }
 0x447   :  { %v3014_v14 = vpop.f32.mrf.mxu1 }
 0x448   :  { %v3015_v57 = vadd.f32 %v3014_v14, %v2983_v9 }
 0x44a   :  { %v3041_v47 = vadd.f32 %v3040_v62, %v3015_v57 }
 0x44c   :  { %v3066_v54 = vadd.f32 %v3065_v0, %v3041_v47 }
 0x44e   :  { %v3093_v44 = vadd.f32 %v3092_v21, %v3066_v54 }
 0x44f   :  { %v3115_v19 = vpop.f32.mrf.mxu1 }
 0x450   :  { %v3116_v4 = vadd.f32 %v3115_v19, %v3093_v44 }
 0x452   :  { %v3118_v24 = vperm.slane %v3116_v4, 0 }
 0x454   :  { %v3119_v8 = vadd.f32 %v3118_v24, %v2946_v18  ;;  %v3120_v10 = vadd.f32 %v3118_v24, %v2949_v56 }
 0x456   :  { %vm3121_vm4 = vcmp.gt.f32.partialorder %v3119_v8, 0.0  ;;  %vm3122_vm5 = vcmp.gt.f32.partialorder %v3120_v10, 0.0  ;;  %v3123_v29 = vmul.f32 0.2, %v3119_v8  ;;  %v3124_v27 = vmul.f32 0.2, %v3120_v10 }
 0x458   :  { %v3125_v17 = vsel %vm3121_vm4, %v3119_v8, %v3123_v29  ;;  %v3126_v23 = vsel %vm3122_vm5, %v3120_v10, %v3124_v27 }
 0x459   :  { %v6712_v40 = vmul.f32 -1.442695, %v3125_v17  ;;  %v6713_v9 = vmul.f32 -1.442695, %v3126_v23 }
 0x45b   :  { %6781 = vpow2.f32 %v6712_v40 }
 0x45c   :  { %6783 = vpow2.f32 %v6713_v9 }
 0x461   :  { %v6782_v14 = vpop.eup %6781 }
 0x462   :  { %v6784_v62 = vpop.eup %6783  ;;  %v3133_v57 = vadd.f32 1.0, %v6782_v14 }
 0x463   :  { %v3134_v0 = vadd.f32 1.0, %v6784_v62 }
 0x464   :  { %6785 = vrcp.f32 %v3133_v57  ;;  %v3146_v19 = vand.u32 2147483648, %v3133_v57  ;;  %v3144_v56 = vand.u32 2147483647, %v3133_v57  ;;  %vm3140_vm9 = vweird.f32 %v3133_v57 }
 0x465   :  { %6787 = vrcp.f32 %v3134_v0  ;;  %v3161_v8 = vand.u32 2147483648, %v3134_v0  ;;  %v3159_v40 = vand.u32 2147483647, %v3134_v0  ;;  %vm3155_vm11 = vweird.f32 %v3134_v0 }
 0x466   :  { %v3147_v27 = vor.u32 1.1754944e-38, %v3146_v19  ;;  %vm3145_vm12 = vcmp.eq.f32.partialorder %v3144_v56, 8.507059e+37 }
 0x467   :  { %v3162_v23 = vor.u32 1.1754944e-38, %v3161_v8  ;;  %vm3160_vm14 = vcmp.eq.f32.partialorder %v3159_v40, 8.507059e+37 }
 0x46a   :  { %v6786_v47 = vpop.eup %6785 }
 0x46b   :  { %v6788_v21 = vpop.eup %6787  ;;  %v3136_v18 = vmul.f32 %v6786_v47, %v3133_v57  ;;  %vm3141_vm7 = vweird.f32 %v6786_v47 }
 0x46c   :  { %v3151_v54 = vmul.f32 %v6788_v21, %v3134_v0  ;;  %vm3156_vm8 = vweird.f32 %v6788_v21  ;;  %vm3142_vm10 = vmor %vm3140_vm9, %vm3141_vm7 }
 0x46d   :  { %v3137_v44 = vsub.f32 1.0, %v3136_v18  ;;  %vm3157_vm13 = vmor %vm3155_vm11, %vm3156_vm8 }
 0x46e   :  { %v3152_v4 = vsub.f32 1.0, %v3151_v54 }
 0x46f   :  { %v3138_v24 = vmul.f32 %v6786_v47, %v3137_v44 }
 0x470   :  { %v3153_v10 = vmul.f32 %v6788_v21, %v3152_v4 }
 0x471   :  { %v3139_v29 = vadd.f32 %v6786_v47, %v3138_v24 }
 0x472   :  { %v3154_v17 = vadd.f32 %v6788_v21, %v3153_v10 }
 0x473   :  { %v3143_v9 = vsel %vm3142_vm10, %v6786_v47, %v3139_v29 }
 0x474   :  { %v3158_v14 = vsel %vm3157_vm13, %v6788_v21, %v3154_v17  ;;  %v3148_v62 = vsel %vm3145_vm12, %v3147_v27, %v3143_v9 }
 0x475   :  { %v3163_v18 = vsel %vm3160_vm14, %v3162_v23, %v3158_v14  ;;  %v3165_v54 = vmul.f32 1.442695, %v3148_v62 }
 0x476   :  { %v3167_v44 = vmul.f32 1.442695, %v3163_v18  ;;  %v6714_v18 = vld [vmem:[%s9430_s0 + $0x10] sm:$0xff] }
 0x477   :  { %6789 = vpow2.f32 %v3165_v54 }
 0x478   :  { %6791 = vpow2.f32 %v3167_v44 }
 0x47d   :  { %v6790_v4 = vpop.eup %6789 }
 0x47e   :  { %v6792_v63 = vpop.eup %6791  ;;  %v3169_v57 = vsel %vm1669_vm6, %v6790_v4, 0.0 }
 0x47f   :  { %v3170_v19 = vsel %vm1669_vm6, %v6792_v63, 0.0 }
 0x480   :  { %v3171_v24 = vadd.f32 %v3170_v19, %v3169_v57 }
 0x482   :  { %v3172_v0 = vrot.slane %v3171_v24, 4 }
 0x484   :  { %v3173_v56 = vadd.f32 %v3172_v0, %v3171_v24  ;;  %v3399_v24 = vsel %vm101_vm0, %v6714_v18, 0 }
 0x486   :  { %v3174_v10 = vrot.slane %v3173_v56, 2 }
 0x488   :  { %v3175_v8 = vadd.f32 %v3174_v10, %v3173_v56 }
 0x48a   :  { %v3176_v47 = vrot.slane %v3175_v8, 1 }
 0x48c   :  { %v3177_v21 = vadd.f32 %v3176_v47, %v3175_v8  ;;  %v8741_v47 = vand.u32 4294901760, %v3399_v24 }
 0x48e   :  { %6793 = vrcp.f32 %v3177_v21  ;;  %v3189_v17 = vand.u32 2147483648, %v3177_v21  ;;  %v3187_v9 = vand.u32 2147483647, %v3177_v21  ;;  %vm3183_vm1 = vweird.f32 %v3177_v21 }
 0x490   :  { %v3190_v62 = vor.u32 1.1754944e-38, %v3189_v17  ;;  %vm3188_vm3 = vcmp.eq.f32.partialorder %v3187_v9, 8.507059e+37  ;;  %v10081_v17 = vld [vmem:[#allocation13_spill] sm:$0xff]  ;;  %v10082_v9 = vld [vmem:[#allocation14_spill] sm:$0xff] }
 0x494   :  { %v6794_v40 = vpop.eup %6793 }
 0x495   :  { %v3179_v29 = vmul.f32 %v6794_v40, %v3177_v21  ;;  %vm3184_vm15 = vweird.f32 %v6794_v40 }
 0x496   :  { %vm3185_vm2 = vmor %vm3183_vm1, %vm3184_vm15 }
 0x497   :  { %v3180_v27 = vsub.f32 1.0, %v3179_v29  ;;  %v8749_v29 = vsub.f32 %v3399_v24, %v8741_v47 }
 0x499   :  { %v3181_v23 = vmul.f32 %v6794_v40, %v3180_v27  ;;  %v8757_v18 = vand.u32 4294901760, %v8749_v29 }
 0x49b   :  { %v3182_v14 = vadd.f32 %v6794_v40, %v3181_v23  ;;  %v3427_v24 = vsub.f32 %v8749_v29, %v8757_v18 }
 0x49d   :  { %v3186_v54 = vsel %vm3185_vm2, %v6794_v40, %v3182_v14  ;;  %v6715_v40 = vld [vmem:[%s9430_s0 + $0x18] sm:$0xff] }
 0x49e   :  { %v3191_v44 = vsel %vm3188_vm3, %v3190_v62, %v3186_v54  ;;  %v3402_v27 = vsel %vm101_vm0, %v6715_v40, 0 }
 0x49f   :  { %v3193_v57 = vmul.f32 %v6790_v4, %v3191_v44  ;;  %v3194_v19 = vmul.f32 %v6792_v63, %v3191_v44  ;;  %v8759_v54 = vand.u32 4294901760, %v3402_v27  ;;  %v10083_v44 = vld [vmem:[#allocation15_spill] sm:$0xff] }
 0x4a1   :  { %v3196_v0 = vsel %vm1669_vm6, %v3193_v57, 0  ;;  %v3199_v56 = vsel %vm1669_vm6, %v3194_v19, 0  ;;  %v10084_v57 = vld [vmem:[#allocation9_spill] sm:$0xff] }
 0x4a2   :  { %v3219_v10 = vand.u32 4294901760, %v3196_v0  ;;  %v8739_v8 = vand.u32 4294901760, %v3199_v56 }
 0x4a4   :  { %3263 = vmatmul.f32.vlgmr.msrb.gmra.mxu3 %v3219_v10  ;;  %v3220_v21 = vsub.f32 %v3196_v0, %v3219_v10  ;;  %v3228_v4 = vsub.f32 %v3199_v56, %v8739_v8  ;;  %v8770_v0 = vsub.f32 %v3402_v27, %v8759_v54  ;;  %v10086_v56 = vld [vmem:[#allocation16_spill] sm:$0xff]  ;;  %v10089_v27 = vld [vmem:[#allocation33_spill] sm:$0xff] }
 0x4a5   :  { %3534 = vmatpush.msrb.mxu3 %v10073_v26 }
 0x4a6   :  { %3293 = vmatmul.f32.vlgmr.msrb.gmra.mxu0 %v3220_v21  ;;  %v3221_v63 = vand.u32 4294901760, %v3220_v21  ;;  %v3229_v62 = vand.u32 4294901760, %v3228_v4 }
 0x4a7   :  { %3536 = vmatpush.msrb.mxu3 %v10074_v16  ;;  %3569 = vmatpush.msrb.mxu0 %v10081_v17 }
 0x4a8   :  { %3323 = vmatmul.f32.vlgmr.msrb.gmra.mxu1 %v3221_v63  ;;  %v3222_v23 = vsub.f32 %v3220_v21, %v3221_v63  ;;  %v3230_v19 = vsub.f32 %v3228_v4, %v3229_v62  ;;  %v10087_v21 = vld [vmem:[#allocation11_spill] sm:$0xff]  ;;  %v8776_v63 = vand.u32 4294901760, %v3427_v24  ;;  %v10098_v24 = vld [vmem:[#allocation30_spill] sm:$0xff] }
 0x4a9   :  { %3538 = vmatpush.msrb.mxu3 %v10075_v34  ;;  %3573 = vmatpush.msrb.mxu0 %v10082_v9  ;;  %v10092_v9 = vld [vmem:[#allocation35_spill] sm:$0xff] }
 0x4aa   :  { %v3223_v14 = vand.u32 4294901760, %v3222_v23  ;;  %3604 = vmatpush.msrb.mxu1 %v10073_v26  ;;  %v10085_v26 = vld [vmem:[#allocation10_spill] sm:$0xff]  ;;  %v3231_v40 = vand.u32 4294901760, %v3230_v19  ;;  %v10091_v23 = vld [vmem:[#allocation23_spill] sm:$0xff] }
 0x4ab   :  { %3540 = vmatpush.msrb.mxu3 %v10076_v2  ;;  %3577 = vmatpush.msrb.mxu0 %v10083_v44  ;;  %v10095_v44 = vld [vmem:[#allocation36_spill] sm:$0xff]  ;;  %v10097_v19 = vld [vmem:[#allocation18_spill] sm:$0xff] }
 0x4ac   :  { %3224 = vmatmul.f32.vlgmr.msrb.gmra.mxu2 %v3223_v14  ;;  %3267 = vmatmul.f32.gmra.mxu3 %v8739_v8  ;;  %v10093_v14 = vld [vmem:[#allocation26_spill] sm:$0xff] }
 0x4ad   :  { %3500 = vmatpush.msrb.mxu2 %v10084_v57  ;;  %3606 = vmatpush.msrb.mxu1 %v10074_v16  ;;  %v8779_v16 = vand.u32 4294901760, %v8770_v0  ;;  %v10096_v57 = vld [vmem:[#allocation28_spill] sm:$0xff] }
 0x4ae   :  { %3298 = vmatmul.f32.gmra.mxu0 %v3228_v4  ;;  %v10088_v4 = vld [vmem:[#allocation12_spill] sm:$0xff] }
 0x4af   :  { %3503 = vmatpush.msrb.mxu2 %v10085_v26  ;;  %3581 = vmatpush.msrb.mxu0 %v10086_v56  ;;  %v3435_v17 = vsub.f32 %v8770_v0, %v8779_v16  ;;  %v10099_v26 = vld [vmem:[#allocation22_spill] sm:$0xff]  ;;  %v10100_v56 = vld [vmem:[#allocation25_spill] sm:$0xff] }
 0x4b0   :  { %3329 = vmatmul.f32.gmra.mxu1 %v3229_v62  ;;  %v10094_v62 = vld [vmem:[#allocation17_spill] sm:$0xff] }
 0x4b1   :  { %3506 = vmatpush.msrb.mxu2 %v10087_v21  ;;  %3608 = vmatpush.msrb.mxu1 %v10075_v34  ;;  %v10090_v34 = vld [vmem:[#allocation34_spill] sm:$0xff]  ;;  %v10102_v21 = vld [vmem:[#allocation56_spill] sm:$0xff] }
 0x4b3   :  { %3509 = vmatpush.msrb.mxu2 %v10088_v4  ;;  %3610 = vmatpush.msrb.mxu1 %v10076_v2  ;;  %v8792_v2 = vand.u32 4294901760, %v3435_v17  ;;  %v10105_v4 = vld [vmem:[#allocation27_spill] sm:$0xff]  ;;  %v10107_v17 = vld [vmem:[#allocation29_spill] sm:$0xff] }
 0x4b4   :  { %3232 = vmatmul.f32.gmra.mxu2 %v3231_v40  ;;  %3383 = vmatmul.f32.vlgmr.msra.gmra.mxu3 %v3219_v10  ;;  %v10103_v40 = vld [vmem:[#allocation38_spill] sm:$0xff] }
 0x4b5   :  { %3674 = vmatpush.msra.mxu3 %v10089_v27  ;;  %v10106_v27 = vld [vmem:[#allocation63_spill] sm:$0xff] }
 0x4b6   :  { %3429 = vmatmul.f32.vlgmr.msra.gmra.mxu0 %v8776_v63 }
 0x4b7   :  { %3680 = vmatpush.msra.mxu3 %v10090_v34  ;;  %3716 = vmatpush.msra.mxu0 %v10091_v23  ;;  %v10108_v34 = vld [vmem:[#allocation68_spill] sm:$0xff]  ;;  %v10109_v23 = vld [vmem:[#allocation39_spill] sm:$0xff] }
 0x4b8   :  { %3478 = vmatmul.f32.vlgmr.msra.gmra.mxu1 %v8741_v47 }
 0x4b9   :  { %3686 = vmatpush.msra.mxu3 %v10092_v9  ;;  %3719 = vmatpush.msra.mxu0 %v10093_v14  ;;  %v10110_v9 = vld [vmem:[#allocation31_spill] sm:$0xff] }
 0x4ba   :  { %3750 = vmatpush.msra.mxu1 %v10094_v62  ;;  %v10111_v14 = vld [vmem:[#allocation71_spill] sm:$0xff] }
 0x4bb   :  { %3692 = vmatpush.msra.mxu3 %v10095_v44  ;;  %3722 = vmatpush.msra.mxu0 %v10096_v57  ;;  %v10113_v44 = vld [vmem:[#allocation32_spill] sm:$0xff]  ;;  %v10114_v57 = vld [vmem:[#allocation75_spill] sm:$0xff] }
 0x4bc   :  { %3356 = vmatmul.f32.vlgmr.msra.gmra.mxu2 %v3219_v10  ;;  %3387 = vmatmul.f32.gmra.mxu3 %v8739_v8  ;;  %v10101_v10 = vld [vmem:[#allocation37_spill] sm:$0xff] }
 0x4bd   :  { %3633 = vmatpush.msra.mxu2 %v10094_v62  ;;  %3752 = vmatpush.msra.mxu1 %v10097_v19 }
 0x4be   :  { %3437 = vmatmul.f32.gmra.mxu0 %v8792_v2 }
 0x4bf   :  { %3635 = vmatpush.msra.mxu2 %v10097_v19  ;;  %3725 = vmatpush.msra.mxu0 %v10098_v24  ;;  %v10116_v24 = vld [vmem:[#allocation83_spill] sm:$0xff] }
 0x4c0   :  { %3482 = vmatmul.f32.gmra.mxu1 %v8759_v54 }
 0x4c1   :  { %3637 = vmatpush.msra.mxu2 %v10099_v26  ;;  %3754 = vmatpush.msra.mxu1 %v10099_v26 }
 0x4c3   :  { %3639 = vmatpush.msra.mxu2 %v10100_v56  ;;  %3756 = vmatpush.msra.mxu1 %v10100_v56 }
 0x4c4   :  { %3360 = vmatmul.f32.gmra.mxu2 %v8739_v8  ;;  %3544 = vmatmul.f32.vlgmr.msrb.gmra.mxu3 %v8757_v18  ;;  %v10104_v8 = vld [vmem:[#allocation58_spill] sm:$0xff] }
 0x4c5   :  { %3820 = vmatpush.msrb.mxu3 %v10094_v62  ;;  %v10112_v62 = vld [vmem:[#allocation40_spill] sm:$0xff] }
 0x4c6   :  { %3583 = vmatmul.f32.vlgmr.msrb.gmra.mxu0 %v8741_v47 }
 0x4c7   :  { %3822 = vmatpush.msrb.mxu3 %v10097_v19  ;;  %3837 = vmatpush.msrb.mxu0 %v10101_v10  ;;  %v10115_v19 = vld [vmem:[#allocation79_spill] sm:$0xff] }
 0x4c8   :  { %3612 = vmatmul.f32.vlgmr.msrb.gmra.mxu1 %v8741_v47 }
 0x4c9   :  { %3824 = vmatpush.msrb.mxu3 %v10099_v26  ;;  %3890 = vmatpush.msrb.mxu1 %v10102_v21  ;;  %v10117_v26 = vld [vmem:[#allocation41_spill] sm:$0xff] }
 0x4ca   :  { %3839 = vmatpush.msrb.mxu0 %v10103_v40  ;;  %v10119_v21 = vld [vmem:[#allocation45_spill] sm:$0xff] }
 0x4cb   :  { %3826 = vmatpush.msrb.mxu3 %v10100_v56  ;;  %3896 = vmatpush.msrb.mxu1 %v10104_v8  ;;  %v10118_v56 = vld [vmem:[#allocation87_spill] sm:$0xff]  ;;  %v10120_v8 = vld [vmem:[#allocation90_spill] sm:$0xff] }
 0x4cc   :  { %3512 = vmatmul.f32.vlgmr.msrb.gmra.mxu2 %v8749_v29  ;;  %3550 = vmatmul.f32.gmra.mxu3 %v8779_v16 }
 0x4cd   :  { %3785 = vmatpush.msrb.mxu2 %v10105_v4  ;;  %3902 = vmatpush.msrb.mxu1 %v10106_v27  ;;  %v10123_v4 = vld [vmem:[#allocation43_spill] sm:$0xff] }
 0x4ce   :  { %3587 = vmatmul.f32.gmra.mxu0 %v8759_v54  ;;  %v10124_v27 = vld [vmem:[#allocation47_spill] sm:$0xff] }
 0x4cf   :  { %3789 = vmatpush.msrb.mxu2 %v10107_v17  ;;  %3908 = vmatpush.msrb.mxu1 %v10108_v34  ;;  %v10125_v17 = vld [vmem:[#allocation44_spill] sm:$0xff]  ;;  %v10127_v34 = vld [vmem:[#allocation97_spill] sm:$0xff] }
 0x4d0   :  { %3616 = vmatmul.f32.gmra.mxu1 %v8759_v54  ;;  %3841 = vmatpush.msrb.mxu0 %v10109_v23 }
 0x4d1   :  { %3793 = vmatpush.msrb.mxu2 %v10110_v9  ;;  %3914 = vmatpush.msrb.mxu1 %v10111_v14  ;;  %v10128_v9 = vld [vmem:[#allocation46_spill] sm:$0xff]  ;;  %v10131_v14 = vld [vmem:[#allocation100_spill] sm:$0xff] }
 0x4d2   :  { %3843 = vmatpush.msrb.mxu0 %v10112_v62 }
 0x4d3   :  { %3797 = vmatpush.msrb.mxu2 %v10113_v44  ;;  %3920 = vmatpush.msrb.mxu1 %v10114_v57  ;;  %v10132_v44 = vld [vmem:[#allocation54_spill] sm:$0xff] }
 0x4d4   :  { %3517 = vmatmul.f32.gmra.mxu2 %v8770_v0  ;;  %3694 = vmatmul.f32.vlgmr.msra.gmra.mxu3 %v8741_v47  ;;  %v10133_v57 = vld [vmem:[#allocation62_spill] sm:$0xff] }
 0x4d5   :  { %4050 = vmatpush.msra.mxu3 %v10101_v10  ;;  %3926 = vmatpush.msrb.mxu1 %v10115_v19  ;;  %v10134_v19 = vld [vmem:[#allocation102_spill] sm:$0xff] }
 0x4d6   :  { %3728 = vmatmul.f32.vlgmr.msra.gmra.mxu0 %v8749_v29  ;;  %v10121_v29 = vld [vmem:[#allocation42_spill] sm:$0xff] }
 0x4d7   :  { %4052 = vmatpush.msra.mxu3 %v10103_v40  ;;  %3932 = vmatpush.msrb.mxu1 %v10116_v24  ;;  %v10135_v24 = vld [vmem:[#allocation55_spill] sm:$0xff] }
 0x4d8   :  { %3760 = vmatmul.f32.vlgmr.msra.gmra.mxu1 %v8757_v18  ;;  %3845 = vmatpush.msrb.mxu0 %v10117_v26  ;;  %v10122_v18 = vld [vmem:[#allocation94_spill] sm:$0xff] }
 0x4d9   :  { %4054 = vmatpush.msra.mxu3 %v10109_v23  ;;  %3938 = vmatpush.msrb.mxu1 %v10118_v56  ;;  %v10137_v56 = vld [vmem:[#allocation104_spill] sm:$0xff] }
 0x4da   :  { %3847 = vmatpush.msrb.mxu0 %v10119_v21 }
 0x4db   :  { %4056 = vmatpush.msra.mxu3 %v10112_v62  ;;  %3944 = vmatpush.msrb.mxu1 %v10120_v8  ;;  %v10138_v8 = vld [vmem:[#allocation59_spill] sm:$0xff] }
 0x4dc   :  { %3645 = vmatmul.f32.vlgmr.msra.gmra.mxu2 %v8776_v63  ;;  %3698 = vmatmul.f32.gmra.mxu3 %v8759_v54  ;;  %v10126_v63 = vld [vmem:[#allocation52_spill] sm:$0xff] }
 0x4dd   :  { %3992 = vmatpush.msra.mxu2 %v10121_v29  ;;  %4058 = vmatpush.msra.mxu3 %v10117_v26  ;;  %v10139_v29 = vld [vmem:[#allocation70_spill] sm:$0xff] }
 0x4de   :  { %3733 = vmatmul.f32.gmra.mxu0 %v8770_v0  ;;  %3950 = vmatpush.msrb.mxu1 %v10122_v18  ;;  %v10129_v0 = vld [vmem:[#allocation51_spill] sm:$0xff]  ;;  %v10140_v18 = vld [vmem:[#allocation65_spill] sm:$0xff] }
 0x4df   :  { %3995 = vmatpush.msra.mxu2 %v10123_v4  ;;  %4060 = vmatpush.msra.mxu3 %v10119_v21  ;;  %v10141_v4 = vld [vmem:[#allocation74_spill] sm:$0xff] }
 0x4e0   :  { %3766 = vmatmul.f32.gmra.mxu1 %v8779_v16  ;;  %3849 = vmatpush.msrb.mxu0 %v10124_v27  ;;  %v10130_v16 = vld [vmem:[#allocation61_spill] sm:$0xff] }
 0x4e1   :  { %3998 = vmatpush.msra.mxu2 %v10125_v17  ;;  %4062 = vmatpush.msra.mxu3 %v10124_v27  ;;  %v10142_v17 = vld [vmem:[#allocation106_spill] sm:$0xff] }
 0x4e2   :  { %3851 = vmatpush.msrb.mxu0 %v10126_v63  ;;  %3956 = vmatpush.msrb.mxu1 %v10127_v34  ;;  %v10143_v34 = vld [vmem:[#allocation69_spill] sm:$0xff] }
 0x4e3   :  { %4001 = vmatpush.msra.mxu2 %v10128_v9  ;;  %4064 = vmatpush.msra.mxu3 %v10126_v63  ;;  %v10144_v9 = vld [vmem:[#allocation78_spill] sm:$0xff] }
 0x4e4   :  { %3653 = vmatmul.f32.gmra.mxu2 %v8792_v2  ;;  %3828 = vmatmul.f32.vlgmr.msrb.gmra.mxu3 %v8741_v47  ;;  %v10136_v2 = vld [vmem:[#allocation66_spill] sm:$0xff] }
 0x4e5   :  { %4004 = vmatpush.msra.mxu2 %v10129_v0  ;;  %4066 = vmatpush.msra.mxu3 %v10130_v16  ;;  %v10145_v0 = vld [vmem:[#allocation73_spill] sm:$0xff] }
 0x4e6   :  { %3853 = vmatpush.msrb.mxu0 %v10130_v16  ;;  %3962 = vmatpush.msrb.mxu1 %v10131_v14  ;;  %v10147_v14 = vld [vmem:[#allocation77_spill] sm:$0xff] }
 0x4e7   :  { %4007 = vmatpush.msra.mxu2 %v10132_v44  ;;  %4068 = vmatpush.msra.mxu3 %v10133_v57  ;;  %v10148_v44 = vld [vmem:[#allocation86_spill] sm:$0xff] }
 0x4e8   :  { %3855 = vmatpush.msrb.mxu0 %v10133_v57  ;;  %3968 = vmatpush.msrb.mxu1 %v10134_v19  ;;  %v10149_v19 = vld [vmem:[#allocation81_spill] sm:$0xff] }
 0x4e9   :  { %4010 = vmatpush.msra.mxu2 %v10135_v24  ;;  %4070 = vmatpush.msra.mxu3 %v10136_v2  ;;  %v10151_v24 = vld [vmem:[#allocation85_spill] sm:$0xff] }
 0x4ea   :  { %3857 = vmatpush.msrb.mxu0 %v10136_v2  ;;  %3974 = vmatpush.msrb.mxu1 %v10137_v56  ;;  %v10153_v56 = vld [vmem:[#allocation89_spill] sm:$0xff] }
 0x4eb   :  { %4013 = vmatpush.msra.mxu2 %v10138_v8  ;;  %4072 = vmatpush.msra.mxu3 %v10139_v29  ;;  %v10156_v8 = vld [vmem:[#allocation92_spill] sm:$0xff] }
 0x4ec   :  { %3799 = vmatmul.f32.vlgmr.msrb.gmra.mxu2 %v8741_v47  ;;  %3832 = vmatmul.f32.gmra.mxu3 %v8759_v54  ;;  %v10146_v47 = vld [vmem:[#allocation82_spill] sm:$0xff] }
 0x4ed   :  { %4016 = vmatpush.msra.mxu2 %v10140_v18  ;;  %4074 = vmatpush.msra.mxu3 %v10141_v4  ;;  %v10157_v18 = vld [vmem:[#allocation49_spill] sm:$0xff] }
 0x4ee   :  { %3859 = vmatpush.msrb.mxu0 %v10139_v29  ;;  %3980 = vmatpush.msrb.mxu1 %v10142_v17  ;;  %v10159_v17 = vld [vmem:[#allocation122_spill] sm:$0xff] }
 0x4ef   :  { %4019 = vmatpush.msra.mxu2 %v10143_v34  ;;  %4076 = vmatpush.msra.mxu3 %v10144_v9  ;;  %v10160_v34 = vld [vmem:[#allocation50_spill] sm:$0xff] }
 0x4f0   :  { %4168 = vmatpush.msra.mxu1 %v10101_v10  ;;  %3861 = vmatpush.msrb.mxu0 %v10141_v4  ;;  %v10150_v10 = vld [vmem:[#allocation107_spill] sm:$0xff] }
 0x4f1   :  { %4022 = vmatpush.msra.mxu2 %v10145_v0  ;;  %4078 = vmatpush.msra.mxu3 %v10146_v47  ;;  %v10162_v0 = vld [vmem:[#allocation126_spill] sm:$0xff] }
 0x4f2   :  { %4170 = vmatpush.msra.mxu1 %v10103_v40  ;;  %3863 = vmatpush.msrb.mxu0 %v10144_v9  ;;  %v10152_v40 = vld [vmem:[#allocation108_spill] sm:$0xff] }
 0x4f3   :  { %4025 = vmatpush.msra.mxu2 %v10147_v14  ;;  %4080 = vmatpush.msra.mxu3 %v10148_v44  ;;  %v10163_v14 = vld [vmem:[#allocation53_spill] sm:$0xff] }
 0x4f4   :  { %3803 = vmatmul.f32.gmra.mxu2 %v8759_v54  ;;  %4172 = vmatpush.msra.mxu1 %v10109_v23  ;;  %v10154_v54 = vld [vmem:[#allocation48_spill] sm:$0xff]  ;;  %v10155_v23 = vld [vmem:[#allocation118_spill] sm:$0xff] }
 0x4f5   :  { %4028 = vmatpush.msra.mxu2 %v10149_v19  ;;  %4262 = vmatpush.msrb.mxu3 %v10150_v10  ;;  %v10165_v19 = vld [vmem:[#allocation130_spill] sm:$0xff]  ;;  %v10166_v10 = vld [vmem:[#allocation57_spill] sm:$0xff] }
 0x4f6   :  { %3865 = vmatpush.msrb.mxu0 %v10146_v47  ;;  %4174 = vmatpush.msra.mxu1 %v10112_v62  ;;  %v10158_v62 = vld [vmem:[#allocation93_spill] sm:$0xff] }
 0x4f7   :  { %4031 = vmatpush.msra.mxu2 %v10151_v24  ;;  %4268 = vmatpush.msrb.mxu3 %v10152_v40  ;;  %v10167_v24 = vld [vmem:[#allocation111_spill] sm:$0xff]  ;;  %v10168_v40 = vld [vmem:[#allocation137_spill] sm:$0xff] }
 0x4f8   :  { %3867 = vmatpush.msrb.mxu0 %v10148_v44  ;;  %4176 = vmatpush.msra.mxu1 %v10117_v26  ;;  %v10161_v26 = vld [vmem:[#allocation96_spill] sm:$0xff] }
 0x4f9   :  { %4034 = vmatpush.msra.mxu2 %v10153_v56  ;;  %4274 = vmatpush.msrb.mxu3 %v10155_v23  ;;  %v10170_v56 = vld [vmem:[#allocation114_spill] sm:$0xff]  ;;  %v10173_v23 = vld [vmem:[#allocation117_spill] sm:$0xff] }
 0x4fa   :  { %4097 = vmatpush.msra.mxu0 %v10154_v54  ;;  %4178 = vmatpush.msra.mxu1 %v10119_v21  ;;  %v10164_v21 = vld [vmem:[#allocation109_spill] sm:$0xff]  ;;  %v10171_v54 = vld [vmem:[#allocation138_spill] sm:$0xff] }
 0x4fb   :  { %4037 = vmatpush.msra.mxu2 %v10156_v8  ;;  %4280 = vmatpush.msrb.mxu3 %v10159_v17  ;;  %v10174_v8 = vld [vmem:[#allocation142_spill] sm:$0xff] }
 0x4fc   :  { %4101 = vmatpush.msra.mxu0 %v10157_v18  ;;  %4180 = vmatpush.msra.mxu1 %v10124_v27  ;;  %v10169_v27 = vld [vmem:[#allocation60_spill] sm:$0xff]  ;;  %v10176_v18 = vld [vmem:[#allocation121_spill] sm:$0xff]  ;;  %v10177_v17 = vld [vmem:[#allocation146_spill] sm:$0xff] }
 0x4fd   :  { %4209 = vmatpush.msrb.mxu2 %v10158_v62  ;;  %4286 = vmatpush.msrb.mxu3 %v10162_v0  ;;  %v10180_v0 = vld [vmem:[#allocation150_spill] sm:$0xff] }
 0x4fe   :  { %4105 = vmatpush.msra.mxu0 %v10160_v34  ;;  %4182 = vmatpush.msra.mxu1 %v10126_v63  ;;  %v10172_v63 = vld [vmem:[#allocation64_spill] sm:$0xff] }
 0x4ff   :  { %4211 = vmatpush.msrb.mxu2 %v10161_v26  ;;  %4292 = vmatpush.msrb.mxu3 %v10165_v19  ;;  %v10179_v34 = vld [vmem:[#allocation124_spill] sm:$0xff]  ;;  %v10183_v19 = vld [vmem:[#allocation157_spill] sm:$0xff] }
 0x500   :  { %4109 = vmatpush.msra.mxu0 %v10163_v14  ;;  %4184 = vmatpush.msra.mxu1 %v10130_v16  ;;  %v10175_v16 = vld [vmem:[#allocation67_spill] sm:$0xff]  ;;  %v10182_v14 = vld [vmem:[#allocation128_spill] sm:$0xff] }
 0x501   :  { %4213 = vmatpush.msrb.mxu2 %v10164_v21  ;;  %4298 = vmatpush.msrb.mxu3 %v10168_v40  ;;  %v10186_v40 = vld [vmem:[#allocation158_spill] sm:$0xff] }
 0x502   :  { %4113 = vmatpush.msra.mxu0 %v10166_v10  ;;  %4186 = vmatpush.msra.mxu1 %v10133_v57  ;;  %v10178_v57 = vld [vmem:[#allocation72_spill] sm:$0xff]  ;;  %v10185_v10 = vld [vmem:[#allocation133_spill] sm:$0xff] }
 0x503   :  { %4215 = vmatpush.msrb.mxu2 %v10167_v24  ;;  %4304 = vmatpush.msrb.mxu3 %v10171_v54  ;;  %v10189_v54 = vld [vmem:[#allocation161_spill] sm:$0xff] }
 0x504   :  { %4117 = vmatpush.msra.mxu0 %v10169_v27  ;;  %4188 = vmatpush.msra.mxu1 %v10136_v2  ;;  %v10181_v2 = vld [vmem:[#allocation76_spill] sm:$0xff] }
 0x505   :  { %4217 = vmatpush.msrb.mxu2 %v10170_v56  ;;  %4310 = vmatpush.msrb.mxu3 %v10174_v8  ;;  %v10188_v27 = vld [vmem:[#allocation136_spill] sm:$0xff]  ;;  %v10192_v8 = vld [vmem:[#allocation163_spill] sm:$0xff] }
 0x506   :  { %4121 = vmatpush.msra.mxu0 %v10172_v63  ;;  %4190 = vmatpush.msra.mxu1 %v10139_v29  ;;  %v10184_v29 = vld [vmem:[#allocation80_spill] sm:$0xff]  ;;  %v10191_v63 = vld [vmem:[#allocation141_spill] sm:$0xff] }
 0x507   :  { %4219 = vmatpush.msrb.mxu2 %v10173_v23  ;;  %4316 = vmatpush.msrb.mxu3 %v10177_v17  ;;  %v10195_v17 = vld [vmem:[#allocation164_spill] sm:$0xff] }
 0x508   :  { %4125 = vmatpush.msra.mxu0 %v10175_v16  ;;  %4192 = vmatpush.msra.mxu1 %v10141_v4  ;;  %v10187_v4 = vld [vmem:[#allocation84_spill] sm:$0xff]  ;;  %v10193_v16 = vld [vmem:[#allocation91_spill] sm:$0xff] }
 0x509   :  { %4221 = vmatpush.msrb.mxu2 %v10176_v18  ;;  %4322 = vmatpush.msrb.mxu3 %v10180_v0  ;;  %v10197_v0 = vld [vmem:[#allocation148_spill] sm:$0xff] }
 0x50a   :  { %4129 = vmatpush.msra.mxu0 %v10178_v57  ;;  %4194 = vmatpush.msra.mxu1 %v10144_v9  ;;  %v10190_v9 = vld [vmem:[#allocation88_spill] sm:$0xff]  ;;  %v10196_v57 = vld [vmem:[#allocation95_spill] sm:$0xff] }
 0x50b   :  { %4223 = vmatpush.msrb.mxu2 %v10179_v34  ;;  %4328 = vmatpush.msrb.mxu3 %v10183_v19  ;;  %v10200_v19 = vld [vmem:[#allocation156_spill] sm:$0xff] }
 0x50c   :  { %4133 = vmatpush.msra.mxu0 %v10181_v2  ;;  %4196 = vmatpush.msra.mxu1 %v10146_v47  ;;  %v10194_v47 = vld [vmem:[#allocation144_spill] sm:$0xff]  ;;  %v10199_v2 = vld [vmem:[#allocation153_spill] sm:$0xff] }
 0x50d   :  { %4225 = vmatpush.msrb.mxu2 %v10182_v14  ;;  %4334 = vmatpush.msrb.mxu3 %v10186_v40 }
 0x50e   :  { %4137 = vmatpush.msra.mxu0 %v10184_v29  ;;  %4198 = vmatpush.msra.mxu1 %v10148_v44  ;;  %v10198_v44 = vld [vmem:[#allocation98_spill] sm:$0xff] }
 0x50f   :  { %4227 = vmatpush.msrb.mxu2 %v10185_v10  ;;  %4340 = vmatpush.msrb.mxu3 %v10189_v54 }
 0x510   :  { %4141 = vmatpush.msra.mxu0 %v10187_v4 }
 0x511   :  { %4229 = vmatpush.msrb.mxu2 %v10188_v27  ;;  %4346 = vmatpush.msrb.mxu3 %v10192_v8 }
 0x512   :  { %4145 = vmatpush.msra.mxu0 %v10190_v9 }
 0x513   :  { %4231 = vmatpush.msrb.mxu2 %v10191_v63  ;;  %4352 = vmatpush.msrb.mxu3 %v10195_v17 }
 0x514   :  { %4149 = vmatpush.msra.mxu0 %v10193_v16 }
 0x515   :  { %4233 = vmatpush.msrb.mxu2 %v10194_v47 }
 0x516   :  { %4153 = vmatpush.msra.mxu0 %v10196_v57 }
 0x517   :  { %4235 = vmatpush.msrb.mxu2 %v10197_v0 }
 0x518   :  { %4157 = vmatpush.msra.mxu0 %v10198_v44 }
 0x519   :  { %4237 = vmatpush.msrb.mxu2 %v10199_v2 }
 0x51b   :  { %4239 = vmatpush.msrb.mxu2 %v10200_v19 }
 0x523   :  { %v3294_v40 = vpop.f32.mrf.mxu0 }
 0x525   :  { %v3324_v4 = vpop.f32.mrf.mxu1 }
 0x527   :  { %v3264_v29 = vpop.f32.mrf.mxu3 }
 0x52b   :  { %v3299_v8 = vpop.f32.mrf.mxu0 }
 0x52d   :  { %v3330_v16 = vpop.f32.mrf.mxu1 }
 0x52f   :  { %v3225_v54 = vpop.f32.mrf.mxu2  ;;  %v3268_v9 = vpop.f32.mrf.mxu3 }
 0x530   :  { %v3265_v36 = vadd.f32 %v3264_v29, %v3225_v54 }
 0x532   :  { %v3295_v38 = vadd.f32 %v3294_v40, %v3265_v36 }
 0x533   :  { %v3430_v57 = vpop.f32.mrf.mxu0 }
 0x534   :  { %v3325_v42 = vadd.f32 %v3324_v4, %v3295_v38 }
 0x535   :  { %v3479_v55 = vpop.f32.mrf.mxu1 }
 0x536   :  { %v3480_v40 = vadd.f32 %v3479_v55, %v3430_v57 }
 0x537   :  { %v3233_v7 = vpop.f32.mrf.mxu2  ;;  %v3384_v17 = vpop.f32.mrf.mxu3 }
 0x538   :  { %v3269_v22 = vadd.f32 %v3268_v9, %v3233_v7 }
 0x53a   :  { %v3300_v58 = vadd.f32 %v3299_v8, %v3269_v22 }
 0x53b   :  { %v3438_v33 = vpop.f32.mrf.mxu0 }
 0x53c   :  { %v3331_v46 = vadd.f32 %v3330_v16, %v3300_v58 }
 0x53d   :  { %v3483_v54 = vpop.f32.mrf.mxu1 }
 0x53e   :  { %v3484_v9 = vadd.f32 %v3483_v54, %v3438_v33 }
 0x53f   :  { %v3357_v44 = vpop.f32.mrf.mxu2  ;;  %v3388_v51 = vpop.f32.mrf.mxu3 }
 0x540   :  { %v3358_v43 = vadd.f32 %v3357_v44, %v3325_v42 }
 0x542   :  { %v3385_v35 = vadd.f32 %v3384_v17, %v3358_v43  ;;  %v10201_v17 = vld [vmem:[#allocation103_spill] sm:$0xff] }
 0x543   :  { %v3584_v4 = vpop.f32.mrf.mxu0 }
 0x544   :  { %v3391_v5 = vmax.f32 %v3385_v35, 0.0 }
 0x545   :  { %v3613_v43 = vpop.f32.mrf.mxu1 }
 0x546   :  { %3393 = vst.msk [vmem:[#allocation2] sm:$0xff] %vm101_vm0, %v3391_v5 }
 0x547   :  { %v3361_v41 = vpop.f32.mrf.mxu2  ;;  %v3545_v60 = vpop.f32.mrf.mxu3 }
 0x548   :  { %v3362_v29 = vadd.f32 %v3361_v41, %v3331_v46 }
 0x54a   :  { %v3389_v48 = vadd.f32 %v3388_v51, %v3362_v29 }
 0x54c   :  { %v3392_v36 = vmax.f32 %v3389_v48, 0.0  ;;  %v3588_v48 = vpop.f32.mrf.mxu0 }
 0x54e   :  { %3394 = vst.msk [vmem:[#allocation2 + $0x8] sm:$0xff] %vm101_vm0, %v3392_v36  ;;  %v10202_v36 = vld [vmem:[#allocation105_spill] sm:$0xff] }
 0x54f   :  { %v3513_v38 = vpop.f32.mrf.mxu2  ;;  %v3551_v42 = vpop.f32.mrf.mxu3 }
 0x550   :  { %v3514_v7 = vadd.f32 %v3513_v38, %v3480_v40 }
 0x552   :  { %v3546_v22 = vadd.f32 %v3545_v60, %v3514_v7  ;;  %v3617_v60 = vpop.f32.mrf.mxu1  ;;  %v10203_v7 = vld [vmem:[#allocation99_spill] sm:$0xff] }
 0x554   :  { %v3585_v35 = vadd.f32 %v3584_v4, %v3546_v22 }
 0x556   :  { %v3614_v5 = vadd.f32 %v3613_v43, %v3585_v35 }
 0x557   :  { %v3518_v58 = vpop.f32.mrf.mxu2  ;;  %v3695_v46 = vpop.f32.mrf.mxu3 }
 0x558   :  { %v8967_v8 = vand.u32 4294901760, %v3614_v5  ;;  %v3519_v16 = vadd.f32 %v3518_v58, %v3484_v9 }
 0x55a   :  { %v8970_v41 = vsub.f32 %v3614_v5, %v8967_v8  ;;  %v3552_v51 = vadd.f32 %v3551_v42, %v3519_v16  ;;  %3982 = vmatmul.f32.vlgmr.msrb.gmra.mxu1 %v8967_v8  ;;  %v3729_v42 = vpop.f32.mrf.mxu0  ;;  %v10207_v5 = vld [vmem:[#allocation110_spill] sm:$0xff]  ;;  %v3761_v16 = vpop.f32.mrf.mxu1 }
 0x55b   :  { %4422 = vmatpush.msrb.mxu1 %v10158_v62 }
 0x55c   :  { %v3589_v55 = vadd.f32 %v3588_v48, %v3552_v51  ;;  %4040 = vmatmul.f32.vlgmr.msra.gmra.mxu2 %v8970_v41  ;;  %v8976_v33 = vand.u32 4294901760, %v8970_v41  ;;  %v10208_v51 = vld [vmem:[#allocation119_spill] sm:$0xff]  ;;  %v10209_v48 = vld [vmem:[#allocation113_spill] sm:$0xff] }
 0x55d   :  { %4424 = vmatpush.msrb.mxu1 %v10161_v26  ;;  %4469 = vmatpush.msra.mxu2 %v10201_v17 }
 0x55e   :  { %v3618_v57 = vadd.f32 %v3617_v60, %v3589_v55  ;;  %4084 = vmatmul.f32.vlgmr.msra.gmra.mxu3 %v8976_v33  ;;  %v3871_v44 = vsub.f32 %v8970_v41, %v8976_v33  ;;  %v10211_v55 = vld [vmem:[#allocation116_spill] sm:$0xff] }
 0x55f   :  { %4426 = vmatpush.msrb.mxu1 %v10164_v21  ;;  %4540 = vmatpush.msra.mxu3 %v10158_v62  ;;  %v3646_v29 = vpop.f32.mrf.mxu2  ;;  %v10204_v62 = vld [vmem:[#allocation112_spill] sm:$0xff]  ;;  %v3699_v22 = vpop.f32.mrf.mxu3 }
 0x560   :  { %v8985_v54 = vand.u32 4294901760, %v3618_v57  ;;  %4473 = vmatpush.msra.mxu2 %v10202_v36  ;;  %v8988_v40 = vand.u32 4294901760, %v3871_v44  ;;  %v3696_v43 = vadd.f32 %v3695_v46, %v3646_v29  ;;  %v10210_v46 = vld [vmem:[#allocation123_spill] sm:$0xff]  ;;  %v10213_v29 = vld [vmem:[#allocation120_spill] sm:$0xff] }
 0x561   :  { %4428 = vmatpush.msrb.mxu1 %v10167_v24  ;;  %4542 = vmatpush.msra.mxu3 %v10161_v26  ;;  %v10205_v26 = vld [vmem:[#allocation101_spill] sm:$0xff]  ;;  %v10214_v36 = vld [vmem:[#allocation131_spill] sm:$0xff] }
 0x562   :  { %v8993_v38 = vsub.f32 %v3618_v57, %v8985_v54  ;;  %3873 = vmatmul.f32.vlgmr.msrb.gmra.mxu0 %v8988_v40  ;;  %3986 = vmatmul.f32.gmra.mxu1 %v8985_v54  ;;  %v10212_v57 = vld [vmem:[#allocation129_spill] sm:$0xff]  ;;  %v3734_v44 = vpop.f32.mrf.mxu0 }
 0x563   :  { %4364 = vmatpush.msrb.mxu0 %v10203_v7  ;;  %4430 = vmatpush.msrb.mxu1 %v10170_v56 }
 0x564   :  { %4544 = vmatpush.msra.mxu3 %v10164_v21  ;;  %4477 = vmatpush.msra.mxu2 %v10204_v62  ;;  %v9002_v4 = vand.u32 4294901760, %v8993_v38  ;;  %v10206_v21 = vld [vmem:[#allocation115_spill] sm:$0xff]  ;;  %v10215_v62 = vld [vmem:[#allocation125_spill] sm:$0xff] }
 0x565   :  { %4045 = vmatmul.f32.gmra.mxu2 %v8993_v38  ;;  %4367 = vmatpush.msrb.mxu0 %v10205_v26 }
 0x566   :  { %4432 = vmatpush.msrb.mxu1 %v10173_v23  ;;  %4546 = vmatpush.msra.mxu3 %v10167_v24  ;;  %v3879_v35 = vsub.f32 %v8993_v38, %v9002_v4  ;;  %v3730_v24 = vadd.f32 %v3729_v42, %v3696_v43  ;;  %v10217_v43 = vld [vmem:[#allocation127_spill] sm:$0xff] }
 0x567   :  { %4481 = vmatpush.msra.mxu2 %v10206_v21  ;;  %4090 = vmatmul.f32.gmra.mxu3 %v9002_v4  ;;  %v3654_v9 = vpop.f32.mrf.mxu2 }
 0x568   :  { %4370 = vmatpush.msrb.mxu0 %v10207_v5  ;;  %4434 = vmatpush.msrb.mxu1 %v10176_v18  ;;  %v9014_v58 = vand.u32 4294901760, %v3879_v35  ;;  %v3762_v60 = vadd.f32 %v3761_v16, %v3730_v24  ;;  %v3700_v17 = vadd.f32 %v3699_v22, %v3654_v9  ;;  %v3767_v22 = vpop.f32.mrf.mxu1  ;;  %v10218_v35 = vld [vmem:[#allocation139_spill] sm:$0xff]  ;;  %v10219_v9 = vld [vmem:[#allocation132_spill] sm:$0xff] }
 0x569   :  { %4548 = vmatpush.msra.mxu3 %v10170_v56  ;;  %4485 = vmatpush.msra.mxu2 %v10208_v51  ;;  %v3829_v56 = vpop.f32.mrf.mxu3  ;;  %v10220_v5 = vld [vmem:[#allocation143_spill] sm:$0xff] }
 0x56a   :  { %4373 = vmatpush.msrb.mxu0 %v10209_v48  ;;  %4436 = vmatpush.msrb.mxu1 %v10179_v34  ;;  %v3735_v42 = vadd.f32 %v3734_v44, %v3700_v17  ;;  %v10221_v51 = vld [vmem:[#allocation135_spill] sm:$0xff]  ;;  %v10226_v44 = vld [vmem:[#allocation154_spill] sm:$0xff] }
 0x56b   :  { %4550 = vmatpush.msra.mxu3 %v10173_v23  ;;  %4489 = vmatpush.msra.mxu2 %v10210_v46  ;;  %v10222_v46 = vld [vmem:[#allocation149_spill] sm:$0xff] }
 0x56c   :  { %3881 = vmatmul.f32.gmra.mxu0 %v9014_v58  ;;  %4200 = vmatmul.f32.vlgmr.msra.gmra.mxu1 %v8967_v8  ;;  %v3768_v21 = vadd.f32 %v3767_v22, %v3735_v42  ;;  %v10231_v42 = vld [vmem:[#allocation155_spill] sm:$0xff] }
 0x56d   :  { %4376 = vmatpush.msrb.mxu0 %v10211_v55  ;;  %4438 = vmatpush.msrb.mxu1 %v10182_v14  ;;  %v10223_v55 = vld [vmem:[#allocation140_spill] sm:$0xff] }
 0x56e   :  { %4552 = vmatpush.msra.mxu3 %v10176_v18  ;;  %4493 = vmatpush.msra.mxu2 %v10212_v57  ;;  %v10216_v18 = vld [vmem:[#allocation134_spill] sm:$0xff] }
 0x56f   :  { %4379 = vmatpush.msrb.mxu0 %v10213_v29  ;;  %4440 = vmatpush.msrb.mxu1 %v10185_v10  ;;  %v3800_v23 = vpop.f32.mrf.mxu2 }
 0x570   :  { %4554 = vmatpush.msra.mxu3 %v10179_v34  ;;  %4497 = vmatpush.msra.mxu2 %v10214_v36  ;;  %v3801_v7 = vadd.f32 %v3800_v23, %v3762_v60  ;;  %v10225_v60 = vld [vmem:[#allocation145_spill] sm:$0xff]  ;;  %v10229_v36 = vld [vmem:[#allocation152_spill] sm:$0xff] }
 0x571   :  { %4382 = vmatpush.msrb.mxu0 %v10215_v62  ;;  %4442 = vmatpush.msrb.mxu1 %v10188_v27  ;;  %v3833_v16 = vpop.f32.mrf.mxu3  ;;  %v10230_v62 = vld [vmem:[#allocation162_spill] sm:$0xff] }
 0x572   :  { %4556 = vmatpush.msra.mxu3 %v10182_v14  ;;  %4501 = vmatpush.msra.mxu2 %v10216_v18  ;;  %v3830_v26 = vadd.f32 %v3829_v56, %v3801_v7  ;;  %v10224_v56 = vld [vmem:[#allocation151_spill] sm:$0xff]  ;;  %v4581_v7 = vld.sshfl [vmem:[#allocation1] sm:$0xff pattern:$0x73625140] }
 0x573   :  { %4385 = vmatpush.msrb.mxu0 %v10217_v43  ;;  %4444 = vmatpush.msrb.mxu1 %v10191_v63  ;;  %v4603_v18 = vand.u32 4294901760, %v4581_v7 }
 0x574   :  { %4558 = vmatpush.msra.mxu3 %v10185_v10  ;;  %v9039_v34 = vand.u32 4294901760, %v3830_v26  ;;  %4505 = vmatpush.msra.mxu2 %v10218_v35 }
 0x575   :  { %4159 = vmatmul.f32.vlgmr.msra.gmra.mxu0 %v8967_v8  ;;  %4204 = vmatmul.f32.gmra.mxu1 %v8985_v54  ;;  %v4604_v22 = vsub.f32 %v4581_v7, %v4603_v18 }
 0x576   :  { %v9045_v14 = vsub.f32 %v3830_v26, %v9039_v34  ;;  %4388 = vmatpush.msrb.mxu0 %v10219_v9  ;;  %4446 = vmatpush.msrb.mxu1 %v10194_v47 }
 0x577   :  { %4560 = vmatpush.msra.mxu3 %v10188_v27  ;;  %4509 = vmatpush.msra.mxu2 %v10220_v5  ;;  %v3804_v10 = vpop.f32.mrf.mxu2  ;;  %v4605_v43 = vand.u32 4294901760, %v4604_v22 }
 0x578   :  { %4391 = vmatpush.msrb.mxu0 %v10221_v51  ;;  %4448 = vmatpush.msrb.mxu1 %v10197_v0  ;;  %v3805_v24 = vadd.f32 %v3804_v10, %v3768_v21  ;;  %v9054_v48 = vand.u32 4294901760, %v9045_v14  ;;  %v4582_v21 = vld.sshfl [vmem:[#allocation1 + $0x8] sm:$0xff pattern:$0x73625140] }
 0x579   :  { %4562 = vmatpush.msra.mxu3 %v10191_v63  ;;  %4513 = vmatpush.msra.mxu2 %v10222_v46  ;;  %v4606_v35 = vsub.f32 %v4604_v22, %v4605_v43  ;;  %v4762_v5 = vand.u32 4294901760, %v4582_v21 }
 0x57a   :  { %4354 = vmatmul.f32.vlgmr.msrb.gmra.mxu3 %v9039_v34  ;;  %4394 = vmatpush.msrb.mxu0 %v10223_v55  ;;  %v3834_v27 = vadd.f32 %v3833_v16, %v3805_v24  ;;  %v4243_v63 = vsub.f32 %v9045_v14, %v9054_v48 }
 0x57b   :  { %4450 = vmatpush.msrb.mxu1 %v10199_v2  ;;  %4564 = vmatpush.msra.mxu3 %v10194_v47  ;;  %v10227_v47 = vld [vmem:[#allocation147_spill] sm:$0xff]  ;;  %v4607_v9 = vand.u32 4294901760, %v4606_v35  ;;  %v4763_v10 = vsub.f32 %v4582_v21, %v4762_v5 }
 0x57c   :  { %4517 = vmatpush.msra.mxu2 %v10224_v56  ;;  %4397 = vmatpush.msrb.mxu0 %v10225_v60  ;;  %v9064_v17 = vand.u32 4294901760, %v3834_v27  ;;  %v9079_v29 = vand.u32 4294901760, %v4243_v63 }
 0x57d   :  { %4452 = vmatpush.msrb.mxu1 %v10200_v19  ;;  %4566 = vmatpush.msra.mxu3 %v10197_v0  ;;  %v10228_v0 = vld [vmem:[#allocation159_spill] sm:$0xff]  ;;  %v4764_v16 = vand.u32 4294901760, %v4763_v10 }
 0x57e   :  { %v9071_v57 = vsub.f32 %v3834_v27, %v9064_v17  ;;  %4521 = vmatpush.msra.mxu2 %v10226_v44  ;;  %4163 = vmatmul.f32.gmra.mxu0 %v8985_v54 }
 0x57f   :  { %4631 = vmatpush.xpose.msra.mxu1 %v9014_v58  ;;  %4400 = vmatpush.msrb.mxu0 %v10227_v47  ;;  %v4765_v51 = vsub.f32 %v4763_v10, %v4764_v16 }
 0x580   :  { %4456 = vmatmul.f32.vlgmr.msrb.gmra.mxu1 %v9054_v48  ;;  %4568 = vmatpush.msra.mxu3 %v10199_v2  ;;  %v9082_v23 = vand.u32 4294901760, %v9071_v57 }
 0x581   :  { %4525 = vmatpush.msra.mxu2 %v10228_v0  ;;  %4403 = vmatpush.msrb.mxu0 %v10229_v36  ;;  %v4766_v24 = vand.u32 4294901760, %v4765_v51 }
 0x582   :  { %4570 = vmatpush.msra.mxu3 %v10200_v19  ;;  %4245 = vmatmul.f32.vlgmr.msrb.gmra.mxu2 %v9079_v29  ;;  %v4251_v2 = vsub.f32 %v9071_v57, %v9082_v23  ;;  %v10232_v19 = vld [vmem:[#allocation160_spill] sm:$0xff] }
 0x583   :  { %4529 = vmatpush.msra.mxu2 %v10230_v62  ;;  %4637 = vmatpush.xpose.msra.mxu1 %v8988_v40 }
 0x584   :  { %4736 = vmatpush.xpose.msrb.mxu3 %v8985_v54  ;;  %4406 = vmatpush.msrb.mxu0 %v10231_v42  ;;  %v4252_v26 = vand.u32 4294901760, %v4251_v2 }
 0x585   :  { %4358 = vmatmul.f32.gmra.mxu3 %v9064_v17  ;;  %4711 = vmatpush.xpose.msrb.mxu2 %v9002_v4 }
 0x586   :  { %4409 = vmatpush.msrb.mxu0 %v10232_v19 }
 0x587   :  { %4684 = vmatpush.xpose.msrb.mxu1 %v8985_v54  ;;  %4412 = vmatmul.f32.vlgmr.msrb.gmra.mxu0 %v9045_v14 }
 0x588   :  { %4462 = vmatmul.f32.gmra.mxu1 %v9082_v23  ;;  %4600 = vmatpush.xpose.msra.mxu0 %v8985_v54 }
 0x589   :  { %4738 = vmatpush.xpose.msrb.mxu3 %v8967_v8  ;;  %4715 = vmatpush.xpose.msrb.mxu2 %v8976_v33 }
 0x58a   :  { %4253 = vmatmul.f32.gmra.mxu2 %v4252_v26 }
 0x58b   :  { %4686 = vmatpush.xpose.msrb.mxu1 %v8967_v8 }
 0x58c   :  { %4602 = vmatpush.xpose.msra.mxu0 %v8967_v8 }
 0x58d   :  { %4572 = vmatmul.f32.vlgmr.msra.gmra.mxu3 %v9039_v34 }
 0x58e   :  { %4843 = vmatpush.xpose.msra.mxu3 %v9064_v17 }
 0x58f   :  { %4417 = vmatmul.f32.gmra.mxu0 %v9071_v57 }
 0x590   :  { %4659 = vmatpush.xpose.msrb.mxu0 %v8993_v38  ;;  %4639 = vmatmul.f32.vlgmr.msra.gmra.mxu1 %v4603_v18 }
 0x591   :  { %4790 = vmatpush.xpose.msra.mxu1 %v4252_v26 }
 0x592   :  { %4845 = vmatpush.xpose.msra.mxu3 %v9039_v34  ;;  %4531 = vmatmul.f32.vlgmr.msra.gmra.mxu2 %v9039_v34 }
 0x593   :  { %4818 = vmatpush.xpose.msra.mxu2 %v9071_v57 }
 0x594   :  { %4662 = vmatpush.xpose.msrb.mxu0 %v8970_v41 }
 0x595   :  { %4796 = vmatpush.xpose.msra.mxu1 %v9079_v29  ;;  %4576 = vmatmul.f32.gmra.mxu3 %v9064_v17 }
 0x597   :  { %4608 = vmatmul.f32.vlgmr.msra.gmra.mxu0 %v4607_v9  ;;  %4821 = vmatpush.xpose.msra.mxu2 %v9045_v14 }
 0x598   :  { %4690 = vmatmul.f32.vlgmr.msrb.gmra.mxu1 %v4605_v43  ;;  %4759 = vmatpush.xpose.msra.mxu0 %v9064_v17 }
 0x599   :  { %4895 = vmatpush.xpose.msrb.mxu1 %v9064_v17 }
 0x59a   :  { %4535 = vmatmul.f32.gmra.mxu2 %v9064_v17 }
 0x59c   :  { %4761 = vmatpush.xpose.msra.mxu0 %v9039_v34 }
 0x59d   :  { %4897 = vmatpush.xpose.msrb.mxu1 %v9039_v34  ;;  %4740 = vmatmul.f32.vlgmr.msrb.gmra.mxu3 %v4603_v18 }
 0x59e   :  { %5050 = vmatpush.msrb.mxu3 %v9014_v58 }
 0x59f   :  { %4665 = vmatmul.f32.vlgmr.msrb.gmra.mxu0 %v4604_v22 }
 0x5a0   :  { %4798 = vmatmul.f32.vlgmr.msra.gmra.mxu1 %v4762_v5  ;;  %5056 = vmatpush.msrb.mxu3 %v8988_v40 }
 0x5a1   :  { %5112 = vmatpush.msra.mxu1 %v8985_v54  ;;  %4870 = vmatpush.xpose.msrb.mxu0 %v9082_v23 }
 0x5a2   :  { %4717 = vmatmul.f32.vlgmr.msrb.gmra.mxu2 %v4603_v18 }
 0x5a3   :  { %5114 = vmatpush.msra.mxu1 %v8967_v8  ;;  %5011 = vmatpush.msrb.mxu2 %v8985_v54 }
 0x5a5   :  { %4849 = vmatmul.f32.vlgmr.msra.gmra.mxu3 %v4764_v16  ;;  %4874 = vmatpush.xpose.msrb.mxu0 %v9054_v48 }
 0x5a6   :  { %5174 = vmatpush.msra.mxu3 %v8985_v54  ;;  %5013 = vmatpush.msrb.mxu2 %v8967_v8 }
 0x5a7   :  { %4767 = vmatmul.f32.vlgmr.msra.gmra.mxu0 %v4766_v24 }
 0x5a8   :  { %4899 = vmatmul.f32.vlgmr.msrb.gmra.mxu1 %v4762_v5  ;;  %5176 = vmatpush.msra.mxu3 %v8967_v8 }
 0x5a9   :  { %5343 = vmatpush.msrb.mxu1 %v4252_v26  ;;  %5082 = vmatpush.msra.mxu0 %v8993_v38 }
 0x5aa   :  { %4824 = vmatmul.f32.vlgmr.msra.gmra.mxu2 %v4763_v10 }
 0x5ab   :  { %5349 = vmatpush.msrb.mxu1 %v9079_v29  ;;  %5085 = vmatpush.msra.mxu0 %v8970_v41 }
 0x5ac   :  { %5145 = vmatpush.msra.mxu2 %v9002_v4 }
 0x5ae   :  { %5149 = vmatpush.msra.mxu2 %v8976_v33 }
 0x5af   :  { %4876 = vmatmul.f32.vlgmr.msrb.gmra.mxu0 %v4762_v5 }
 0x5b0   :  { %5304 = vmatpush.msrb.mxu0 %v9064_v17 }
 0x5b2   :  { %5306 = vmatpush.msrb.mxu0 %v9039_v34 }
 0x5d7   :  { %v3983_v8 = vpop.f32.mrf.mxu1 }
 0x5df   :  { %v3874_v54 = vpop.f32.mrf.mxu0  ;;  %v3987_v46 = vpop.f32.mrf.mxu1 }
 0x5e0   :  { %v4041_v38 = vpop.f32.mrf.mxu2  ;;  %v3984_v55 = vadd.f32 %v3983_v8, %v3874_v54 }
 0x5e1   :  { %v4085_v40 = vpop.f32.mrf.mxu3 }
 0x5e2   :  { %v4042_v41 = vadd.f32 %v4041_v38, %v3984_v55 }
 0x5e4   :  { %v4086_v4 = vadd.f32 %v4085_v40, %v4042_v41 }
 0x5e8   :  { %v4046_v60 = vpop.f32.mrf.mxu2 }
 0x5e9   :  { %v3882_v58 = vpop.f32.mrf.mxu0  ;;  %v4201_v63 = vpop.f32.mrf.mxu1 }
 0x5ea   :  { %v4091_v27 = vpop.f32.mrf.mxu3  ;;  %v3988_v44 = vadd.f32 %v3987_v46, %v3882_v58 }
 0x5ec   :  { %v4047_v0 = vadd.f32 %v4046_v60, %v3988_v44  ;;  %v10233_v60 = vmov 1  }
 0x5ee   :  { %v4092_v2 = vadd.f32 %v4091_v27, %v4047_v0 }
 0x5f2   :  { %v4160_v56 = vpop.f32.mrf.mxu0  ;;  %v4205_v62 = vpop.f32.mrf.mxu1 }
 0x5f3   :  { %v4161_v47 = vadd.f32 %v4160_v56, %v4086_v4 }
 0x5f5   :  { %v4202_v7 = vadd.f32 %v4201_v63, %v4161_v47 }
 0x5fb   :  { %v4164_v29 = vpop.f32.mrf.mxu0 }
 0x5fc   :  { %v4165_v18 = vadd.f32 %v4164_v29, %v4092_v2 }
 0x5fd   :  { %v4355_v33 = vpop.f32.mrf.mxu3  ;;  %v4457_v5 = vpop.f32.mrf.mxu1 }
 0x5fe   :  { %v4206_v35 = vadd.f32 %v4205_v62, %v4165_v18 }
 0x604   :  { %v4413_v22 = vpop.f32.mrf.mxu0 }
 0x605   :  { %v4246_v36 = vpop.f32.mrf.mxu2  ;;  %v4463_v46 = vpop.f32.mrf.mxu1 }
 0x606   :  { %v4247_v42 = vadd.f32 %v4246_v36, %v4202_v7 }
 0x608   :  { %v4359_v19 = vpop.f32.mrf.mxu3  ;;  %v4356_v26 = vadd.f32 %v4355_v33, %v4247_v42 }
 0x60a   :  { %v4414_v9 = vadd.f32 %v4413_v22, %v4356_v26 }
 0x60c   :  { %v4458_v16 = vadd.f32 %v4457_v5, %v4414_v9  ;;  %v4418_v8 = vpop.f32.mrf.mxu0 }
 0x60d   :  { %v4254_v43 = vpop.f32.mrf.mxu2  ;;  %v4640_v4 = vpop.f32.mrf.mxu1 }
 0x60e   :  { %v4255_v21 = vadd.f32 %v4254_v43, %v4206_v35 }
 0x610   :  { %v4360_v10 = vadd.f32 %v4359_v19, %v4255_v21  ;;  %v4573_v51 = vpop.f32.mrf.mxu3 }
 0x612   :  { %v4419_v58 = vadd.f32 %v4418_v8, %v4360_v10 }
 0x614   :  { %v4464_v38 = vadd.f32 %v4463_v46, %v4419_v58  ;;  %v4609_v63 = vpop.f32.mrf.mxu0 }
 0x615   :  { %v4532_v24 = vpop.f32.mrf.mxu2  ;;  %v4641_v44 = vadd.f32 %v4640_v4, %v4609_v63  ;;  %v4691_v29 = vpop.f32.mrf.mxu1 }
 0x616   :  { %v4533_v54 = vadd.f32 %v4532_v24, %v4458_v16 }
 0x618   :  { %v4574_v40 = vadd.f32 %v4573_v51, %v4533_v54  ;;  %v4577_v56 = vpop.f32.mrf.mxu3 }
 0x61a   :  { %5199 = vperm.xlu2 %6742, %v4574_v40   ;;  %4905 = vperm.xlu0 %6739, %v4574_v40  }
 0x61c   :  { %v4666_v33 = vpop.f32.mrf.mxu0 }
 0x61d   :  { %v4536_v55 = vpop.f32.mrf.mxu2  ;;  %v4667_v47 = vadd.f32 %v4666_v33, %v4641_v44  ;;  %v4799_v19 = vpop.f32.mrf.mxu1 }
 0x61e   :  { %v4537_v27 = vadd.f32 %v4536_v55, %v4464_v38 }
 0x61f   :  { %v4692_v0 = vadd.f32 %v4691_v29, %v4667_v47 }
 0x620   :  { %v4578_v41 = vadd.f32 %v4577_v56, %v4537_v27  ;;  %v4741_v62 = vpop.f32.mrf.mxu3 }
 0x622   :  { %6743 = vset.pattern.permute.xlu0 %v10233_v60  ;;  %4910 = vperm.xlu1 %6741, %v4578_v41  }
 0x623   :  { %5203 = vperm.xlu0 %6743, %v4578_v41  }
 0x624   :  { %v4768_v42 = vpop.f32.mrf.mxu0 }
 0x625   :  { %v4718_v36 = vpop.f32.mrf.mxu2  ;;  %v4900_v10 = vpop.f32.mrf.mxu1 }
 0x626   :  { %v4719_v7 = vadd.f32 %v4718_v36, %v4692_v0 }
 0x628   :  { %v4742_v2 = vadd.f32 %v4741_v62, %v4719_v7  ;;  %v4850_v35 = vpop.f32.mrf.mxu3 }
 0x62a   :  { %v4769_v18 = vadd.f32 %v4768_v42, %v4742_v2 }
 0x62c   :  { %v4800_v26 = vadd.f32 %v4799_v19, %v4769_v18  ;;  %v4877_v9 = vpop.f32.mrf.mxu0 }
 0x62d   :  { %v4825_v22 = vpop.f32.mrf.mxu2 }
 0x62e   :  { %v4826_v43 = vadd.f32 %v4825_v22, %v4800_v26 }
 0x630   :  { %v4851_v21 = vadd.f32 %v4850_v35, %v4826_v43 }
 0x632   :  { %v4878_v5 = vadd.f32 %v4877_v9, %v4851_v21 }
 0x634   :  { %v4901_v16 = vadd.f32 %v4900_v10, %v4878_v5 }
 0x636   :  { %v5206_v51 = vperm.slane %v4901_v16, 1  ;;  %v4913_v46 = vperm.slane %v4901_v16, 0 }
 0x674   :  { %v5200_v24 = vpop.permute.xlu2 %5199 }
 0x675   :  { %v5207_v54 = vadd.f32 %v5206_v51, %v5200_v24 }
 0x677   :  { %v5211_v8 = vmul.f32 0.2, %v5207_v54  ;;  %vm5209_vm4 = vcmp.gt.f32.partialorder %v5207_v54, 0.0 }
 0x679   :  { %v5213_v40 = vsel %vm5209_vm4, %v5207_v54, %v5211_v8 }
 0x67a   :  { %v6720_v58 = vmul.f32 -1.442695, %v5213_v40 }
 0x67c   :  { %6795 = vpow2.f32 %v6720_v58 }
 0x682   :  { %v6796_v27 = vpop.eup %6795 }
 0x683   :  { %v5221_v41 = vadd.f32 1.0, %v6796_v27 }
 0x685   :  { %vm5228_vm13 = vweird.f32 %v5221_v41 }
 0x68c   :  { %v4906_v38 = vpop.permute.xlu0 %4905 }
 0x68d   :  { %v4914_v55 = vadd.f32 %v4913_v46, %v4906_v38  ;;  %v5234_v38 = vand.u32 2147483648, %v5221_v41 }
 0x68f   :  { %vm4916_vm5 = vcmp.gt.f32.partialorder %v4914_v55, 0.0  ;;  %v4918_v56 = vmul.f32 0.2, %v4914_v55 }
 0x691   :  { %v4920_v60 = vsel %vm4916_vm5, %v4914_v55, %v4918_v56  ;;  %v5232_v55 = vand.u32 2147483647, %v5221_v41 }
 0x692   :  { %v6716_v63 = vmul.f32 -1.442695, %v4920_v60 }
 0x693   :  { %vm5233_vm1 = vcmp.eq.f32.partialorder %v5232_v55, 8.507059e+37 }
 0x694   :  { %6797 = vpow2.f32 %v6716_v63  ;;  %v4911_v4 = vpop.permute.xlu1 %4910 }
 0x695   :  { %6799 = vrcp.f32 %v5221_v41  ;;  %v4915_v44 = vadd.f32 %v4913_v46, %v4911_v4  ;;  %v5204_v33 = vpop.permute.xlu0 %5203 }
 0x696   :  { %v5208_v47 = vadd.f32 %v5206_v51, %v5204_v33  ;;  %v5235_v33 = vor.u32 1.1754944e-38, %v5234_v38 }
 0x697   :  { %vm4917_vm7 = vcmp.gt.f32.partialorder %v4915_v44, 0.0  ;;  %v4919_v29 = vmul.f32 0.2, %v4915_v44 }
 0x698   :  { %vm5210_vm8 = vcmp.gt.f32.partialorder %v5208_v47, 0.0  ;;  %v5212_v0 = vmul.f32 0.2, %v5208_v47 }
 0x699   :  { %v4921_v36 = vsel %vm4917_vm7, %v4915_v44, %v4919_v29 }
 0x69a   :  { %v6798_v7 = vpop.eup %6797  ;;  %v6717_v62 = vmul.f32 -1.442695, %v4921_v36  ;;  %v5214_v2 = vsel %vm5210_vm8, %v5208_v47, %v5212_v0 }
 0x69b   :  { %v6800_v42 = vpop.eup %6799  ;;  %v4928_v18 = vadd.f32 1.0, %v6798_v7  ;;  %v6721_v19 = vmul.f32 -1.442695, %v5214_v2 }
 0x69c   :  { %6801 = vpow2.f32 %v6717_v62  ;;  %v5224_v26 = vmul.f32 %v6800_v42, %v5221_v41  ;;  %vm5229_vm10 = vweird.f32 %v6800_v42 }
 0x69d   :  { %6803 = vrcp.f32 %v4928_v18  ;;  %v4941_v54 = vand.u32 2147483648, %v4928_v18  ;;  %vm4935_vm11 = vweird.f32 %v4928_v18  ;;  %v4939_v58 = vand.u32 2147483647, %v4928_v18  ;;  %vm5230_vm14 = vmor %vm5228_vm13, %vm5229_vm10 }
 0x69e   :  { %6805 = vpow2.f32 %v6721_v19  ;;  %v5225_v43 = vsub.f32 1.0, %v5224_v26 }
 0x69f   :  { %v4942_v60 = vor.u32 1.1754944e-38, %v4941_v54  ;;  %vm4940_vm15 = vcmp.eq.f32.partialorder %v4939_v58, 8.507059e+37 }
 0x6a0   :  { %v5226_v10 = vmul.f32 %v6800_v42, %v5225_v43 }
 0x6a2   :  { %v6802_v22 = vpop.eup %6801  ;;  %v5227_v8 = vadd.f32 %v6800_v42, %v5226_v10 }
 0x6a3   :  { %v6804_v35 = vpop.eup %6803  ;;  %v4929_v21 = vadd.f32 1.0, %v6802_v22 }
 0x6a4   :  { %v6806_v9 = vpop.eup %6805  ;;  %v4931_v5 = vmul.f32 %v6804_v35, %v4928_v18  ;;  %vm4936_vm9 = vweird.f32 %v6804_v35  ;;  %v5231_v4 = vsel %vm5230_vm14, %v6800_v42, %v5227_v8 }
 0x6a5   :  { %6807 = vrcp.f32 %v4929_v21  ;;  %v5222_v51 = vadd.f32 1.0, %v6806_v9  ;;  %vm4937_vm12 = vmor %vm4935_vm11, %vm4936_vm9  ;;  %v4956_v47 = vand.u32 2147483648, %v4929_v21  ;;  %v4954_v7 = vand.u32 2147483647, %v4929_v21 }
 0x6a6   :  { %v4932_v16 = vsub.f32 1.0, %v4931_v5  ;;  %v5236_v62 = vsel %vm5233_vm1, %v5235_v33, %v5231_v4  ;;  %vm4950_vm3 = vweird.f32 %v4929_v21 }
 0x6a7   :  { %6809 = vrcp.f32 %v5222_v51  ;;  %v5249_v41 = vand.u32 2147483648, %v5222_v51  ;;  %v4957_v26 = vor.u32 1.1754944e-38, %v4956_v47  ;;  %v5247_v42 = vand.u32 2147483647, %v5222_v51 }
 0x6a8   :  { %v4933_v24 = vmul.f32 %v6804_v35, %v4932_v16  ;;  %vm4955_vm7 = vcmp.eq.f32.partialorder %v4954_v7, 8.507059e+37  ;;  %vm5243_vm8 = vweird.f32 %v5222_v51 }
 0x6a9   :  { %v5250_v16 = vor.u32 1.1754944e-38, %v5249_v41  ;;  %vm5248_vm10 = vcmp.eq.f32.partialorder %v5247_v42, 8.507059e+37 }
 0x6aa   :  { %v4934_v40 = vadd.f32 %v6804_v35, %v4933_v24 }
 0x6ab   :  { %v6808_v46 = vpop.eup %6807 }
 0x6ac   :  { %v4938_v27 = vsel %vm4937_vm12, %v6804_v35, %v4934_v40  ;;  %v4946_v56 = vmul.f32 %v6808_v46, %v4929_v21  ;;  %vm4951_vm2 = vweird.f32 %v6808_v46  ;;  %v5253_v35 = vmul.f32 1.442695, %v5236_v62 }
 0x6ad   :  { %v6810_v63 = vpop.eup %6809  ;;  %v4943_v0 = vsel %vm4940_vm15, %v4942_v60, %v4938_v27  ;;  %vm4952_vm4 = vmor %vm4950_vm3, %vm4951_vm2 }
 0x6ae   :  { %v4947_v44 = vsub.f32 1.0, %v4946_v56  ;;  %v5239_v29 = vmul.f32 %v6810_v63, %v5222_v51  ;;  %v4960_v19 = vmul.f32 1.442695, %v4943_v0  ;;  %vm5244_vm5 = vweird.f32 %v6810_v63 }
 0x6af   :  { %vm5245_vm9 = vmor %vm5243_vm8, %vm5244_vm5 }
 0x6b0   :  { %v4948_v36 = vmul.f32 %v6808_v46, %v4947_v44  ;;  %v5240_v2 = vsub.f32 1.0, %v5239_v29  ;;  %6811 = vpow2.f32 %v4960_v19 }
 0x6b2   :  { %v4949_v18 = vadd.f32 %v6808_v46, %v4948_v36  ;;  %v5241_v22 = vmul.f32 %v6810_v63, %v5240_v2 }
 0x6b4   :  { %v4953_v43 = vsel %vm4952_vm4, %v6808_v46, %v4949_v18  ;;  %v5242_v5 = vadd.f32 %v6810_v63, %v5241_v22 }
 0x6b5   :  { %v4958_v9 = vsel %vm4955_vm7, %v4957_v26, %v4953_v43 }
 0x6b6   :  { %v4962_v10 = vmul.f32 1.442695, %v4958_v9  ;;  %v5246_v24 = vsel %vm5245_vm9, %v6810_v63, %v5242_v5  ;;  %v6812_v8 = vpop.eup %6811 }
 0x6b7   :  { %v5251_v21 = vsel %vm5248_vm10, %v5250_v16, %v5246_v24  ;;  %v4964_v38 = vsel %vm1669_vm6, %v6812_v8, 0.0 }
 0x6b8   :  { %6813 = vpow2.f32 %v4962_v10  ;;  %v5255_v54 = vmul.f32 1.442695, %v5251_v21 }
 0x6b9   :  { %6815 = vpow2.f32 %v5253_v35 }
 0x6ba   :  { %6817 = vpow2.f32 %v5255_v54 }
 0x6be   :  { %v6814_v40 = vpop.eup %6813 }
 0x6bf   :  { %v6816_v58 = vpop.eup %6815  ;;  %v4965_v46 = vsel %vm1669_vm6, %v6814_v40, 0.0 }
 0x6c0   :  { %v4966_v55 = vadd.f32 %v4965_v46, %v4964_v38  ;;  %v6818_v51 = vpop.eup %6817  ;;  %v5257_v27 = vsel %vm1669_vm6, %v6816_v58, 0.0 }
 0x6c1   :  { %v5258_v56 = vsel %vm1669_vm6, %v6818_v51, 0.0 }
 0x6c2   :  { %v4967_v60 = vrot.slane %v4966_v55, 4  ;;  %v5259_v63 = vadd.f32 %v5258_v56, %v5257_v27 }
 0x6c4   :  { %v4968_v4 = vadd.f32 %v4967_v60, %v4966_v55  ;;  %v5260_v44 = vrot.slane %v5259_v63, 4 }
 0x6c6   :  { %v4969_v33 = vrot.slane %v4968_v4, 2  ;;  %v5261_v47 = vadd.f32 %v5260_v44, %v5259_v63 }
 0x6c8   :  { %v4970_v29 = vadd.f32 %v4969_v33, %v4968_v4  ;;  %v5262_v0 = vrot.slane %v5261_v47, 2 }
 0x6ca   :  { %v4971_v36 = vrot.slane %v4970_v29, 1  ;;  %v5263_v7 = vadd.f32 %v5262_v0, %v5261_v47 }
 0x6cc   :  { %v4972_v62 = vadd.f32 %v4971_v36, %v4970_v29  ;;  %v5264_v2 = vrot.slane %v5263_v7, 1 }
 0x6ce   :  { %6819 = vrcp.f32 %v4972_v62  ;;  %v5265_v18 = vadd.f32 %v5264_v2, %v5263_v7  ;;  %v4984_v42 = vand.u32 2147483648, %v4972_v62  ;;  %v4982_v9 = vand.u32 2147483647, %v4972_v62 }
 0x6cf   :  { %vm4978_vm12 = vweird.f32 %v4972_v62 }
 0x6d0   :  { %6821 = vrcp.f32 %v5265_v18  ;;  %v5277_v16 = vand.u32 2147483648, %v5265_v18  ;;  %v4985_v24 = vor.u32 1.1754944e-38, %v4984_v42  ;;  %v5275_v54 = vand.u32 2147483647, %v5265_v18 }
 0x6d1   :  { %vm4983_vm15 = vcmp.eq.f32.partialorder %v4982_v9, 8.507059e+37  ;;  %vm5271_vm1 = vweird.f32 %v5265_v18  ;;  %v10236_v9 = vld [vmem:[#allocation166_spill] sm:$0xff] }
 0x6d2   :  { %v5278_v60 = vor.u32 1.1754944e-38, %v5277_v16  ;;  %vm5276_vm3 = vcmp.eq.f32.partialorder %v5275_v54, 8.507059e+37  ;;  %v10239_v16 = vld [vmem:[#allocation165_spill] sm:$0xff] }
 0x6d4   :  { %v6820_v41 = vpop.eup %6819 }
 0x6d5   :  { %v4974_v19 = vmul.f32 %v6820_v41, %v4972_v62  ;;  %vm4979_vm11 = vweird.f32 %v6820_v41 }
 0x6d6   :  { %v6822_v26 = vpop.eup %6821  ;;  %vm4980_vm13 = vmor %vm4978_vm12, %vm4979_vm11 }
 0x6d7   :  { %v4975_v22 = vsub.f32 1.0, %v4974_v19  ;;  %v5267_v43 = vmul.f32 %v6822_v26, %v5265_v18  ;;  %vm5272_vm14 = vweird.f32 %v6822_v26 }
 0x6d8   :  { %vm5273_vm2 = vmor %vm5271_vm1, %vm5272_vm14 }
 0x6d9   :  { %v4976_v35 = vmul.f32 %v6820_v41, %v4975_v22  ;;  %v5268_v5 = vsub.f32 1.0, %v5267_v43 }
 0x6db   :  { %v4977_v10 = vadd.f32 %v6820_v41, %v4976_v35  ;;  %v5269_v21 = vmul.f32 %v6822_v26, %v5268_v5  ;;  %v10234_v35 = vld [vmem:[#allocation174_spill] sm:$0xff] }
 0x6dc   :  { %v10237_v5 = vld [vmem:[#allocation182_spill] sm:$0xff] }
 0x6dd   :  { %v4981_v46 = vsel %vm4980_vm13, %v6820_v41, %v4977_v10  ;;  %v5270_v55 = vadd.f32 %v6822_v26, %v5269_v21  ;;  %v10238_v10 = vld [vmem:[#allocation169_spill] sm:$0xff]  ;;  %v10241_v21 = vld [vmem:[#allocation172_spill] sm:$0xff] }
 0x6de   :  { %v4986_v38 = vsel %vm4983_vm15, %v4985_v24, %v4981_v46  ;;  %v10240_v24 = vld [vmem:[#allocation186_spill] sm:$0xff]  ;;  %v10242_v46 = vld [vmem:[#allocation167_spill] sm:$0xff] }
 0x6df   :  { %v4988_v27 = vmul.f32 %v6812_v8, %v4986_v38  ;;  %v4989_v56 = vmul.f32 %v6814_v40, %v4986_v38  ;;  %v5274_v63 = vsel %vm5273_vm2, %v6822_v26, %v5270_v55  ;;  %v10243_v38 = vld [vmem:[#allocation193_spill] sm:$0xff]  ;;  %v10244_v55 = vld [vmem:[#allocation176_spill] sm:$0xff] }
 0x6e0   :  { %v5279_v33 = vsel %vm5276_vm3, %v5278_v60, %v5274_v63  ;;  %v10247_v60 = vld [vmem:[#allocation181_spill] sm:$0xff] }
 0x6e1   :  { %v4991_v4 = vsel %vm1669_vm6, %v4988_v27, 0  ;;  %v4994_v44 = vsel %vm1669_vm6, %v4989_v56, 0  ;;  %v5281_v0 = vmul.f32 %v6816_v58, %v5279_v33  ;;  %v5282_v40 = vmul.f32 %v6818_v51, %v5279_v33  ;;  %v10245_v27 = vld [vmem:[#allocation170_spill] sm:$0xff]  ;;  %v10248_v63 = vld [vmem:[#allocation173_spill] sm:$0xff] }
 0x6e2   :  { %v5014_v47 = vand.u32 4294901760, %v4991_v4  ;;  %v9145_v29 = vand.u32 4294901760, %v4994_v44  ;;  %v10246_v56 = vld [vmem:[#allocation194_spill] sm:$0xff]  ;;  %v10251_v33 = vld [vmem:[#allocation177_spill] sm:$0xff] }
 0x6e3   :  { %v5284_v7 = vsel %vm1669_vm6, %v5281_v0, 0  ;;  %v5287_v41 = vsel %vm1669_vm6, %v5282_v40, 0  ;;  %v10253_v0 = vld [vmem:[#allocation188_spill] sm:$0xff] }
 0x6e4   :  { %5058 = vmatmul.f32.vlgmr.msrb.gmra.mxu3 %v5014_v47  ;;  %v5015_v36 = vsub.f32 %v4991_v4, %v5014_v47  ;;  %v9149_v8 = vand.u32 4294901760, %v5284_v7  ;;  %v5023_v2 = vsub.f32 %v4994_v44, %v9145_v29  ;;  %v9163_v26 = vand.u32 4294901760, %v5287_v41  ;;  %v10249_v4 = vld [vmem:[#allocation198_spill] sm:$0xff]  ;;  %v10250_v44 = vld [vmem:[#allocation183_spill] sm:$0xff]  ;;  %v10257_v40 = vld [vmem:[#allocation184_spill] sm:$0xff] }
 0x6e5   :  { %5405 = vmatpush.msrb.mxu3 %v9064_v17 }
 0x6e6   :  { %5088 = vmatmul.f32.vlgmr.msra.gmra.mxu0 %v5015_v36  ;;  %v5016_v62 = vand.u32 4294901760, %v5015_v36  ;;  %v9155_v58 = vsub.f32 %v5284_v7, %v9149_v8  ;;  %v5024_v19 = vand.u32 4294901760, %v5023_v2  ;;  %v10255_v7 = vld [vmem:[#allocation206_spill] sm:$0xff] }
 0x6e7   :  { %5407 = vmatpush.msrb.mxu3 %v9039_v34  ;;  %5438 = vmatpush.msra.mxu0 %v9082_v23 }
 0x6e8   :  { %5118 = vmatmul.f32.vlgmr.msra.gmra.mxu1 %v5016_v62  ;;  %v5017_v18 = vsub.f32 %v5015_v36, %v5016_v62  ;;  %v5309_v23 = vand.u32 4294901760, %v9155_v58  ;;  %v5025_v22 = vsub.f32 %v5023_v2, %v5024_v19  ;;  %v10254_v36 = vld [vmem:[#allocation180_spill] sm:$0xff]  ;;  %v10258_v62 = vld [vmem:[#allocation213_spill] sm:$0xff] }
 0x6e9   :  { %5442 = vmatpush.msra.mxu0 %v9054_v48  ;;  %5467 = vmatpush.msra.mxu1 %v9064_v17  ;;  %v9169_v17 = vsub.f32 %v5287_v41, %v9163_v26  ;;  %v10262_v41 = vld [vmem:[#allocation201_spill] sm:$0xff] }
 0x6ea   :  { %v5018_v51 = vand.u32 4294901760, %v5017_v18  ;;  %v5310_v48 = vsub.f32 %v9155_v58, %v5309_v23  ;;  %v10260_v18 = vld [vmem:[#allocation189_spill] sm:$0xff] }
 0x6eb   :  { %5469 = vmatpush.msra.mxu1 %v9039_v34  ;;  %v5026_v34 = vand.u32 4294901760, %v5025_v22  ;;  %v5317_v43 = vand.u32 4294901760, %v9169_v17  ;;  %v10267_v22 = vld [vmem:[#allocation222_spill] sm:$0xff] }
 0x6ec   :  { %5019 = vmatmul.f32.vlgmr.msrb.gmra.mxu2 %v5018_v51  ;;  %5062 = vmatmul.f32.gmra.mxu3 %v9145_v29  ;;  %v5311_v42 = vand.u32 4294901760, %v5310_v48  ;;  %v10263_v51 = vld [vmem:[#allocation192_spill] sm:$0xff] }
 0x6ed   :  { %5375 = vmatpush.msrb.mxu2 %v9071_v57  ;;  %v10235_v57 = vld [vmem:[#allocation178_spill] sm:$0xff]  ;;  %v10268_v48 = vld [vmem:[#allocation208_spill] sm:$0xff] }
 0x6ee   :  { %5093 = vmatmul.f32.gmra.mxu0 %v5023_v2  ;;  %v10259_v2 = vld [vmem:[#allocation196_spill] sm:$0xff] }
 0x6ef   :  { %5378 = vmatpush.msrb.mxu2 %v9045_v14  ;;  %v5318_v14 = vsub.f32 %v9169_v17, %v5317_v43 }
 0x6f0   :  { %5124 = vmatmul.f32.gmra.mxu1 %v5024_v19  ;;  %v10264_v19 = vld [vmem:[#allocation218_spill] sm:$0xff] }
 0x6f1   :  { %v5319_v54 = vand.u32 4294901760, %v5318_v14  ;;  %v10277_v14 = vld [vmem:[#allocation221_spill] sm:$0xff] }
 0x6f4   :  { %5027 = vmatmul.f32.gmra.mxu2 %v5026_v34  ;;  %5178 = vmatmul.f32.vlgmr.msra.gmra.mxu3 %v5014_v47  ;;  %v10269_v34 = vld [vmem:[#allocation200_spill] sm:$0xff] }
 0x6f5   :  { %5545 = vmatpush.msra.mxu3 %v10234_v35  ;;  %v10273_v35 = vld [vmem:[#allocation227_spill] sm:$0xff] }
 0x6f6   :  { %5312 = vmatmul.f32.vlgmr.msrb.gmra.mxu0 %v5311_v42  ;;  %v10271_v42 = vld [vmem:[#allocation211_spill] sm:$0xff] }
 0x6f7   :  { %5551 = vmatpush.msra.mxu3 %v10235_v57  ;;  %5647 = vmatpush.msrb.mxu0 %v10236_v9  ;;  %v10274_v57 = vld [vmem:[#allocation216_spill] sm:$0xff]  ;;  %v10275_v9 = vld [vmem:[#allocation209_spill] sm:$0xff] }
 0x6f8   :  { %5351 = vmatmul.f32.vlgmr.msrb.gmra.mxu1 %v9149_v8 }
 0x6f9   :  { %5557 = vmatpush.msra.mxu3 %v10237_v5  ;;  %5650 = vmatpush.msrb.mxu0 %v10238_v10  ;;  %v10278_v5 = vld [vmem:[#allocation212_spill] sm:$0xff]  ;;  %v10279_v10 = vld [vmem:[#allocation223_spill] sm:$0xff] }
 0x6fa   :  { %5705 = vmatpush.msrb.mxu1 %v10239_v16 }
 0x6fb   :  { %5563 = vmatpush.msra.mxu3 %v10240_v24  ;;  %5653 = vmatpush.msrb.mxu0 %v10241_v21  ;;  %v10280_v24 = vld [vmem:[#allocation217_spill] sm:$0xff]  ;;  %v10281_v21 = vld [vmem:[#allocation220_spill] sm:$0xff] }
 0x6fc   :  { %5151 = vmatmul.f32.vlgmr.msra.gmra.mxu2 %v5014_v47  ;;  %5182 = vmatmul.f32.gmra.mxu3 %v9145_v29  ;;  %v10252_v47 = vld [vmem:[#allocation202_spill] sm:$0xff] }
 0x6fd   :  { %5707 = vmatpush.msrb.mxu1 %v10242_v46  ;;  %5492 = vmatpush.msra.mxu2 %v10239_v16 }
 0x6fe   :  { %5320 = vmatmul.f32.gmra.mxu0 %v5319_v54  ;;  %5569 = vmatpush.msra.mxu3 %v10243_v38  ;;  %v10282_v54 = vld [vmem:[#allocation230_spill] sm:$0xff] }
 0x6ff   :  { %5656 = vmatpush.msrb.mxu0 %v10244_v55  ;;  %5709 = vmatpush.msrb.mxu1 %v10245_v27  ;;  %v10285_v38 = vld [vmem:[#allocation234_spill] sm:$0xff]  ;;  %v10286_v55 = vld [vmem:[#allocation171_spill] sm:$0xff] }
 0x700   :  { %5355 = vmatmul.f32.gmra.mxu1 %v9163_v26  ;;  %5494 = vmatpush.msra.mxu2 %v10242_v46 }
 0x701   :  { %5575 = vmatpush.msra.mxu3 %v10246_v56  ;;  %5659 = vmatpush.msrb.mxu0 %v10247_v60  ;;  %v10288_v56 = vld [vmem:[#allocation175_spill] sm:$0xff]  ;;  %v10289_v60 = vld [vmem:[#allocation240_spill] sm:$0xff] }
 0x702   :  { %5711 = vmatpush.msrb.mxu1 %v10248_v63  ;;  %5496 = vmatpush.msra.mxu2 %v10245_v27 }
 0x703   :  { %5581 = vmatpush.msra.mxu3 %v10249_v4  ;;  %5662 = vmatpush.msrb.mxu0 %v10250_v44  ;;  %v10291_v4 = vld [vmem:[#allocation243_spill] sm:$0xff]  ;;  %v10292_v44 = vld [vmem:[#allocation185_spill] sm:$0xff] }
 0x704   :  { %5155 = vmatmul.f32.gmra.mxu2 %v9145_v29  ;;  %5411 = vmatmul.f32.vlgmr.msrb.gmra.mxu3 %v5309_v23  ;;  %v10256_v29 = vld [vmem:[#allocation191_spill] sm:$0xff]  ;;  %v10266_v23 = vld [vmem:[#allocation197_spill] sm:$0xff] }
 0x705   :  { %5713 = vmatpush.msrb.mxu1 %v10251_v33  ;;  %5498 = vmatpush.msra.mxu2 %v10248_v63 }
 0x706   :  { %5444 = vmatmul.f32.vlgmr.msra.gmra.mxu0 %v9149_v8  ;;  %5587 = vmatpush.msra.mxu3 %v10252_v47  ;;  %v10294_v47 = vld [vmem:[#allocation187_spill] sm:$0xff] }
 0x707   :  { %5665 = vmatpush.msrb.mxu0 %v10253_v0  ;;  %5715 = vmatpush.msrb.mxu1 %v10254_v36  ;;  %v10295_v0 = vld [vmem:[#allocation251_spill] sm:$0xff] }
 0x708   :  { %5471 = vmatmul.f32.vlgmr.msra.gmra.mxu1 %v9149_v8  ;;  %5500 = vmatpush.msra.mxu2 %v10251_v33  ;;  %v10261_v8 = vld [vmem:[#allocation214_spill] sm:$0xff] }
 0x709   :  { %5593 = vmatpush.msra.mxu3 %v10255_v7  ;;  %5668 = vmatpush.msrb.mxu0 %v10256_v29  ;;  %v10297_v7 = vld [vmem:[#allocation252_spill] sm:$0xff]  ;;  %v10298_v29 = vld [vmem:[#allocation195_spill] sm:$0xff] }
 0x70a   :  { %5717 = vmatpush.msrb.mxu1 %v10257_v40  ;;  %5502 = vmatpush.msra.mxu2 %v10254_v36 }
 0x70b   :  { %5599 = vmatpush.msra.mxu3 %v10258_v62  ;;  %5671 = vmatpush.msrb.mxu0 %v10259_v2  ;;  %v10300_v62 = vld [vmem:[#allocation199_spill] sm:$0xff] }
 0x70c   :  { %5381 = vmatmul.f32.vlgmr.msrb.gmra.mxu2 %v9155_v58  ;;  %5417 = vmatmul.f32.gmra.mxu3 %v5317_v43  ;;  %v10265_v58 = vld [vmem:[#allocation203_spill] sm:$0xff]  ;;  %v10272_v43 = vld [vmem:[#allocation204_spill] sm:$0xff] }
 0x70d   :  { %5719 = vmatpush.msrb.mxu1 %v10260_v18  ;;  %5504 = vmatpush.msra.mxu2 %v10257_v40  ;;  %v10301_v2 = vld [vmem:[#allocation259_spill] sm:$0xff] }
 0x70e   :  { %5448 = vmatmul.f32.gmra.mxu0 %v9163_v26  ;;  %5605 = vmatpush.msra.mxu3 %v10261_v8  ;;  %v10303_v8 = vld [vmem:[#allocation264_spill] sm:$0xff] }
 0x70f   :  { %5674 = vmatpush.msrb.mxu0 %v10262_v41  ;;  %5721 = vmatpush.msrb.mxu1 %v10263_v51  ;;  %v10304_v41 = vld [vmem:[#allocation207_spill] sm:$0xff] }
 0x710   :  { %5475 = vmatmul.f32.gmra.mxu1 %v9163_v26  ;;  %5506 = vmatpush.msra.mxu2 %v10260_v18  ;;  %v10270_v26 = vld [vmem:[#allocation225_spill] sm:$0xff] }
 0x711   :  { %5611 = vmatpush.msra.mxu3 %v10264_v19  ;;  %5677 = vmatpush.msrb.mxu0 %v10265_v58  ;;  %v10306_v19 = vld [vmem:[#allocation210_spill] sm:$0xff]  ;;  %v10307_v58 = vld [vmem:[#allocation268_spill] sm:$0xff] }
 0x712   :  { %5723 = vmatpush.msrb.mxu1 %v10266_v23  ;;  %5508 = vmatpush.msra.mxu2 %v10263_v51 }
 0x713   :  { %5617 = vmatpush.msra.mxu3 %v10267_v22  ;;  %5680 = vmatpush.msrb.mxu0 %v10268_v48  ;;  %v10309_v22 = vld [vmem:[#allocation270_spill] sm:$0xff]  ;;  %v10310_v48 = vld [vmem:[#allocation219_spill] sm:$0xff] }
 0x714   :  { %5386 = vmatmul.f32.gmra.mxu2 %v9169_v17  ;;  %5725 = vmatpush.msrb.mxu1 %v10269_v34  ;;  %v10276_v17 = vld [vmem:[#allocation228_spill] sm:$0xff] }
 0x715   :  { %5510 = vmatpush.msra.mxu2 %v10266_v23  ;;  %5623 = vmatpush.msra.mxu3 %v10270_v26  ;;  %v10312_v26 = vld [vmem:[#allocation224_spill] sm:$0xff] }
 0x716   :  { %5683 = vmatpush.msrb.mxu0 %v10271_v42  ;;  %5727 = vmatpush.msrb.mxu1 %v10272_v43  ;;  %v10313_v42 = vld [vmem:[#allocation226_spill] sm:$0xff] }
 0x717   :  { %5512 = vmatpush.msra.mxu2 %v10269_v34  ;;  %5629 = vmatpush.msra.mxu3 %v10273_v35 }
 0x718   :  { %5686 = vmatpush.msrb.mxu0 %v10274_v57  ;;  %5729 = vmatpush.msrb.mxu1 %v10275_v9 }
 0x719   :  { %5514 = vmatpush.msra.mxu2 %v10272_v43  ;;  %5635 = vmatpush.msra.mxu3 %v10276_v17 }
 0x71a   :  { %5689 = vmatpush.msrb.mxu0 %v10277_v14  ;;  %5731 = vmatpush.msrb.mxu1 %v10278_v5 }
 0x71b   :  { %5823 = vmatpush.msrb.mxu3 %v10239_v16  ;;  %5516 = vmatpush.msra.mxu2 %v10275_v9  ;;  %v10283_v16 = vld [vmem:[#allocation232_spill] sm:$0xff] }
 0x71c   :  { %5692 = vmatpush.msrb.mxu0 %v10279_v10  ;;  %5733 = vmatpush.msrb.mxu1 %v10280_v24 }
 0x71d   :  { %5825 = vmatpush.msrb.mxu3 %v10242_v46  ;;  %5518 = vmatpush.msra.mxu2 %v10278_v5  ;;  %v10284_v46 = vld [vmem:[#allocation168_spill] sm:$0xff] }
 0x71e   :  { %5864 = vmatpush.msra.mxu0 %v8260_v6  ;;  %5735 = vmatpush.msrb.mxu1 %v10281_v21 }
 0x71f   :  { %5827 = vmatpush.msrb.mxu3 %v10245_v27  ;;  %5520 = vmatpush.msra.mxu2 %v10280_v24  ;;  %v10287_v27 = vld [vmem:[#allocation239_spill] sm:$0xff] }
 0x720   :  { %5866 = vmatpush.msra.mxu0 %v8274_v37  ;;  %5917 = vmatpush.msra.mxu1 %v10282_v54 }
 0x721   :  { %5829 = vmatpush.msrb.mxu3 %v10248_v63  ;;  %5522 = vmatpush.msra.mxu2 %v10281_v21  ;;  %v10290_v63 = vld [vmem:[#allocation179_spill] sm:$0xff] }
 0x722   :  { %5868 = vmatpush.msra.mxu0 %v8290_v32  ;;  %5923 = vmatpush.msra.mxu1 %v10283_v16 }
 0x723   :  { %5752 = vmatpush.msrb.mxu2 %v10284_v46  ;;  %5831 = vmatpush.msrb.mxu3 %v10251_v33  ;;  %v10293_v33 = vld [vmem:[#allocation246_spill] sm:$0xff] }
 0x724   :  { %5870 = vmatpush.msra.mxu0 %v8306_v25  ;;  %5929 = vmatpush.msra.mxu1 %v10285_v38 }
 0x725   :  { %5756 = vmatpush.msrb.mxu2 %v10286_v55  ;;  %5833 = vmatpush.msrb.mxu3 %v10254_v36  ;;  %v10296_v36 = vld [vmem:[#allocation190_spill] sm:$0xff] }
 0x726   :  { %5872 = vmatpush.msra.mxu0 %v8324_v13  ;;  %5935 = vmatpush.msra.mxu1 %v10287_v27 }
 0x727   :  { %5760 = vmatpush.msrb.mxu2 %v10288_v56  ;;  %5835 = vmatpush.msrb.mxu3 %v10257_v40  ;;  %v10299_v40 = vld [vmem:[#allocation255_spill] sm:$0xff] }
 0x728   :  { %5874 = vmatpush.msra.mxu0 %v8342_v30  ;;  %5941 = vmatpush.msra.mxu1 %v10289_v60 }
 0x729   :  { %5764 = vmatpush.msrb.mxu2 %v10290_v63  ;;  %5837 = vmatpush.msrb.mxu3 %v10260_v18  ;;  %v10302_v18 = vld [vmem:[#allocation205_spill] sm:$0xff] }
 0x72a   :  { %5876 = vmatpush.msra.mxu0 %v8368_v11  ;;  %5947 = vmatpush.msra.mxu1 %v10291_v4 }
 0x72b   :  { %5768 = vmatpush.msrb.mxu2 %v10292_v44  ;;  %5839 = vmatpush.msrb.mxu3 %v10263_v51  ;;  %v10305_v51 = vld [vmem:[#allocation265_spill] sm:$0xff] }
 0x72c   :  { %5878 = vmatpush.msra.mxu0 %v8387_v15  ;;  %5953 = vmatpush.msra.mxu1 %v10293_v33 }
 0x72d   :  { %5772 = vmatpush.msrb.mxu2 %v10294_v47  ;;  %5841 = vmatpush.msrb.mxu3 %v10266_v23  ;;  %v10308_v23 = vld [vmem:[#allocation215_spill] sm:$0xff] }
 0x72e   :  { %5880 = vmatpush.msra.mxu0 %v8407_v61  ;;  %5959 = vmatpush.msra.mxu1 %v10295_v0 }
 0x72f   :  { %5776 = vmatpush.msrb.mxu2 %v10296_v36  ;;  %5843 = vmatpush.msrb.mxu3 %v10269_v34  ;;  %v10311_v34 = vld [vmem:[#allocation271_spill] sm:$0xff] }
 0x730   :  { %5882 = vmatpush.msra.mxu0 %v8424_v39  ;;  %5965 = vmatpush.msra.mxu1 %v10297_v7 }
 0x731   :  { %5780 = vmatpush.msrb.mxu2 %v10298_v29  ;;  %5845 = vmatpush.msrb.mxu3 %v10272_v43 }
 0x732   :  { %5884 = vmatpush.msra.mxu0 %v8448_v45  ;;  %5971 = vmatpush.msra.mxu1 %v10299_v40 }
 0x733   :  { %5784 = vmatpush.msrb.mxu2 %v10300_v62  ;;  %5847 = vmatpush.msrb.mxu3 %v10275_v9 }
 0x734   :  { %5886 = vmatpush.msra.mxu0 %v8469_v12  ;;  %5977 = vmatpush.msra.mxu1 %v10301_v2 }
 0x735   :  { %5788 = vmatpush.msrb.mxu2 %v10302_v18  ;;  %5849 = vmatpush.msrb.mxu3 %v10278_v5 }
 0x736   :  { %5888 = vmatpush.msra.mxu0 %v8490_v52  ;;  %5983 = vmatpush.msra.mxu1 %v10303_v8 }
 0x737   :  { %5792 = vmatpush.msrb.mxu2 %v10304_v41  ;;  %5851 = vmatpush.msrb.mxu3 %v10280_v24 }
 0x738   :  { %5890 = vmatpush.msra.mxu0 %v10060_v28  ;;  %5989 = vmatpush.msra.mxu1 %v10305_v51 }
 0x739   :  { %5796 = vmatpush.msrb.mxu2 %v10306_v19  ;;  %5853 = vmatpush.msrb.mxu3 %v10281_v21 }
 0x73a   :  { %5892 = vmatpush.msra.mxu0 %v8528_v50  ;;  %5995 = vmatpush.msra.mxu1 %v10307_v58 }
 0x73b   :  { %5800 = vmatpush.msrb.mxu2 %v10308_v23 }
 0x73c   :  { %5894 = vmatpush.msra.mxu0 %v8547_v1  ;;  %6001 = vmatpush.msra.mxu1 %v10309_v22 }
 0x73d   :  { %5804 = vmatpush.msrb.mxu2 %v10310_v48 }
 0x73e   :  { %6007 = vmatpush.msra.mxu1 %v10311_v34 }
 0x73f   :  { %5808 = vmatpush.msrb.mxu2 %v10312_v26 }
 0x741   :  { %5812 = vmatpush.msrb.mxu2 %v10313_v42 }
 0x763   :  { %v5089_v35 = vpop.f32.mrf.mxu0 }
 0x765   :  { %v5119_v57 = vpop.f32.mrf.mxu1 }
 0x767   :  { %v5059_v43 = vpop.f32.mrf.mxu3 }
 0x76b   :  { %v5094_v14 = vpop.f32.mrf.mxu0 }
 0x76d   :  { %v5125_v5 = vpop.f32.mrf.mxu1 }
 0x76f   :  { %v5020_v9 = vpop.f32.mrf.mxu2  ;;  %v5063_v17 = vpop.f32.mrf.mxu3 }
 0x770   :  { %v5060_v46 = vadd.f32 %v5059_v43, %v5020_v9 }
 0x772   :  { %v5090_v38 = vadd.f32 %v5089_v35, %v5060_v46 }
 0x773   :  { %v5313_v21 = vpop.f32.mrf.mxu0 }
 0x774   :  { %v5120_v63 = vadd.f32 %v5119_v57, %v5090_v38 }
 0x775   :  { %v5352_v54 = vpop.f32.mrf.mxu1 }
 0x776   :  { %v5353_v33 = vadd.f32 %v5352_v54, %v5313_v21 }
 0x777   :  { %v5028_v10 = vpop.f32.mrf.mxu2  ;;  %v5179_v24 = vpop.f32.mrf.mxu3 }
 0x778   :  { %v5064_v4 = vadd.f32 %v5063_v17, %v5028_v10 }
 0x77a   :  { %v5095_v47 = vadd.f32 %v5094_v14, %v5064_v4 }
 0x77b   :  { %v5321_v27 = vpop.f32.mrf.mxu0 }
 0x77c   :  { %v5126_v8 = vadd.f32 %v5125_v5, %v5095_v47 }
 0x77d   :  { %v5356_v60 = vpop.f32.mrf.mxu1 }
 0x77e   :  { %v5357_v19 = vadd.f32 %v5356_v60, %v5321_v27 }
 0x77f   :  { %v5152_v16 = vpop.f32.mrf.mxu2  ;;  %v5183_v55 = vpop.f32.mrf.mxu3 }
 0x780   :  { %v5153_v44 = vadd.f32 %v5152_v16, %v5120_v63 }
 0x782   :  { %v5180_v0 = vadd.f32 %v5179_v24, %v5153_v44 }
 0x783   :  { %v5445_v40 = vpop.f32.mrf.mxu0 }
 0x784   :  { %v5188_v2 = vmin.f32 %v5180_v0, 0.0  ;;  %vm5186_vm5 = vcmp.gt.f32.partialorder %v5180_v0, 0.0 }
 0x785   :  { %v5472_v18 = vpop.f32.mrf.mxu1 }
 0x786   :  { %v5190_v23 = vmul.f32 1.442695, %v5188_v2 }
 0x787   :  { %v5156_v56 = vpop.f32.mrf.mxu2  ;;  %v5412_v36 = vpop.f32.mrf.mxu3 }
 0x788   :  { %v5157_v51 = vadd.f32 %v5156_v56, %v5126_v8  ;;  %6823 = vpow2.f32 %v5190_v23  ;;  %v10316_v8 = vld [vmem:[#allocation237_spill] sm:$0xff]  ;;  %v10321_v23 = vld [vmem:[#allocation236_spill] sm:$0xff] }
 0x78a   :  { %v5184_v26 = vadd.f32 %v5183_v55, %v5157_v51  ;;  %v10319_v51 = vld [vmem:[#allocation233_spill] sm:$0xff] }
 0x78b   :  { %v5449_v57 = vpop.f32.mrf.mxu0 }
 0x78c   :  { %v5189_v17 = vmin.f32 %v5184_v26, 0.0  ;;  %vm5187_vm8 = vcmp.gt.f32.partialorder %v5184_v26, 0.0 }
 0x78d   :  { %v5476_v14 = vpop.f32.mrf.mxu1 }
 0x78e   :  { %v6824_v24 = vpop.eup %6823  ;;  %v5192_v21 = vmul.f32 1.442695, %v5189_v17  ;;  %v10336_v17 = vld [vmem:[#allocation269_spill] sm:$0xff] }
 0x78f   :  { %v5382_v7 = vpop.f32.mrf.mxu2  ;;  %v5418_v42 = vpop.f32.mrf.mxu3  ;;  %v6718_v38 = vadd.f32 -1.0, %v6824_v24 }
 0x790   :  { %v5383_v29 = vadd.f32 %v5382_v7, %v5353_v33 }
 0x791   :  { %v5196_v56 = vsel %vm5186_vm5, %v5180_v0, %v6718_v38 }
 0x792   :  { %v5413_v62 = vadd.f32 %v5412_v36, %v5383_v29  ;;  %v9316_v33 = vand.u32 4294901760, %v5196_v56 }
 0x794   :  { %v5446_v41 = vadd.f32 %v5445_v40, %v5413_v62  ;;  %v9326_v62 = vsub.f32 %v5196_v56, %v9316_v33 }
 0x796   :  { %v5473_v58 = vadd.f32 %v5472_v18, %v5446_v41  ;;  %v5897_v2 = vand.u32 4294901760, %v9326_v62  ;;  %v10314_v18 = vld [vmem:[#allocation235_spill] sm:$0xff] }
 0x797   :  { %v5387_v22 = vpop.f32.mrf.mxu2 }
 0x798   :  { %v5481_v48 = vmin.f32 %v5473_v58, 0.0  ;;  %v5388_v34 = vadd.f32 %v5387_v22, %v5357_v19  ;;  %vm5479_vm4 = vcmp.gt.f32.partialorder %v5473_v58, 0.0  ;;  %v10322_v22 = vld [vmem:[#allocation247_spill] sm:$0xff] }
 0x79a   :  { %v5483_v43 = vmul.f32 1.442695, %v5481_v48  ;;  %v5419_v35 = vadd.f32 %v5418_v42, %v5388_v34  ;;  %v10324_v48 = vld [vmem:[#allocation249_spill] sm:$0xff] }
 0x79c   :  { %6825 = vpow2.f32 %v5483_v43  ;;  %v5450_v9 = vadd.f32 %v5449_v57, %v5419_v35  ;;  %v10328_v43 = vld [vmem:[#allocation258_spill] sm:$0xff]  ;;  %v10330_v35 = vld [vmem:[#allocation260_spill] sm:$0xff] }
 0x79d   :  { %v10332_v57 = vld [vmem:[#allocation262_spill] sm:$0xff] }
 0x79e   :  { %v5477_v10 = vadd.f32 %v5476_v14, %v5450_v9  ;;  %v10334_v9 = vld [vmem:[#allocation266_spill] sm:$0xff]  ;;  %v10339_v14 = vld [vmem:[#allocation267_spill] sm:$0xff] }
 0x7a0   :  { %v5482_v5 = vmin.f32 %v5477_v10, 0.0  ;;  %vm5480_vm7 = vcmp.gt.f32.partialorder %v5477_v10, 0.0 }
 0x7a2   :  { %v6826_v54 = vpop.eup %6825  ;;  %v5485_v16 = vmul.f32 1.442695, %v5482_v5 }
 0x7a3   :  { %v6722_v46 = vadd.f32 -1.0, %v6826_v54 }
 0x7a4   :  { %6827 = vpow2.f32 %v5485_v16 }
 0x7a5   :  { %6829 = vpow2.f32 %v5192_v21  ;;  %v5489_v55 = vsel %vm5479_vm4, %v5473_v58, %v6722_v46  ;;  %v10320_v58 = vld [vmem:[#allocation245_spill] sm:$0xff] }
 0x7a6   :  { %v9311_v27 = vand.u32 4294901760, %v5489_v55 }
 0x7a8   :  { %5637 = vmatmul.f32.vlgmr.msra.gmra.mxu3 %v9311_v27  ;;  %v5524_v60 = vsub.f32 %v5489_v55, %v9311_v27 }
 0x7a9   :  { %6077 = vmatpush.msra.mxu3 %v8260_v6 }
 0x7aa   :  { %v6828_v63 = vpop.eup %6827  ;;  %5695 = vmatmul.f32.vlgmr.msrb.gmra.mxu0 %v5524_v60  ;;  %v5525_v4 = vand.u32 4294901760, %v5524_v60 }
 0x7ab   :  { %v6830_v44 = vpop.eup %6829  ;;  %6079 = vmatpush.msra.mxu3 %v8274_v37  ;;  %6124 = vmatpush.msrb.mxu0 %v8288_v53  ;;  %v6723_v47 = vadd.f32 -1.0, %v6828_v63 }
 0x7ac   :  { %5739 = vmatmul.f32.vlgmr.msrb.gmra.mxu1 %v5525_v4  ;;  %v5526_v36 = vsub.f32 %v5524_v60, %v5525_v4  ;;  %v6719_v7 = vadd.f32 -1.0, %v6830_v44 }
 0x7ad   :  { %6081 = vmatpush.msra.mxu3 %v8290_v32  ;;  %6128 = vmatpush.msrb.mxu0 %v8304_v3  ;;  %v5490_v0 = vsel %vm5480_vm7, %v5477_v10, %v6723_v47 }
 0x7ae   :  { %6195 = vmatpush.msrb.mxu1 %v8260_v6  ;;  %v5527_v29 = vand.u32 4294901760, %v5526_v36  ;;  %v9323_v40 = vand.u32 4294901760, %v5490_v0  ;;  %v5197_v3 = vsel %vm5187_vm8, %v5184_v26, %v6719_v7  ;;  %v10326_v26 = vld [vmem:[#allocation253_spill] sm:$0xff] }
 0x7af   :  { %6083 = vmatpush.msra.mxu3 %v8306_v25  ;;  %6132 = vmatpush.msrb.mxu0 %v8322_v49 }
 0x7b0   :  { %6197 = vmatpush.msrb.mxu1 %v8274_v37  ;;  %5528 = vmatmul.f32.vlgmr.msra.gmra.mxu2 %v5527_v29  ;;  %v5532_v53 = vsub.f32 %v5490_v0, %v9323_v40  ;;  %v9340_v37 = vand.u32 4294901760, %v5197_v3 }
 0x7b1   :  { %5641 = vmatmul.f32.gmra.mxu3 %v9323_v40  ;;  %6019 = vmatpush.msra.mxu2 %v8277_v31  ;;  %v10315_v31 = vld [vmem:[#allocation229_spill] sm:$0xff] }
 0x7b2   :  { %6085 = vmatpush.msra.mxu3 %v8324_v13  ;;  %6136 = vmatpush.msrb.mxu0 %v8351_v20  ;;  %v5533_v6 = vand.u32 4294901760, %v5532_v53  ;;  %v5904_v41 = vsub.f32 %v5197_v3, %v9340_v37 }
 0x7b3   :  { %6199 = vmatpush.msrb.mxu1 %v8290_v32  ;;  %5700 = vmatmul.f32.gmra.mxu0 %v5532_v53  ;;  %v5898_v32 = vsub.f32 %v9326_v62, %v5897_v2 }
 0x7b4   :  { %6022 = vmatpush.msra.mxu2 %v8293_v59  ;;  %6087 = vmatpush.msra.mxu3 %v8342_v30  ;;  %v5534_v49 = vsub.f32 %v5532_v53, %v5533_v6  ;;  %v10317_v59 = vld [vmem:[#allocation231_spill] sm:$0xff] }
 0x7b5   :  { %6140 = vmatpush.msrb.mxu0 %v10314_v18  ;;  %6201 = vmatpush.msrb.mxu1 %v8306_v25  ;;  %v10318_v25 = vld [vmem:[#allocation241_spill] sm:$0xff]  ;;  %v5899_v19 = vand.u32 4294901760, %v5898_v32 }
 0x7b6   :  { %5745 = vmatmul.f32.gmra.mxu1 %v5533_v6  ;;  %6025 = vmatpush.msra.mxu2 %v10315_v31  ;;  %v5535_v20 = vand.u32 4294901760, %v5534_v49 }
 0x7b7   :  { %6089 = vmatpush.msra.mxu3 %v8368_v11  ;;  %6144 = vmatpush.msrb.mxu0 %v10316_v8 }
 0x7b8   :  { %6203 = vmatpush.msrb.mxu1 %v8324_v13  ;;  %6028 = vmatpush.msra.mxu2 %v10317_v59  ;;  %v5905_v13 = vand.u32 4294901760, %v5904_v41 }
 0x7b9   :  { %6091 = vmatpush.msra.mxu3 %v8387_v15  ;;  %6148 = vmatpush.msrb.mxu0 %v10318_v25 }
 0x7ba   :  { %6205 = vmatpush.msrb.mxu1 %v8342_v30  ;;  %5536 = vmatmul.f32.gmra.mxu2 %v5535_v20  ;;  %v10323_v30 = vld [vmem:[#allocation238_spill] sm:$0xff]  ;;  %v5906_v34 = vsub.f32 %v5904_v41, %v5905_v13 }
 0x7bb   :  { %5855 = vmatmul.f32.vlgmr.msrb.gmra.mxu3 %v9311_v27  ;;  %6031 = vmatpush.msra.mxu2 %v10319_v51 }
 0x7bc   :  { %6093 = vmatpush.msra.mxu3 %v8407_v61  ;;  %6152 = vmatpush.msrb.mxu0 %v10320_v58  ;;  %v5907_v42 = vand.u32 4294901760, %v5906_v34 }
 0x7bd   :  { %6207 = vmatpush.msrb.mxu1 %v8368_v11  ;;  %5900 = vmatmul.f32.vlgmr.msra.gmra.mxu0 %v5899_v19  ;;  %v10325_v11 = vld [vmem:[#allocation242_spill] sm:$0xff]  ;;  %v6845_v19 = vld [vmem:[%s9435_s5] ss:$0 sm:$0xff]  ;;  %s6874_s5 = smov [#allocation2]  }
 0x7be   :  { %6034 = vmatpush.msra.mxu2 %v10321_v23  ;;  %6095 = vmatpush.msra.mxu3 %v8424_v39  ;;  %s6690_s23 = sshll.u32 %s6874_s5, 4  ;;  %s6691_s23 = int_to_ptr.vmem [resolvable:$true] %s6690_s23 }
 0x7bf   :  { %6156 = vmatpush.msrb.mxu0 %v10322_v22  ;;  %6209 = vmatpush.msrb.mxu1 %v8387_v15  ;;  %v10327_v15 = vld [vmem:[#allocation244_spill] sm:$0xff] }
 0x7c0   :  { %6009 = vmatmul.f32.vlgmr.msra.gmra.mxu1 %v9316_v33  ;;  %6037 = vmatpush.msra.mxu2 %v10323_v30 }
 0x7c1   :  { %6097 = vmatpush.msra.mxu3 %v8448_v45  ;;  %6160 = vmatpush.msrb.mxu0 %v10324_v48 }
 0x7c2   :  { %6211 = vmatpush.msrb.mxu1 %v8407_v61  ;;  %6040 = vmatpush.msra.mxu2 %v10325_v11  ;;  %v10329_v61 = vld [vmem:[#allocation248_spill] sm:$0xff] }
 0x7c3   :  { %6099 = vmatpush.msra.mxu3 %v8469_v12  ;;  %6164 = vmatpush.msrb.mxu0 %v10326_v26 }
 0x7c4   :  { %6213 = vmatpush.msrb.mxu1 %v8424_v39  ;;  %5814 = vmatmul.f32.vlgmr.msrb.gmra.mxu2 %v9311_v27  ;;  %v10331_v39 = vld [vmem:[#allocation250_spill] sm:$0xff] }
 0x7c5   :  { %5859 = vmatmul.f32.gmra.mxu3 %v9323_v40  ;;  %6043 = vmatpush.msra.mxu2 %v10327_v15 }
 0x7c6   :  { %6101 = vmatpush.msra.mxu3 %v8490_v52  ;;  %6168 = vmatpush.msrb.mxu0 %v10328_v43 }
 0x7c7   :  { %6215 = vmatpush.msrb.mxu1 %v8448_v45  ;;  %5908 = vmatmul.f32.gmra.mxu0 %v5907_v42  ;;  %v10333_v45 = vld [vmem:[#allocation254_spill] sm:$0xff] }
 0x7c8   :  { %6046 = vmatpush.msra.mxu2 %v10329_v61  ;;  %6103 = vmatpush.msra.mxu3 %v10060_v28 }
 0x7c9   :  { %6172 = vmatpush.msrb.mxu0 %v10330_v35  ;;  %6217 = vmatpush.msrb.mxu1 %v8469_v12  ;;  %v10335_v12 = vld [vmem:[#allocation257_spill] sm:$0xff] }
 0x7ca   :  { %6013 = vmatmul.f32.gmra.mxu1 %v9340_v37  ;;  %6049 = vmatpush.msra.mxu2 %v10331_v39 }
 0x7cb   :  { %6105 = vmatpush.msra.mxu3 %v8528_v50  ;;  %6176 = vmatpush.msrb.mxu0 %v10332_v57 }
 0x7cc   :  { %6219 = vmatpush.msrb.mxu1 %v8490_v52  ;;  %6052 = vmatpush.msra.mxu2 %v10333_v45  ;;  %v10337_v52 = vld [vmem:[#allocation261_spill] sm:$0xff] }
 0x7cd   :  { %6107 = vmatpush.msra.mxu3 %v8547_v1  ;;  %6180 = vmatpush.msrb.mxu0 %v10334_v9 }
 0x7ce   :  { %6221 = vmatpush.msrb.mxu1 %v10060_v28  ;;  %5818 = vmatmul.f32.gmra.mxu2 %v9323_v40  ;;  %v10338_v28 = vld [vmem:[#allocation263_spill] sm:$0xff] }
 0x7cf   :  { %6111 = vmatmul.f32.vlgmr.msra.gmra.mxu3 %v5897_v2  ;;  %6055 = vmatpush.msra.mxu2 %v10335_v12 }
 0x7d0   :  { %6184 = vmatpush.msrb.mxu0 %v10336_v17  ;;  %6223 = vmatpush.msrb.mxu1 %v8528_v50 }
 0x7d1   :  { %6186 = vmatmul.f32.vlgmr.msrb.gmra.mxu0 %v9316_v33  ;;  %6058 = vmatpush.msra.mxu2 %v10337_v52 }
 0x7d2   :  { %6225 = vmatpush.msrb.mxu1 %v8547_v1 }
 0x7d3   :  { %6227 = vmatmul.f32.vlgmr.msrb.gmra.mxu1 %v9316_v33  ;;  %6061 = vmatpush.msra.mxu2 %v10338_v28 }
 0x7d5   :  { %6064 = vmatpush.msra.mxu2 %v10339_v14 }
 0x7d6   :  { %6067 = vmatmul.f32.vlgmr.msra.gmra.mxu2 %v9326_v62 }
 0x7d7   :  { %6117 = vmatmul.f32.gmra.mxu3 %v5905_v13 }
 0x7d9   :  { %6190 = vmatmul.f32.gmra.mxu0 %v9340_v37 }
 0x7db   :  { %6231 = vmatmul.f32.gmra.mxu1 %v9340_v37 }
 0x7de   :  { %6072 = vmatmul.f32.gmra.mxu2 %v5904_v41 }
 0x827   :  { %v5696_v10 = vpop.f32.mrf.mxu0 }
 0x829   :  { %v5740_v24 = vpop.f32.mrf.mxu1 }
 0x82b   :  { %v5638_v50 = vpop.f32.mrf.mxu3 }
 0x830   :  { %v5701_v1 = vpop.f32.mrf.mxu0 }
 0x833   :  { %v5529_v5 = vpop.f32.mrf.mxu2  ;;  %v5746_v16 = vpop.f32.mrf.mxu1 }
 0x834   :  { %v5642_v21 = vpop.f32.mrf.mxu3  ;;  %v5639_v46 = vadd.f32 %v5638_v50, %v5529_v5 }
 0x836   :  { %v5697_v55 = vadd.f32 %v5696_v10, %v5639_v46  ;;  %v10340_v46 = vld [vmem:[#allocation274_spill] sm:$0xff] }
 0x838   :  { %v5741_v4 = vadd.f32 %v5740_v24, %v5697_v55  ;;  %v10342_v55 = vld [vmem:[#allocation273_spill] sm:$0xff] }
 0x83a   :  { %v5901_v27 = vpop.f32.mrf.mxu0 }
 0x83d   :  { %v5537_v54 = vpop.f32.mrf.mxu2  ;;  %v6010_v60 = vpop.f32.mrf.mxu1 }
 0x83e   :  { %v5856_v38 = vpop.f32.mrf.mxu3  ;;  %v5643_v63 = vadd.f32 %v5642_v21, %v5537_v54 }
 0x840   :  { %v5702_v33 = vadd.f32 %v5701_v1, %v5643_v63 }
 0x842   :  { %v5747_v29 = vadd.f32 %v5746_v16, %v5702_v33 }
 0x844   :  { %v5909_v0 = vpop.f32.mrf.mxu0 }
 0x847   :  { %v5815_v56 = vpop.f32.mrf.mxu2  ;;  %v6014_v40 = vpop.f32.mrf.mxu1 }
 0x848   :  { %v5816_v44 = vadd.f32 %v5815_v56, %v5741_v4  ;;  %v5860_v47 = vpop.f32.mrf.mxu3  ;;  %v10343_v56 = vld [vmem:[#allocation256_spill] sm:$0xff] }
 0x84a   :  { %v5857_v36 = vadd.f32 %v5856_v38, %v5816_v44  ;;  %v10341_v38 = vld [vmem:[#allocation272_spill] sm:$0xff] }
 0x84c   :  { %v5902_v53 = vadd.f32 %v5901_v27, %v5857_v36 }
 0x84e   :  { %v6011_v6 = vadd.f32 %v6010_v60, %v5902_v53  ;;  %v6187_v18 = vpop.f32.mrf.mxu0 }
 0x850   :  { %v6228_v8 = vpop.f32.mrf.mxu1 }
 0x851   :  { %v5819_v7 = vpop.f32.mrf.mxu2 }
 0x852   :  { %v5820_v62 = vadd.f32 %v5819_v7, %v5747_v29  ;;  %v6112_v2 = vpop.f32.mrf.mxu3 }
 0x854   :  { %v5861_v3 = vadd.f32 %v5860_v47, %v5820_v62 }
 0x856   :  { %v5910_v20 = vadd.f32 %v5909_v0, %v5861_v3  ;;  %v6191_v30 = vpop.f32.mrf.mxu0 }
 0x858   :  { %v6015_v41 = vadd.f32 %v6014_v40, %v5910_v20  ;;  %v6232_v26 = vpop.f32.mrf.mxu1 }
 0x859   :  { %v6068_v49 = vpop.f32.mrf.mxu2 }
 0x85a   :  { %v6069_v37 = vadd.f32 %v6068_v49, %v6011_v6  ;;  %v6118_v13 = vpop.f32.mrf.mxu3 }
 0x85c   :  { %v6113_v31 = vadd.f32 %v6112_v2, %v6069_v37 }
 0x85e   :  { %v6188_v32 = vadd.f32 %v6187_v18, %v6113_v31 }
 0x860   :  { %v6229_v59 = vadd.f32 %v6228_v8, %v6188_v32 }
 0x861   :  { %v6073_v25 = vpop.f32.mrf.mxu2 }
 0x862   :  { %v6074_v51 = vadd.f32 %v6073_v25, %v6015_v41  ;;  %v6235_v58 = vmul.f32 %v6845_v19, %v6229_v59  ;;  %v6244_v48 = vsel %vm101_vm0, %v6229_v59, 0  ;;  %v6507_v34 = vand.u32 4294901760, %v6229_v59 }
 0x863   :  { %v6265_v42 = vand.u32 4294901760, %v6244_v48 }
 0x864   :  { %v6119_v23 = vadd.f32 %v6118_v13, %v6074_v51  ;;  %v6237_v22 = vsel %vm101_vm0, %v6235_v58, 0.0  ;;  %v6547_v43 = vsub.f32 %v6229_v59, %v6507_v34 }
 0x865   :  { %6238 = vadd.xlane.f32.xlu1 %v6237_v22  ;;  %v6297_v9 = vsub.f32 %v6244_v48, %v6265_v42 }
 0x866   :  { %v6192_v11 = vadd.f32 %v6191_v30, %v6119_v23  ;;  %v6548_v52 = vand.u32 4294901760, %v6547_v43 }
 0x867   :  { %v6298_v10 = vand.u32 4294901760, %v6297_v9 }
 0x868   :  { %v6233_v15 = vadd.f32 %v6232_v26, %v6192_v11  ;;  %v6549_v24 = vsub.f32 %v6547_v43, %v6548_v52 }
 0x869   :  { %v6299_v54 = vsub.f32 %v6297_v9, %v6298_v10 }
 0x86a   :  { %v6247_v61 = vsel %vm101_vm0, %v6233_v15, 0  ;;  %v6236_v35 = vmul.f32 %v6845_v19, %v6233_v15  ;;  %v6505_v39 = vand.u32 4294901760, %v6233_v15  ;;  %v6550_v16 = vand.u32 4294901760, %v6549_v24 }
 0x86b   :  { %v6263_v57 = vand.u32 4294901760, %v6247_v61  ;;  %v6300_v27 = vand.u32 4294901760, %v6299_v54 }
 0x86c   :  { %v6240_v45 = vsel %vm101_vm0, %v6236_v35, 0.0  ;;  %v6541_v12 = vsub.f32 %v6233_v15, %v6505_v39 }
 0x86d   :  { %6264 = vmatpush.xpose.msrb.mxu2 %v6263_v57  ;;  %6348 = vmatpush.xpose.msra.mxu1 %v6263_v57  ;;  %v6291_v17 = vsub.f32 %v6247_v61, %v6263_v57 }
 0x86e   :  { %6241 = vadd.xlane.f32.xlu0 %v6240_v45  ;;  %v6542_v28 = vand.u32 4294901760, %v6541_v12 }
 0x86f   :  { %6323 = vmatpush.xpose.msra.mxu0 %v6291_v17  ;;  %v6292_v14 = vand.u32 4294901760, %v6291_v17 }
 0x870   :  { %v6543_v50 = vsub.f32 %v6541_v12, %v6542_v28 }
 0x871   :  { %6266 = vmatpush.xpose.msrb.mxu2 %v6265_v42  ;;  %6350 = vmatpush.xpose.msra.mxu1 %v6265_v42  ;;  %v6293_v5 = vsub.f32 %v6291_v17, %v6292_v14 }
 0x872   :  { %v6544_v21 = vand.u32 4294901760, %v6543_v50 }
 0x873   :  { %6326 = vmatpush.xpose.msra.mxu0 %v6297_v9  ;;  %v6294_v1 = vand.u32 4294901760, %v6293_v5 }
 0x874   :  { %6272 = vmatmul.f32.vlgmr.msrb.gmra.mxu2 %v10340_v46  ;;  %6354 = vmatmul.f32.vlgmr.msra.gmra.mxu1 %v10342_v55 }
 0x875   :  { %6375 = vmatpush.xpose.msra.mxu2 %v6292_v14  ;;  %6545 = vmatpush.msrb.mxu1 %v6544_v21 }
 0x876   :  { %6295 = vmatpush.xpose.msrb.mxu3 %v6294_v1  ;;  %6329 = vmatmul.f32.vlgmr.msra.gmra.mxu0 %v10341_v38 }
 0x877   :  { %6506 = vmatpush.msrb.mxu0 %v6505_v39  ;;  %6551 = vmatpush.msrb.mxu1 %v6550_v16 }
 0x879   :  { %6379 = vmatpush.xpose.msra.mxu2 %v6298_v10  ;;  %6508 = vmatpush.msrb.mxu0 %v6507_v34 }
 0x87a   :  { %6669 = vmatpush.msra.mxu1 %v6505_v39  ;;  %6301 = vmatpush.xpose.msrb.mxu3 %v6300_v27 }
 0x87b   :  { %6640 = vmatpush.msra.mxu0 %v6542_v28 }
 0x87c   :  { %6671 = vmatpush.msra.mxu1 %v6507_v34  ;;  %6381 = vmatmul.f32.vlgmr.msra.gmra.mxu2 %v10343_v56 }
 0x87d   :  { %6577 = vmatpush.msrb.mxu2 %v6541_v12  ;;  %6644 = vmatpush.msra.mxu0 %v6548_v52 }
 0x87e   :  { %6400 = vmatpush.xpose.msra.mxu3 %v6263_v57 }
 0x87f   :  { %6580 = vmatpush.msrb.mxu2 %v6547_v43  ;;  %6303 = vmatmul.f32.vlgmr.msrb.gmra.mxu3 %v10343_v56 }
 0x882   :  { %6402 = vmatpush.xpose.msra.mxu3 %v6265_v42 }
 0x886   :  { %6607 = vmatpush.msrb.mxu3 %v6505_v39 }
 0x887   :  { %6404 = vmatmul.f32.vlgmr.msra.gmra.mxu3 %v10343_v56 }
 0x888   :  { %6609 = vmatpush.msrb.mxu3 %v6507_v34 }
 0x8d8   :  { %v6239_v53 = vpop.xlane.xlu1 %6238 }
 0x8e1   :  { %v6242_v3 = vpop.xlane.xlu0 %6241 }
 0x8f1   :  { %v6355_v33 = vpop.f32.mrf.mxu1 }
 0x8f3   :  { %v6330_v4 = vpop.f32.mrf.mxu0 }
 0x8f7   :  { %v6273_v60 = vpop.f32.mrf.mxu2 }
 0x8ff   :  { %v6382_v36 = vpop.f32.mrf.mxu2 }
 0x902   :  { %v6304_v63 = vpop.f32.mrf.mxu3 }
 0x903   :  { %v6305_v44 = vadd.f32 %v6304_v63, %v6273_v60 }
 0x905   :  { %v6331_v47 = vadd.f32 %v6330_v4, %v6305_v44 }
 0x907   :  { %v6356_v0 = vadd.f32 %v6355_v33, %v6331_v47 }
 0x909   :  { %v6383_v7 = vadd.f32 %v6382_v36, %v6356_v0 }
 0x90a   :  { %v6405_v29 = vpop.f32.mrf.mxu3 }
 0x90b   :  { %v6406_v40 = vadd.f32 %v6405_v29, %v6383_v7 }
 0x90d   :  { %v6408_v62 = vperm.slane %v6406_v40, 0 }
 0x90f   :  { %v6409_v6 = vadd.f32 %v6408_v62, %v6239_v53  ;;  %v6410_v2 = vadd.f32 %v6408_v62, %v6242_v3 }
 0x911   :  { %vm6411_vm9 = vcmp.gt.f32.partialorder %v6409_v6, 0.0  ;;  %vm6412_vm10 = vcmp.gt.f32.partialorder %v6410_v2, 0.0  ;;  %v6413_v49 = vmul.f32 0.2, %v6409_v6  ;;  %v6414_v37 = vmul.f32 0.2, %v6410_v2 }
 0x913   :  { %v6415_v18 = vsel %vm6411_vm9, %v6409_v6, %v6413_v49  ;;  %v6416_v31 = vsel %vm6412_vm10, %v6410_v2, %v6414_v37 }
 0x914   :  { %v6724_v20 = vmul.f32 -1.442695, %v6415_v18  ;;  %v6725_v8 = vmul.f32 -1.442695, %v6416_v31 }
 0x916   :  { %6831 = vpow2.f32 %v6724_v20 }
 0x917   :  { %6833 = vpow2.f32 %v6725_v8 }
 0x91c   :  { %v6832_v32 = vpop.eup %6831 }
 0x91d   :  { %v6834_v59 = vpop.eup %6833  ;;  %v6423_v41 = vadd.f32 1.0, %v6832_v32 }
 0x91e   :  { %v6424_v25 = vadd.f32 1.0, %v6834_v59 }
 0x91f   :  { %6835 = vrcp.f32 %v6423_v41  ;;  %v6436_v22 = vand.u32 2147483648, %v6423_v41  ;;  %v6434_v34 = vand.u32 2147483647, %v6423_v41  ;;  %vm6430_vm13 = vweird.f32 %v6423_v41 }
 0x920   :  { %6837 = vrcp.f32 %v6424_v25  ;;  %v6451_v11 = vand.u32 2147483648, %v6424_v25  ;;  %v6449_v15 = vand.u32 2147483647, %v6424_v25  ;;  %vm6445_vm15 = vweird.f32 %v6424_v25 }
 0x921   :  { %v6437_v43 = vor.u32 1.1754944e-38, %v6436_v22  ;;  %vm6435_vm1 = vcmp.eq.f32.partialorder %v6434_v34, 8.507059e+37 }
 0x922   :  { %v6452_v35 = vor.u32 1.1754944e-38, %v6451_v11  ;;  %vm6450_vm3 = vcmp.eq.f32.partialorder %v6449_v15, 8.507059e+37 }
 0x925   :  { %v6836_v51 = vpop.eup %6835 }
 0x926   :  { %v6838_v19 = vpop.eup %6837  ;;  %v6426_v58 = vmul.f32 %v6836_v51, %v6423_v41  ;;  %vm6431_vm11 = vweird.f32 %v6836_v51 }
 0x927   :  { %v6441_v13 = vmul.f32 %v6838_v19, %v6424_v25  ;;  %vm6446_vm12 = vweird.f32 %v6838_v19  ;;  %vm6432_vm14 = vmor %vm6430_vm13, %vm6431_vm11 }
 0x928   :  { %v6427_v23 = vsub.f32 1.0, %v6426_v58  ;;  %vm6447_vm2 = vmor %vm6445_vm15, %vm6446_vm12 }
 0x929   :  { %v6442_v30 = vsub.f32 1.0, %v6441_v13 }
 0x92a   :  { %v6428_v48 = vmul.f32 %v6836_v51, %v6427_v23 }
 0x92b   :  { %v6443_v26 = vmul.f32 %v6838_v19, %v6442_v30 }
 0x92c   :  { %v6429_v42 = vadd.f32 %v6836_v51, %v6428_v48 }
 0x92d   :  { %v6444_v61 = vadd.f32 %v6838_v19, %v6443_v26 }
 0x92e   :  { %v6433_v39 = vsel %vm6432_vm14, %v6836_v51, %v6429_v42 }
 0x92f   :  { %v6448_v57 = vsel %vm6447_vm2, %v6838_v19, %v6444_v61  ;;  %v6438_v45 = vsel %vm6435_vm1, %v6437_v43, %v6433_v39 }
 0x930   :  { %v6453_v9 = vsel %vm6450_vm3, %v6452_v35, %v6448_v57  ;;  %v6455_v12 = vmul.f32 1.442695, %v6438_v45 }
 0x931   :  { %v6457_v17 = vmul.f32 1.442695, %v6453_v9 }
 0x932   :  { %6839 = vpow2.f32 %v6455_v12 }
 0x933   :  { %6841 = vpow2.f32 %v6457_v17 }
 0x938   :  { %v6840_v52 = vpop.eup %6839 }
 0x939   :  { %v6842_v28 = vpop.eup %6841  ;;  %v6459_v14 = vsel %vm1669_vm6, %v6840_v52, 0.0 }
 0x93a   :  { %v6460_v50 = vsel %vm1669_vm6, %v6842_v28, 0.0 }
 0x93b   :  { %v6461_v10 = vadd.f32 %v6460_v50, %v6459_v14 }
 0x93d   :  { %v6462_v5 = vrot.slane %v6461_v10, 4 }
 0x93f   :  { %v6463_v24 = vadd.f32 %v6462_v5, %v6461_v10 }
 0x941   :  { %v6464_v21 = vrot.slane %v6463_v24, 2 }
 0x943   :  { %v6465_v1 = vadd.f32 %v6464_v21, %v6463_v24 }
 0x945   :  { %v6466_v54 = vrot.slane %v6465_v1, 1 }
 0x947   :  { %v6467_v16 = vadd.f32 %v6466_v54, %v6465_v1 }
 0x949   :  { %6843 = vrcp.f32 %v6467_v16  ;;  %v6479_v27 = vand.u32 2147483648, %v6467_v16  ;;  %v6477_v60 = vand.u32 2147483647, %v6467_v16  ;;  %vm6473_vm5 = vweird.f32 %v6467_v16 }
 0x94b   :  { %v6480_v4 = vor.u32 1.1754944e-38, %v6479_v27  ;;  %vm6478_vm8 = vcmp.eq.f32.partialorder %v6477_v60, 8.507059e+37 }
 0x94f   :  { %v6844_v46 = vpop.eup %6843 }
 0x950   :  { %v6469_v38 = vmul.f32 %v6844_v46, %v6467_v16  ;;  %vm6474_vm4 = vweird.f32 %v6844_v46 }
 0x951   :  { %vm6475_vm7 = vmor %vm6473_vm5, %vm6474_vm4 }
 0x952   :  { %v6470_v55 = vsub.f32 1.0, %v6469_v38 }
 0x954   :  { %v6471_v56 = vmul.f32 %v6844_v46, %v6470_v55 }
 0x956   :  { %v6472_v63 = vadd.f32 %v6844_v46, %v6471_v56 }
 0x958   :  { %v6476_v44 = vsel %vm6475_vm7, %v6844_v46, %v6472_v63 }
 0x959   :  { %v6481_v33 = vsel %vm6478_vm8, %v6480_v4, %v6476_v44 }
 0x95a   :  { %v6483_v47 = vmul.f32 %v6840_v52, %v6481_v33  ;;  %v6484_v36 = vmul.f32 %v6842_v28, %v6481_v33 }
 0x95c   :  { %v6486_v0 = vsel %vm1669_vm6, %v6483_v47, 0  ;;  %v6489_v7 = vsel %vm1669_vm6, %v6484_v36, 0 }
 0x95d   :  { %v6509_v29 = vand.u32 4294901760, %v6486_v0  ;;  %v6517_v40 = vand.u32 4294901760, %v6489_v7 }
 0x95f   :  { %6553 = vmatmul.f32.vlgmr.msrb.gmra.mxu1 %v6509_v29  ;;  %v6510_v62 = vsub.f32 %v6486_v0, %v6509_v29  ;;  %v6518_v3 = vsub.f32 %v6489_v7, %v6517_v40 }
 0x961   :  { %6583 = vmatmul.f32.vlgmr.msrb.gmra.mxu2 %v6510_v62  ;;  %v6511_v53 = vand.u32 4294901760, %v6510_v62  ;;  %v6519_v49 = vand.u32 4294901760, %v6518_v3 }
 0x963   :  { %6613 = vmatmul.f32.vlgmr.msrb.gmra.mxu3 %v6511_v53  ;;  %v6512_v6 = vsub.f32 %v6510_v62, %v6511_v53  ;;  %v6520_v37 = vsub.f32 %v6518_v3, %v6519_v49 }
 0x965   :  { %v6513_v2 = vand.u32 4294901760, %v6512_v6  ;;  %v6521_v18 = vand.u32 4294901760, %v6520_v37 }
 0x967   :  { %6514 = vmatmul.f32.vlgmr.msrb.gmra.mxu0 %v6513_v2  ;;  %6557 = vmatmul.f32.gmra.mxu1 %v6517_v40 }
 0x969   :  { %6588 = vmatmul.f32.gmra.mxu2 %v6518_v3 }
 0x96b   :  { %6619 = vmatmul.f32.gmra.mxu3 %v6519_v49 }
 0x96f   :  { %6522 = vmatmul.f32.gmra.mxu0 %v6521_v18  ;;  %6673 = vmatmul.f32.vlgmr.msra.gmra.mxu1 %v6509_v29 }
 0x977   :  { %6646 = vmatmul.f32.vlgmr.msra.gmra.mxu0 %v6509_v29  ;;  %6677 = vmatmul.f32.gmra.mxu1 %v6517_v40 }
 0x97f   :  { %6650 = vmatmul.f32.gmra.mxu0 %v6517_v40 }
 0x9dc   :  { %v6554_v31 = vpop.f32.mrf.mxu1 }
 0x9e4   :  { %v6515_v20 = vpop.f32.mrf.mxu0  ;;  %v6558_v8 = vpop.f32.mrf.mxu1 }
 0x9e5   :  { %v6555_v32 = vadd.f32 %v6554_v31, %v6515_v20  ;;  %v6584_v59 = vpop.f32.mrf.mxu2 }
 0x9e6   :  { %v6614_v51 = vpop.f32.mrf.mxu3 }
 0x9e7   :  { %v6585_v25 = vadd.f32 %v6584_v59, %v6555_v32 }
 0x9e9   :  { %v6615_v19 = vadd.f32 %v6614_v51, %v6585_v25 }
 0x9ec   :  { %v6523_v41 = vpop.f32.mrf.mxu0  ;;  %v6674_v13 = vpop.f32.mrf.mxu1 }
 0x9ed   :  { %v6559_v58 = vadd.f32 %v6558_v8, %v6523_v41  ;;  %v6589_v30 = vpop.f32.mrf.mxu2 }
 0x9ee   :  { %v6620_v26 = vpop.f32.mrf.mxu3 }
 0x9ef   :  { %v6590_v48 = vadd.f32 %v6589_v30, %v6559_v58 }
 0x9f1   :  { %v6621_v15 = vadd.f32 %v6620_v26, %v6590_v48 }
 0x9f4   :  { %v6647_v23 = vpop.f32.mrf.mxu0  ;;  %v6678_v61 = vpop.f32.mrf.mxu1 }
 0x9f5   :  { %v6648_v22 = vadd.f32 %v6647_v23, %v6615_v19 }
 0x9f7   :  { %v6675_v34 = vadd.f32 %v6674_v13, %v6648_v22 }
 0x9f9   :  { %v6681_v11 = vmax.f32 %v6675_v34, 0.0 }
 0x9fb   :  { %6684 = vst.msk [vmem:[#allocation2 + $0x10] sm:$0xff] %vm101_vm0, %v6681_v11 }
 0x9fc   :  { %v6651_v42 = vpop.f32.mrf.mxu0 }
 0x9fd   :  { %v6652_v43 = vadd.f32 %v6651_v42, %v6621_v15 }
 0x9ff   :  { %v6679_v35 = vadd.f32 %v6678_v61, %v6652_v43 }
 0xa01   :  { %v6682_v39 = vmax.f32 %v6679_v35, 0.0 }
 0xa03   :  { %6685 = vst.msk [vmem:[#allocation2 + $0x18] sm:$0xff] %vm101_vm0, %v6682_v39 }
 0xa04   :  { %6698 = dma.vmem_to_hbm [thread:$0]  %s6691_s23, 512, %s6693_s26, [#allocation3], %s6875_s27, %s6875_s27, %s6876_s28  }
 0xa05   :  { %6870 = dma.done.wait [#allocation3], 512  }
 0xa06   :  { %6871 = vsyncadd [#allocation3], 4294966784 }
 0xa07   :  { %6703 = vsyncpa [#allocation3], 1 }

</bundles_post_ra>
